<compile_context>
chip_gen: v5e
topology: v5e:2x2
jax: 0.10.0
libtpu: 0.0.40
codegen_flags: <defaults>
</compile_context>

<pallas_src>
import functools

import jax
import jax.numpy as jnp
from jax.experimental import pallas as pl
from jax.experimental.pallas import tpu as pltpu

N_ITERS = 5  # default n_iters of the Richard_Lucy module


def _roll_rows(v, shift, size):
    """Circular roll along axis 0 (sublanes) on the XLU; static shift."""
    shift = shift % size
    if shift == 0:
        return v
    return pltpu.roll(v, shift=shift, axis=0)


def _rl_kernel(afwd_ref, aadj_ref, y_ref, x_ref, *, n_iters, kh, rh, hh):
    # afwd_ref : [kh*GW, GW]  stacked block-diag circulants (forward conv)
    # aadj_ref : [kh*GW, GW]  stacked block-diag circulants^T, pre-scaled by 1/sum(psf)
    # y_ref/x_ref : [H, GW]   one lane-dense slab of G images
    def conv(v, op_ref, sign):
        # kh XLU row-rolls + one fused MXU matmul (K = kh*GW).
        stacked = jnp.concatenate(
            [_roll_rows(v, sign * (a - rh), hh) for a in range(kh)], axis=1)
        return jnp.dot(stacked, op_ref[...], preferred_element_type=jnp.float32)

    y = jnp.maximum(y_ref[...], 0.0)              # torch.max(y, zeros_like(y))
    x = y                                         # x = y.clone()
    for _ in range(n_iters):                      # static RL iteration count
        hx = conv(x, afwd_ref, +1)                # conv_fft_batch(H, x)
        ratio = y / jnp.maximum(hx, 1e-12)        # guard against all-zero patches
        num = conv(ratio, aadj_ref, -1)           # conv_fft_batch(conj(H), y/Hx) / divisor
        x = x * num                               # divisor folded into aadj
    x_ref[...] = x


def _pick_group(n_imgs, w):
    """Images packed along lanes per grid step (lane-dense: G*W ~ 128)."""
    if w >= 128:
        return 1
    g = min(n_imgs, max(1, 128 // w))
    while n_imgs % g:
        g -= 1
    return max(g, 1)


def richard_lucy_pallas(y, psf, n_iters=N_ITERS):
    B, Cc, Hh, Ww = y.shape
    kh, kw = psf.shape[-2:]
    BC = B * Cc
    rh, rw = kh // 2, kw // 2
    psf2d = psf.reshape(kh, kw).astype(jnp.float32)

    G = _pick_group(BC, Ww)
    NB = BC // G
    GW = G * Ww

    # ---- W-direction circulants (one per PSF row), same ifftshift convention
    #      as psf_to_otf:  A[a][j2, j] = psf[a, (j - j2 + rw) % W] ----
    padded = jnp.zeros((kh, Ww), jnp.float32).at[:, :kw].set(psf2d)
    rolled = jnp.roll(padded, -rw, axis=1)                     # [kh, W]
    jw = jnp.arange(Ww)
    idx = (jw[None, :] - jw[:, None]) % Ww                     # idx[j2, j] = (j - j2) % W
    A = rolled[:, idx]                                         # [kh, W, W]

    # Block-diagonal over the G lane-packed images, stacked along K (a-major).
    eye_g = jnp.eye(G, dtype=jnp.float32)
    a_fwd = jax.vmap(lambda m: jnp.kron(eye_g, m))(A).reshape(kh * GW, GW)
    inv_div = 1.0 / jnp.sum(psf2d)                 # conv_H(ones) == sum(psf) everywhere
    a_adj = jax.vmap(lambda m: jnp.kron(eye_g, m.T))(A).reshape(kh * GW, GW) * inv_div

    # ---- lane-dense image slabs: [NB, H, G*W] (image g at lanes g*W:(g+1)*W) ----
    y_slab = (y.astype(jnp.float32).reshape(NB, G, Hh, Ww)
              .transpose(0, 2, 1, 3).reshape(NB, Hh, GW))

    # Generation-aware VMEM limit (v7x: 64 MiB physical, v5e/v6e: 128 MiB).
    try:
        vmem_cap = int(pltpu.get_tpu_info().vmem_capacity_bytes)
    except Exception:
        vmem_cap = 64 * 1024 * 1024
    vmem_limit = int(min((vmem_cap * 3) // 4, 112 * 1024 * 1024))

    flops = NB * n_iters * 2 * (2 * Hh * (kh * GW) * GW)
    bytes_accessed = (2 * BC * Hh * Ww + 2 * kh * GW * GW) * 4

    out = pl.pallas_call(
        functools.partial(_rl_kernel, n_iters=n_iters, kh=kh, rh=rh, hh=Hh),
        out_shape=jax.ShapeDtypeStruct((NB, Hh, GW), jnp.float32),
        grid=(NB,),
        in_specs=[
            pl.BlockSpec((kh * GW, GW), lambda b: (0, 0)),      # fwd operator (resident)
            pl.BlockSpec((kh * GW, GW), lambda b: (0, 0)),      # adj operator / divisor
            pl.BlockSpec((None, Hh, GW), lambda b: (b, 0, 0)),  # image slab b
        ],
        out_specs=pl.BlockSpec((None, Hh, GW), lambda b: (b, 0, 0)),
        compiler_params=pltpu.CompilerParams(
            dimension_semantics=("parallel",),
            vmem_limit_bytes=vmem_limit),
        cost_estimate=pl.CostEstimate(
            flops=flops, transcendentals=0, bytes_accessed=bytes_accessed),
    )(a_fwd, a_adj, y_slab)

    out = out.reshape(NB, Hh, G, Ww).transpose(0, 2, 1, 3)
    return out.reshape(B, Cc, Hh, Ww)


def richard_lucy_ref(y, psf, n_iters=N_ITERS):
    """Pure-JAX FFT reference matching the PyTorch module semantics."""
    B, Cc, Hh, Ww = y.shape
    kh, kw = psf.shape[-2:]
    padded = jnp.zeros((Hh, Ww), jnp.float32).at[:kh, :kw].set(
        psf.reshape(kh, kw).astype(jnp.float32))
    psf_shifted = jnp.roll(padded, (-(kh // 2), -(kw // 2)), axis=(0, 1))
    Hf = jnp.fft.fft2(psf_shifted)
    Htf = jnp.conj(Hf)
    conv = lambda Hc, v: jnp.real(jnp.fft.ifft2(jnp.fft.fft2(v) * Hc))
    y = jnp.maximum(y, 0.0)
    ones = jnp.ones_like(y)
    x = y
    for _ in range(n_iters):
        Hx = conv(Hf, x)
        num = conv(Htf, y / Hx)
        div = conv(Hf, ones)
        x = x * num / div
    return x


if __name__ == "__main__":
    key = jax.random.PRNGKey(0)
    B, Cc, Hh, Ww = 2, 4, 16, 16
    kh = kw = 5
    k1, k2 = jax.random.split(key)
    y = jax.random.uniform(k1, (B, Cc, Hh, Ww), jnp.float32, 0.1, 1.0)

    # deterministic, slightly asymmetric PSF (exercises H vs conj(H) paths and
    # the roll-direction convention), normalized to sum 1, shape [1, 1, 5, 5]
    g = jnp.arange(kh, dtype=jnp.float32) - (kh // 2)
    psf2d = jnp.exp(-(g[:, None] ** 2 + g[None, :] ** 2) / (2.0 * 1.2 ** 2))
    psf2d = psf2d * (1.0 + 0.25 * jax.random.uniform(k2, (kh, kw), jnp.float32))
    psf = (psf2d / jnp.sum(psf2d)).reshape(1, 1, kh, kw)

    out = jax.block_until_ready(richard_lucy_pallas(y, psf))
    ref = richard_lucy_ref(y, psf)
    err = float(jnp.max(jnp.abs(out - ref)))
    assert jnp.allclose(out, ref, rtol=2e-3, atol=2e-3), f"max abs err {err}"
    print("KERNEL_OK")
</pallas_src>

<mosaic_0001>
module attributes {stable_mosaic.version = 11 : i64} {
  func.func @_rl_kernel(%arg0: i32, %arg1: memref<640x128xf32, #tpu.memory_space<vmem>>, %arg2: memref<640x128xf32, #tpu.memory_space<vmem>>, %arg3: memref<1x16x128xf32, #tpu.memory_space<vmem>>, %arg4: memref<1x16x128xf32, #tpu.memory_space<vmem>>) attributes {dimension_semantics = [#tpu.dimension_semantics<parallel>], iteration_bounds = array<i64: 1>, scalar_prefetch = 0 : i64, scratch_operands = 0 : i64, tpu.core_type = #tpu.core_type<tc>, window_params = [{pipeline_mode = #tpu.pipeline_mode<synchronous>, transform_indices = @transform_0, window_bounds = array<i64: 640, 128>}, {pipeline_mode = #tpu.pipeline_mode<synchronous>, transform_indices = @transform_1, window_bounds = array<i64: 640, 128>}, {transform_indices = @transform_2, window_bounds = array<i64: 1, 16, 128>}, {transform_indices = @transform_3, window_bounds = array<i64: 1, 16, 128>}]} {
    %c0 = arith.constant 0 : index
    %c0_0 = arith.constant 0 : index
    %c0_1 = arith.constant 0 : index
    %0 = vector.load %arg3[%c0, %c0_0, %c0_1] : memref<1x16x128xf32, #tpu.memory_space<vmem>>, vector<1x16x128xf32>
    %1 = vector.shape_cast %0 : vector<1x16x128xf32> to vector<16x128xf32>
    %cst = arith.constant 0.000000e+00 : f32
    %2 = vector.broadcast %cst : f32 to vector<16x128xf32>
    %3 = arith.maximumf %1, %2 : vector<16x128xf32>
    %c14_i32 = arith.constant 14 : i32
    %4 = tpu.dynamic_rotate %3 by %c14_i32 dim 0 : vector<16x128xf32>, i32 -> vector<16x128xf32>
    %c15_i32 = arith.constant 15 : i32
    %5 = tpu.dynamic_rotate %3 by %c15_i32 dim 0 : vector<16x128xf32>, i32 -> vector<16x128xf32>
    %c1_i32 = arith.constant 1 : i32
    %6 = tpu.dynamic_rotate %3 by %c1_i32 dim 0 : vector<16x128xf32>, i32 -> vector<16x128xf32>
    %c2_i32 = arith.constant 2 : i32
    %7 = tpu.dynamic_rotate %3 by %c2_i32 dim 0 : vector<16x128xf32>, i32 -> vector<16x128xf32>
    %8 = tpu.concatenate %4, %5, %3, %6, %7 in 1 : vector<16x128xf32>, vector<16x128xf32>, vector<16x128xf32>, vector<16x128xf32>, vector<16x128xf32> -> vector<16x640xf32>
    %c0_2 = arith.constant 0 : index
    %c0_3 = arith.constant 0 : index
    %9 = vector.load %arg1[%c0_2, %c0_3] : memref<640x128xf32, #tpu.memory_space<vmem>>, vector<640x128xf32>
    %cst_4 = arith.constant dense<0.000000e+00> : vector<16x128xf32>
    %10 = tpu.matmul %8, %9, %cst_4 {dimension_numbers = #tpu.dot_dimension_numbers<[1], [0], [0], [1], [0, 0, 1, 1], [], []>} : vector<16x640xf32>, vector<640x128xf32>, vector<16x128xf32> -> vector<16x128xf32>
    %cst_5 = arith.constant 9.99999996E-13 : f32
    %11 = vector.broadcast %cst_5 : f32 to vector<16x128xf32>
    %12 = arith.maximumf %10, %11 : vector<16x128xf32>
    %13 = arith.divf %3, %12 : vector<16x128xf32>
    %c2_i32_6 = arith.constant 2 : i32
    %14 = tpu.dynamic_rotate %13 by %c2_i32_6 dim 0 : vector<16x128xf32>, i32 -> vector<16x128xf32>
    %c1_i32_7 = arith.constant 1 : i32
    %15 = tpu.dynamic_rotate %13 by %c1_i32_7 dim 0 : vector<16x128xf32>, i32 -> vector<16x128xf32>
    %c15_i32_8 = arith.constant 15 : i32
    %16 = tpu.dynamic_rotate %13 by %c15_i32_8 dim 0 : vector<16x128xf32>, i32 -> vector<16x128xf32>
    %c14_i32_9 = arith.constant 14 : i32
    %17 = tpu.dynamic_rotate %13 by %c14_i32_9 dim 0 : vector<16x128xf32>, i32 -> vector<16x128xf32>
    %18 = tpu.concatenate %14, %15, %13, %16, %17 in 1 : vector<16x128xf32>, vector<16x128xf32>, vector<16x128xf32>, vector<16x128xf32>, vector<16x128xf32> -> vector<16x640xf32>
    %c0_10 = arith.constant 0 : index
    %c0_11 = arith.constant 0 : index
    %19 = vector.load %arg2[%c0_10, %c0_11] : memref<640x128xf32, #tpu.memory_space<vmem>>, vector<640x128xf32>
    %cst_12 = arith.constant dense<0.000000e+00> : vector<16x128xf32>
    %20 = tpu.matmul %18, %19, %cst_12 {dimension_numbers = #tpu.dot_dimension_numbers<[1], [0], [0], [1], [0, 0, 1, 1], [], []>} : vector<16x640xf32>, vector<640x128xf32>, vector<16x128xf32> -> vector<16x128xf32>
    %21 = arith.mulf %3, %20 : vector<16x128xf32>
    %c14_i32_13 = arith.constant 14 : i32
    %22 = tpu.dynamic_rotate %21 by %c14_i32_13 dim 0 : vector<16x128xf32>, i32 -> vector<16x128xf32>
    %c15_i32_14 = arith.constant 15 : i32
    %23 = tpu.dynamic_rotate %21 by %c15_i32_14 dim 0 : vector<16x128xf32>, i32 -> vector<16x128xf32>
    %c1_i32_15 = arith.constant 1 : i32
    %24 = tpu.dynamic_rotate %21 by %c1_i32_15 dim 0 : vector<16x128xf32>, i32 -> vector<16x128xf32>
    %c2_i32_16 = arith.constant 2 : i32
    %25 = tpu.dynamic_rotate %21 by %c2_i32_16 dim 0 : vector<16x128xf32>, i32 -> vector<16x128xf32>
    %26 = tpu.concatenate %22, %23, %21, %24, %25 in 1 : vector<16x128xf32>, vector<16x128xf32>, vector<16x128xf32>, vector<16x128xf32>, vector<16x128xf32> -> vector<16x640xf32>
    %c0_17 = arith.constant 0 : index
    %c0_18 = arith.constant 0 : index
    %27 = vector.load %arg1[%c0_17, %c0_18] : memref<640x128xf32, #tpu.memory_space<vmem>>, vector<640x128xf32>
    %cst_19 = arith.constant dense<0.000000e+00> : vector<16x128xf32>
    %28 = tpu.matmul %26, %27, %cst_19 {dimension_numbers = #tpu.dot_dimension_numbers<[1], [0], [0], [1], [0, 0, 1, 1], [], []>} : vector<16x640xf32>, vector<640x128xf32>, vector<16x128xf32> -> vector<16x128xf32>
    %cst_20 = arith.constant 9.99999996E-13 : f32
    %29 = vector.broadcast %cst_20 : f32 to vector<16x128xf32>
    %30 = arith.maximumf %28, %29 : vector<16x128xf32>
    %31 = arith.divf %3, %30 : vector<16x128xf32>
    %c2_i32_21 = arith.constant 2 : i32
    %32 = tpu.dynamic_rotate %31 by %c2_i32_21 dim 0 : vector<16x128xf32>, i32 -> vector<16x128xf32>
    %c1_i32_22 = arith.constant 1 : i32
    %33 = tpu.dynamic_rotate %31 by %c1_i32_22 dim 0 : vector<16x128xf32>, i32 -> vector<16x128xf32>
    %c15_i32_23 = arith.constant 15 : i32
    %34 = tpu.dynamic_rotate %31 by %c15_i32_23 dim 0 : vector<16x128xf32>, i32 -> vector<16x128xf32>
    %c14_i32_24 = arith.constant 14 : i32
    %35 = tpu.dynamic_rotate %31 by %c14_i32_24 dim 0 : vector<16x128xf32>, i32 -> vector<16x128xf32>
    %36 = tpu.concatenate %32, %33, %31, %34, %35 in 1 : vector<16x128xf32>, vector<16x128xf32>, vector<16x128xf32>, vector<16x128xf32>, vector<16x128xf32> -> vector<16x640xf32>
    %c0_25 = arith.constant 0 : index
    %c0_26 = arith.constant 0 : index
    %37 = vector.load %arg2[%c0_25, %c0_26] : memref<640x128xf32, #tpu.memory_space<vmem>>, vector<640x128xf32>
    %cst_27 = arith.constant dense<0.000000e+00> : vector<16x128xf32>
    %38 = tpu.matmul %36, %37, %cst_27 {dimension_numbers = #tpu.dot_dimension_numbers<[1], [0], [0], [1], [0, 0, 1, 1], [], []>} : vector<16x640xf32>, vector<640x128xf32>, vector<16x128xf32> -> vector<16x128xf32>
    %39 = arith.mulf %21, %38 : vector<16x128xf32>
    %c14_i32_28 = arith.constant 14 : i32
    %40 = tpu.dynamic_rotate %39 by %c14_i32_28 dim 0 : vector<16x128xf32>, i32 -> vector<16x128xf32>
    %c15_i32_29 = arith.constant 15 : i32
    %41 = tpu.dynamic_rotate %39 by %c15_i32_29 dim 0 : vector<16x128xf32>, i32 -> vector<16x128xf32>
    %c1_i32_30 = arith.constant 1 : i32
    %42 = tpu.dynamic_rotate %39 by %c1_i32_30 dim 0 : vector<16x128xf32>, i32 -> vector<16x128xf32>
    %c2_i32_31 = arith.constant 2 : i32
    %43 = tpu.dynamic_rotate %39 by %c2_i32_31 dim 0 : vector<16x128xf32>, i32 -> vector<16x128xf32>
    %44 = tpu.concatenate %40, %41, %39, %42, %43 in 1 : vector<16x128xf32>, vector<16x128xf32>, vector<16x128xf32>, vector<16x128xf32>, vector<16x128xf32> -> vector<16x640xf32>
    %c0_32 = arith.constant 0 : index
    %c0_33 = arith.constant 0 : index
    %45 = vector.load %arg1[%c0_32, %c0_33] : memref<640x128xf32, #tpu.memory_space<vmem>>, vector<640x128xf32>
    %cst_34 = arith.constant dense<0.000000e+00> : vector<16x128xf32>
    %46 = tpu.matmul %44, %45, %cst_34 {dimension_numbers = #tpu.dot_dimension_numbers<[1], [0], [0], [1], [0, 0, 1, 1], [], []>} : vector<16x640xf32>, vector<640x128xf32>, vector<16x128xf32> -> vector<16x128xf32>
    %cst_35 = arith.constant 9.99999996E-13 : f32
    %47 = vector.broadcast %cst_35 : f32 to vector<16x128xf32>
    %48 = arith.maximumf %46, %47 : vector<16x128xf32>
    %49 = arith.divf %3, %48 : vector<16x128xf32>
    %c2_i32_36 = arith.constant 2 : i32
    %50 = tpu.dynamic_rotate %49 by %c2_i32_36 dim 0 : vector<16x128xf32>, i32 -> vector<16x128xf32>
    %c1_i32_37 = arith.constant 1 : i32
    %51 = tpu.dynamic_rotate %49 by %c1_i32_37 dim 0 : vector<16x128xf32>, i32 -> vector<16x128xf32>
    %c15_i32_38 = arith.constant 15 : i32
    %52 = tpu.dynamic_rotate %49 by %c15_i32_38 dim 0 : vector<16x128xf32>, i32 -> vector<16x128xf32>
    %c14_i32_39 = arith.constant 14 : i32
    %53 = tpu.dynamic_rotate %49 by %c14_i32_39 dim 0 : vector<16x128xf32>, i32 -> vector<16x128xf32>
    %54 = tpu.concatenate %50, %51, %49, %52, %53 in 1 : vector<16x128xf32>, vector<16x128xf32>, vector<16x128xf32>, vector<16x128xf32>, vector<16x128xf32> -> vector<16x640xf32>
    %c0_40 = arith.constant 0 : index
    %c0_41 = arith.constant 0 : index
    %55 = vector.load %arg2[%c0_40, %c0_41] : memref<640x128xf32, #tpu.memory_space<vmem>>, vector<640x128xf32>
    %cst_42 = arith.constant dense<0.000000e+00> : vector<16x128xf32>
    %56 = tpu.matmul %54, %55, %cst_42 {dimension_numbers = #tpu.dot_dimension_numbers<[1], [0], [0], [1], [0, 0, 1, 1], [], []>} : vector<16x640xf32>, vector<640x128xf32>, vector<16x128xf32> -> vector<16x128xf32>
    %57 = arith.mulf %39, %56 : vector<16x128xf32>
    %c14_i32_43 = arith.constant 14 : i32
    %58 = tpu.dynamic_rotate %57 by %c14_i32_43 dim 0 : vector<16x128xf32>, i32 -> vector<16x128xf32>
    %c15_i32_44 = arith.constant 15 : i32
    %59 = tpu.dynamic_rotate %57 by %c15_i32_44 dim 0 : vector<16x128xf32>, i32 -> vector<16x128xf32>
    %c1_i32_45 = arith.constant 1 : i32
    %60 = tpu.dynamic_rotate %57 by %c1_i32_45 dim 0 : vector<16x128xf32>, i32 -> vector<16x128xf32>
    %c2_i32_46 = arith.constant 2 : i32
    %61 = tpu.dynamic_rotate %57 by %c2_i32_46 dim 0 : vector<16x128xf32>, i32 -> vector<16x128xf32>
    %62 = tpu.concatenate %58, %59, %57, %60, %61 in 1 : vector<16x128xf32>, vector<16x128xf32>, vector<16x128xf32>, vector<16x128xf32>, vector<16x128xf32> -> vector<16x640xf32>
    %c0_47 = arith.constant 0 : index
    %c0_48 = arith.constant 0 : index
    %63 = vector.load %arg1[%c0_47, %c0_48] : memref<640x128xf32, #tpu.memory_space<vmem>>, vector<640x128xf32>
    %cst_49 = arith.constant dense<0.000000e+00> : vector<16x128xf32>
    %64 = tpu.matmul %62, %63, %cst_49 {dimension_numbers = #tpu.dot_dimension_numbers<[1], [0], [0], [1], [0, 0, 1, 1], [], []>} : vector<16x640xf32>, vector<640x128xf32>, vector<16x128xf32> -> vector<16x128xf32>
    %cst_50 = arith.constant 9.99999996E-13 : f32
    %65 = vector.broadcast %cst_50 : f32 to vector<16x128xf32>
    %66 = arith.maximumf %64, %65 : vector<16x128xf32>
    %67 = arith.divf %3, %66 : vector<16x128xf32>
    %c2_i32_51 = arith.constant 2 : i32
    %68 = tpu.dynamic_rotate %67 by %c2_i32_51 dim 0 : vector<16x128xf32>, i32 -> vector<16x128xf32>
    %c1_i32_52 = arith.constant 1 : i32
    %69 = tpu.dynamic_rotate %67 by %c1_i32_52 dim 0 : vector<16x128xf32>, i32 -> vector<16x128xf32>
    %c15_i32_53 = arith.constant 15 : i32
    %70 = tpu.dynamic_rotate %67 by %c15_i32_53 dim 0 : vector<16x128xf32>, i32 -> vector<16x128xf32>
    %c14_i32_54 = arith.constant 14 : i32
    %71 = tpu.dynamic_rotate %67 by %c14_i32_54 dim 0 : vector<16x128xf32>, i32 -> vector<16x128xf32>
    %72 = tpu.concatenate %68, %69, %67, %70, %71 in 1 : vector<16x128xf32>, vector<16x128xf32>, vector<16x128xf32>, vector<16x128xf32>, vector<16x128xf32> -> vector<16x640xf32>
    %c0_55 = arith.constant 0 : index
    %c0_56 = arith.constant 0 : index
    %73 = vector.load %arg2[%c0_55, %c0_56] : memref<640x128xf32, #tpu.memory_space<vmem>>, vector<640x128xf32>
    %cst_57 = arith.constant dense<0.000000e+00> : vector<16x128xf32>
    %74 = tpu.matmul %72, %73, %cst_57 {dimension_numbers = #tpu.dot_dimension_numbers<[1], [0], [0], [1], [0, 0, 1, 1], [], []>} : vector<16x640xf32>, vector<640x128xf32>, vector<16x128xf32> -> vector<16x128xf32>
    %75 = arith.mulf %57, %74 : vector<16x128xf32>
    %c14_i32_58 = arith.constant 14 : i32
    %76 = tpu.dynamic_rotate %75 by %c14_i32_58 dim 0 : vector<16x128xf32>, i32 -> vector<16x128xf32>
    %c15_i32_59 = arith.constant 15 : i32
    %77 = tpu.dynamic_rotate %75 by %c15_i32_59 dim 0 : vector<16x128xf32>, i32 -> vector<16x128xf32>
    %c1_i32_60 = arith.constant 1 : i32
    %78 = tpu.dynamic_rotate %75 by %c1_i32_60 dim 0 : vector<16x128xf32>, i32 -> vector<16x128xf32>
    %c2_i32_61 = arith.constant 2 : i32
    %79 = tpu.dynamic_rotate %75 by %c2_i32_61 dim 0 : vector<16x128xf32>, i32 -> vector<16x128xf32>
    %80 = tpu.concatenate %76, %77, %75, %78, %79 in 1 : vector<16x128xf32>, vector<16x128xf32>, vector<16x128xf32>, vector<16x128xf32>, vector<16x128xf32> -> vector<16x640xf32>
    %c0_62 = arith.constant 0 : index
    %c0_63 = arith.constant 0 : index
    %81 = vector.load %arg1[%c0_62, %c0_63] : memref<640x128xf32, #tpu.memory_space<vmem>>, vector<640x128xf32>
    %cst_64 = arith.constant dense<0.000000e+00> : vector<16x128xf32>
    %82 = tpu.matmul %80, %81, %cst_64 {dimension_numbers = #tpu.dot_dimension_numbers<[1], [0], [0], [1], [0, 0, 1, 1], [], []>} : vector<16x640xf32>, vector<640x128xf32>, vector<16x128xf32> -> vector<16x128xf32>
    %cst_65 = arith.constant 9.99999996E-13 : f32
    %83 = vector.broadcast %cst_65 : f32 to vector<16x128xf32>
    %84 = arith.maximumf %82, %83 : vector<16x128xf32>
    %85 = arith.divf %3, %84 : vector<16x128xf32>
    %c2_i32_66 = arith.constant 2 : i32
    %86 = tpu.dynamic_rotate %85 by %c2_i32_66 dim 0 : vector<16x128xf32>, i32 -> vector<16x128xf32>
    %c1_i32_67 = arith.constant 1 : i32
    %87 = tpu.dynamic_rotate %85 by %c1_i32_67 dim 0 : vector<16x128xf32>, i32 -> vector<16x128xf32>
    %c15_i32_68 = arith.constant 15 : i32
    %88 = tpu.dynamic_rotate %85 by %c15_i32_68 dim 0 : vector<16x128xf32>, i32 -> vector<16x128xf32>
    %c14_i32_69 = arith.constant 14 : i32
    %89 = tpu.dynamic_rotate %85 by %c14_i32_69 dim 0 : vector<16x128xf32>, i32 -> vector<16x128xf32>
    %90 = tpu.concatenate %86, %87, %85, %88, %89 in 1 : vector<16x128xf32>, vector<16x128xf32>, vector<16x128xf32>, vector<16x128xf32>, vector<16x128xf32> -> vector<16x640xf32>
    %c0_70 = arith.constant 0 : index
    %c0_71 = arith.constant 0 : index
    %91 = vector.load %arg2[%c0_70, %c0_71] : memref<640x128xf32, #tpu.memory_space<vmem>>, vector<640x128xf32>
    %cst_72 = arith.constant dense<0.000000e+00> : vector<16x128xf32>
    %92 = tpu.matmul %90, %91, %cst_72 {dimension_numbers = #tpu.dot_dimension_numbers<[1], [0], [0], [1], [0, 0, 1, 1], [], []>} : vector<16x640xf32>, vector<640x128xf32>, vector<16x128xf32> -> vector<16x128xf32>
    %93 = arith.mulf %75, %92 : vector<16x128xf32>
    %c0_73 = arith.constant 0 : index
    %c0_74 = arith.constant 0 : index
    %c0_75 = arith.constant 0 : index
    %94 = vector.load %arg4[%c0_73, %c0_74, %c0_75] : memref<1x16x128xf32, #tpu.memory_space<vmem>>, vector<1x16x128xf32>
    %95 = vector.shape_cast %94 : vector<1x16x128xf32> to vector<16x128xf32>
    %96 = vector.shape_cast %93 : vector<16x128xf32> to vector<1x16x128xf32>
    tpu.vector_store %arg4[%c0_73, %c0_74, %c0_75], %96 {strides = array<i32>} : memref<1x16x128xf32, #tpu.memory_space<vmem>>, vector<1x16x128xf32>,
    return
  }
  func.func @transform_0(%arg0: i32) -> (i32, i32) {
    %c0_i32 = arith.constant 0 : i32
    %c0_i32_0 = arith.constant 0 : i32
    %c0_i32_1 = arith.constant 0 : i32
    return %c0_i32, %c0_i32_0 : i32, i32
  }
  func.func @transform_1(%arg0: i32) -> (i32, i32) {
    %c0_i32 = arith.constant 0 : i32
    %c0_i32_0 = arith.constant 0 : i32
    %c0_i32_1 = arith.constant 0 : i32
    return %c0_i32, %c0_i32_0 : i32, i32
  }
  func.func @transform_2(%arg0: i32) -> (i32, i32, i32) {
    %c0_i32 = arith.constant 0 : i32
    %c0_i32_0 = arith.constant 0 : i32
    %c0_i32_1 = arith.constant 0 : i32
    return %arg0, %c0_i32, %c0_i32_0 : i32, i32, i32
  }
  func.func @transform_3(%arg0: i32) -> (i32, i32, i32) {
    %c0_i32 = arith.constant 0 : i32
    %c0_i32_0 = arith.constant 0 : i32
    %c0_i32_1 = arith.constant 0 : i32
    return %arg0, %c0_i32, %c0_i32_0 : i32, i32, i32
  }
}

</mosaic_0001>

<bundles_post_ra>
// kernel: tpu_custom_call.1
= control target key start
LH: loop header
LB: loop body
LE: loop exit
PB: predicated region body
PF: predicated region fallthrough
CT: control target
= control target key end

     0   :  { %8 = vsyncpa [#allocation3], 0  ;;  %s3856_s0 = inlined_call_operand.hbm [shape: f32[640,128], index: 0, kind: input, shape index: {}]   ;;  %s3857_s1 = inlined_call_operand.hbm [shape: f32[640,128], index: 1, kind: input, shape index: {}]   ;;  %s3858_s2 = inlined_call_operand.hbm [shape: f32[1,16,128], index: 2, kind: input, shape index: {}]   ;;  %s3859_s3 = inlined_call_operand.hbm [shape: f32[1,16,128], index: 3, kind: output, shape index: {}]  }
   0x1   :  { %9 = vsyncpa [#allocation6], 0 }
   0x2   :  { %10 = vsyncpa [#allocation4], 0  ;;  %s28_s14 = sshll.u32 %s3857_s1, 4  ;;  %s2208_s15 = smov [#allocation5]   ;;  %s29_s14 = int_to_ptr.hbm [resolvable:$true] %s28_s14 }
   0x3   :  { %s30_s16 = sshll.u32 %s2208_s15, 4  ;;  %s15_s19 = sshll.u32 %s3856_s0, 4  ;;  %s31_s16 = int_to_ptr.vmem [resolvable:$true] %s30_s16  ;;  %s16_s19 = int_to_ptr.hbm [resolvable:$true] %s15_s19 }
   0x4   :  { %s2209_s20 = smov 128   ;;  %s2210_s21 = smov 8  }
   0x5   :  { %36 = dma.hbm_to_vmem [thread:$0]  %s29_s14, 10240, %s31_s16, [#allocation6], %s2209_s20, %s2209_s20, %s2210_s21  }
   0x6   :  { %s2211_s22 = smov [#allocation2]   ;;  %s41_s1 = sshll.u32 %s3858_s2, 4  ;;  %s42_s1 = int_to_ptr.hbm [resolvable:$true] %s41_s1 }
   0x7   :  { %s17_s23 = sshll.u32 %s2211_s22, 4  ;;  %s2212_s0 = smov [#allocation7]   ;;  %s18_s23 = int_to_ptr.vmem [resolvable:$true] %s17_s23 }
   0x8   :  { %23 = dma.hbm_to_vmem [thread:$0]  %s16_s19, 10240, %s18_s23, [#allocation3], %s2209_s20, %s2209_s20, %s2210_s21  }
   0x9   :  { %s43_s26 = sshll.u32 %s2212_s0, 4  ;;  %s44_s26 = int_to_ptr.vmem [resolvable:$true] %s43_s26 }
   0xa   :  { %49 = dma.hbm_to_vmem [thread:$0]  %s42_s1, 256, %s44_s26, [#allocation6], %s2209_s20, %s2209_s20, %s2210_s21  }
   0xb   :  { %2202 = dma.done.wait [#allocation3], 10240  }
   0xc   :  { %2203 = vsyncadd [#allocation3], 4294957056 }
   0xd   :  { %2204 = dma.done.wait [#allocation6], 10496  }
   0xe   :  { %2205 = vsyncadd [#allocation6], 4294956800  ;;  %v2252_v0 = vld [vmem:[#allocation2 + $0x78] sm:$0xff]  ;;  %v2254_v1 = vld [vmem:[#allocation2 + $0x70] sm:$0xff]  ;;  %v68_v45 = vlaneseq  ;;  %s2213_s2 = smov [#allocation8]   ;;  %s1720_s30 = sshll.u32 %s3859_s3, 4  ;;  %s1721_s30 = int_to_ptr.hbm [resolvable:$true] %s1720_s30 }
   0xf   :  { %168 = vmatpush.msra.mxu0 %v2252_v0  ;;  %v2257_v2 = vld [vmem:[#allocation2 + $0x68] sm:$0xff]  ;;  %v2259_v3 = vld [vmem:[#allocation2 + $0x178] sm:$0xff]  ;;  %v2261_v4 = vld [vmem:[#allocation2 + $0x170] sm:$0xff]  ;;  %s1718_s27 = sshll.u32 %s2213_s2, 4  ;;  %s1719_s27 = int_to_ptr.vmem [resolvable:$true] %s1718_s27 }
  0x10   :  { %214 = vmatpush.msra.mxu2 %v2259_v3  ;;  %v2265_v5 = vld [vmem:[#allocation2 + $0x1f8] sm:$0xff]  ;;  %v2269_v7 = vld [vmem:[#allocation2 + $0x60] sm:$0xff]  ;;  %v2273_v8 = vld [vmem:[#allocation2 + $0x168] sm:$0xff]  ;;  %v2409_v58 = vshrl.u32 %v68_v45, 7 }
  0x11   :  { %169 = vmatpush.msra.mxu0 %v2254_v1  ;;  %4046 = vst [vmem:[#allocation12_spill] sm:$0xff] %v2265_v5  ;;  %v2267_v6 = vld [vmem:[#allocation2 + $0xf8] sm:$0xff]  ;;  %237 = vmatpush.msra.mxu3 %v2265_v5  ;;  %v2275_v9 = vld [vmem:[#allocation2 + $0x1f0] sm:$0xff]  ;;  %v2281_v11 = vld [vmem:[#allocation2 + $0x1e8] sm:$0xff] }
  0x12   :  { %191 = vmatpush.msra.mxu1 %v2267_v6  ;;  %4047 = vst [vmem:[#allocation13_spill] sm:$0xff] %v2275_v9  ;;  %215 = vmatpush.msra.mxu2 %v2261_v4  ;;  %v2279_v10 = vld [vmem:[#allocation2 + $0xf0] sm:$0xff]  ;;  %v2283_v12 = vld [vmem:[#allocation2 + $0x58] sm:$0xff]  ;;  %v2287_v13 = vld [vmem:[#allocation2 + $0x160] sm:$0xff]  ;;  %vm80_vm0 = vcmp.lt.s32.totalorder %v2409_v58, 1  ;;  %vm70_vm1 = vcmp.lt.s32.totalorder %v2409_v58, 6 }
  0x13   :  { %170 = vmatpush.msra.mxu0 %v2257_v2  ;;  %4048 = vst [vmem:[#allocation14_spill] sm:$0xff] %v2281_v11  ;;  %238 = vmatpush.msra.mxu3 %v2275_v9  ;;  %v2289_v14 = vld [vmem:[#allocation2 + $0xe8] sm:$0xff]  ;;  %v2293_v15 = vld [vmem:[#allocation2 + $0x1e0] sm:$0xff]  ;;  %v2297_v17 = vld [vmem:[#allocation2 + $0x50] sm:$0xff]  ;;  %vm75_vm2 = vcmp.lt.s32.totalorder %v2409_v58, 7  ;;  %vm85_vm3 = vcmp.lt.s32.totalorder %v2409_v58, 2 }
  0x14   :  { %192 = vmatpush.msra.mxu1 %v2279_v10  ;;  %216 = vmatpush.msra.mxu2 %v2273_v8  ;;  %4049 = vst [vmem:[#allocation15_spill] sm:$0xff] %v2293_v15  ;;  %v2295_v16 = vld [vmem:[#allocation2 + $0xe0] sm:$0xff]  ;;  %v2301_v18 = vld [vmem:[#allocation2 + $0x158] sm:$0xff]  ;;  %v2309_v21 = vld [vmem:[#allocation2 + $0x48] sm:$0xff] }
  0x15   :  { %171 = vmatpush.msra.mxu0 %v2269_v7  ;;  %239 = vmatpush.msra.mxu3 %v2281_v11  ;;  %v2305_v19 = vld [vmem:[#allocation2 + $0x1d8] sm:$0xff]  ;;  %v2313_v22 = vld [vmem:[#allocation2 + $0x150] sm:$0xff]  ;;  %v2321_v25 = vld [vmem:[#allocation2 + $0x40] sm:$0xff]  ;;  %4059 = vst [vmem:[#allocation25_spill] sm:$0xff] %v2409_v58 }
  0x16   :  { %193 = vmatpush.msra.mxu1 %v2289_v14  ;;  %217 = vmatpush.msra.mxu2 %v2287_v13  ;;  %4050 = vst [vmem:[#allocation16_spill] sm:$0xff] %v2305_v19  ;;  %v2307_v20 = vld [vmem:[#allocation2 + $0xd8] sm:$0xff]  ;;  %v2317_v23 = vld [vmem:[#allocation2 + $0x1d0] sm:$0xff]  ;;  %v2325_v26 = vld [vmem:[#allocation2 + $0x148] sm:$0xff] }
  0x17   :  { %172 = vmatpush.msra.mxu0 %v2283_v12  ;;  %240 = vmatpush.msra.mxu3 %v2293_v15  ;;  %4051 = vst [vmem:[#allocation17_spill] sm:$0xff] %v2317_v23  ;;  %v2319_v24 = vld [vmem:[#allocation2 + $0xd0] sm:$0xff]  ;;  %v2329_v27 = vld [vmem:[#allocation2 + $0x1c8] sm:$0xff]  ;;  %v2333_v29 = vld [vmem:[#allocation2 + $0x38] sm:$0xff] }
  0x18   :  { %194 = vmatpush.msra.mxu1 %v2295_v16  ;;  %218 = vmatpush.msra.mxu2 %v2301_v18  ;;  %4052 = vst [vmem:[#allocation18_spill] sm:$0xff] %v2329_v27  ;;  %v2331_v28 = vld [vmem:[#allocation2 + $0xc8] sm:$0xff]  ;;  %v2337_v30 = vld [vmem:[#allocation2 + $0x140] sm:$0xff]  ;;  %v2345_v33 = vld [vmem:[#allocation2 + $0x30] sm:$0xff] }
  0x19   :  { %173 = vmatpush.msra.mxu0 %v2297_v17  ;;  %241 = vmatpush.msra.mxu3 %v2305_v19  ;;  %v2341_v31 = vld [vmem:[#allocation2 + $0x1c0] sm:$0xff]  ;;  %v2349_v34 = vld [vmem:[#allocation2 + $0x138] sm:$0xff]  ;;  %v2357_v37 = vld [vmem:[#allocation2 + $0x28] sm:$0xff] }
  0x1a   :  { %195 = vmatpush.msra.mxu1 %v2307_v20  ;;  %219 = vmatpush.msra.mxu2 %v2313_v22  ;;  %4053 = vst [vmem:[#allocation19_spill] sm:$0xff] %v2341_v31  ;;  %v2343_v32 = vld [vmem:[#allocation2 + $0xc0] sm:$0xff]  ;;  %v2353_v35 = vld [vmem:[#allocation2 + $0x1b8] sm:$0xff]  ;;  %v2361_v38 = vld [vmem:[#allocation2 + $0x130] sm:$0xff] }
  0x1b   :  { %174 = vmatpush.msra.mxu0 %v2309_v21  ;;  %242 = vmatpush.msra.mxu3 %v2317_v23  ;;  %4054 = vst [vmem:[#allocation20_spill] sm:$0xff] %v2353_v35  ;;  %v2355_v36 = vld [vmem:[#allocation2 + $0xb8] sm:$0xff]  ;;  %v2365_v39 = vld [vmem:[#allocation2 + $0x1b0] sm:$0xff]  ;;  %v2369_v41 = vld [vmem:[#allocation2 + $0x20] sm:$0xff] }
  0x1c   :  { %196 = vmatpush.msra.mxu1 %v2319_v24  ;;  %220 = vmatpush.msra.mxu2 %v2325_v26  ;;  %4055 = vst [vmem:[#allocation21_spill] sm:$0xff] %v2365_v39  ;;  %v2367_v40 = vld [vmem:[#allocation2 + $0xb0] sm:$0xff]  ;;  %v2373_v42 = vld [vmem:[#allocation2 + $0x128] sm:$0xff]  ;;  %v2381_v46 = vld [vmem:[#allocation2 + $0x18] sm:$0xff] }
  0x1d   :  { %175 = vmatpush.msra.mxu0 %v2321_v25  ;;  %243 = vmatpush.msra.mxu3 %v2329_v27  ;;  %v2377_v43 = vld [vmem:[#allocation2 + $0x1a8] sm:$0xff]  ;;  %v2385_v47 = vld [vmem:[#allocation2 + $0x120] sm:$0xff]  ;;  %v2393_v52 = vld [vmem:[#allocation2 + $0x10] sm:$0xff] }
  0x1e   :  { %197 = vmatpush.msra.mxu1 %v2331_v28  ;;  %221 = vmatpush.msra.mxu2 %v2337_v30  ;;  %4056 = vst [vmem:[#allocation22_spill] sm:$0xff] %v2377_v43  ;;  %v2379_v44 = vld [vmem:[#allocation2 + $0xa8] sm:$0xff]  ;;  %v62_v48 = vld [vmem:[#allocation7] sm:$0xff]  ;;  %v2397_v53 = vld [vmem:[#allocation2 + $0x118] sm:$0xff] }
  0x1f   :  { %176 = vmatpush.msra.mxu0 %v2333_v29  ;;  %244 = vmatpush.msra.mxu3 %v2341_v31  ;;  %v2389_v49 = vld [vmem:[#allocation2 + $0x1a0] sm:$0xff]  ;;  %v63_v51 = vld [vmem:[#allocation7 + $0x8] sm:$0xff]  ;;  %v2401_v54 = vld [vmem:[#allocation2 + $0x198] sm:$0xff]  ;;  %v2405_v56 = vmax.f32 %v62_v48, 0.0 }
  0x20   :  { %198 = vmatpush.msra.mxu1 %v2343_v32  ;;  %222 = vmatpush.msra.mxu2 %v2349_v34  ;;  %4057 = vst [vmem:[#allocation23_spill] sm:$0xff] %v2389_v49  ;;  %v2391_v50 = vld [vmem:[#allocation2 + $0xa0] sm:$0xff]  ;;  %v2403_v55 = vld [vmem:[#allocation2 + $0x98] sm:$0xff]  ;;  %v2407_v57 = vmax.f32 %v63_v51, 0.0  ;;  %v2411_v59 = vld [vmem:[#allocation2 + $0x8] sm:$0xff] }
  0x21   :  { %177 = vmatpush.msra.mxu0 %v2345_v33  ;;  %245 = vmatpush.msra.mxu3 %v2353_v35  ;;  %4058 = vst [vmem:[#allocation24_spill] sm:$0xff] %v2401_v54  ;;  %v2415_v60 = vld [vmem:[#allocation2 + $0x110] sm:$0xff]  ;;  %v2423_v63 = vld [vmem:[#allocation2] sm:$0xff]  ;;  %v2427_v45 = vld [vmem:[#allocation2 + $0x108] sm:$0xff]  ;;  %v66_v35 = vrot.slane %v2405_v56, 2  ;;  %v73_v27 = vrot.slane %v2405_v56, 1 }
  0x22   :  { %199 = vmatpush.msra.mxu1 %v2355_v36  ;;  %223 = vmatpush.msra.mxu2 %v2361_v38  ;;  %v2419_v61 = vld [vmem:[#allocation2 + $0x190] sm:$0xff]  ;;  %4061 = vst [vmem:[#allocation27_spill] sm:$0xff] %v2423_v63  ;;  %v2430_v48 = vld [vmem:[#allocation2 + $0x278] sm:$0xff]  ;;  %v2433_v51 = vld [vmem:[#allocation2 + $0x188] sm:$0xff]  ;;  %v67_v31 = vrot.slane %v2407_v57, 2  ;;  %v74_v23 = vrot.slane %v2407_v57, 1 }
  0x23   :  { %178 = vmatpush.msra.mxu0 %v2357_v37  ;;  %246 = vmatpush.msra.mxu3 %v2365_v39  ;;  %4060 = vst [vmem:[#allocation26_spill] sm:$0xff] %v2419_v61  ;;  %v2421_v62 = vld [vmem:[#allocation2 + $0x90] sm:$0xff]  ;;  %v2442_v39 = vld [vmem:[#allocation2 + $0x88] sm:$0xff]  ;;  %v2458_v15 = vld [vmem:[#allocation2 + $0x80] sm:$0xff] }
  0x24   :  { %200 = vmatpush.msra.mxu1 %v2367_v40  ;;  %224 = vmatpush.msra.mxu2 %v2373_v42  ;;  %4062 = vst [vmem:[#allocation28_spill] sm:$0xff] %v2430_v48  ;;  %v2449_v19 = vld [vmem:[#allocation2 + $0x270] sm:$0xff]  ;;  %v2460_v11 = vld [vmem:[#allocation2 + $0x268] sm:$0xff]  ;;  %v2472_v5 = vld [vmem:[#allocation2 + $0x260] sm:$0xff] }
  0x25   :  { %179 = vmatpush.msra.mxu0 %v2369_v41  ;;  %247 = vmatpush.msra.mxu3 %v2377_v43  ;;  %4063 = vst [vmem:[#allocation29_spill] sm:$0xff] %v2433_v51  ;;  %v79_v43 = vrot.slane %v2407_v57, 7  ;;  %v2694_v58 = vld [vmem:[#allocation5 + $0x268] sm:$0xff] }
  0x26   :  { %201 = vmatpush.msra.mxu1 %v2379_v44  ;;  %225 = vmatpush.msra.mxu2 %v2385_v47  ;;  %4065 = vst [vmem:[#allocation31_spill] sm:$0xff] %v2449_v19 }
  0x27   :  { %180 = vmatpush.msra.mxu0 %v2381_v46  ;;  %248 = vmatpush.msra.mxu3 %v2389_v49  ;;  %v78_v49 = vrot.slane %v2405_v56, 7  ;;  %4067 = vst [vmem:[#allocation33_spill] sm:$0xff] %v2460_v11 }
  0x28   :  { %202 = vmatpush.msra.mxu1 %v2391_v50  ;;  %226 = vmatpush.msra.mxu2 %v2397_v53  ;;  %4068 = vst [vmem:[#allocation34_spill] sm:$0xff] %v2472_v5 }
  0x29   :  { %181 = vmatpush.msra.mxu0 %v2393_v52  ;;  %249 = vmatpush.msra.mxu3 %v2401_v54  ;;  %v2440_v54 = vld [vmem:[#allocation2 + $0x100] sm:$0xff]  ;;  %v82_v9 = vsel %vm80_vm0, %v79_v43, %v78_v49  ;;  %4134 = vst [vmem:[#allocation100_spill] sm:$0xff] %v2694_v58 }
  0x2a   :  { %203 = vmatpush.msra.mxu1 %v2403_v55  ;;  %227 = vmatpush.msra.mxu2 %v2415_v60  ;;  %4064 = vst [vmem:[#allocation30_spill] sm:$0xff] %v2440_v54 }
  0x2b   :  { %182 = vmatpush.msra.mxu0 %v2411_v59  ;;  %250 = vmatpush.msra.mxu3 %v2419_v61  ;;  %v2456_v61 = vld [vmem:[#allocation2 + $0x180] sm:$0xff] }
  0x2c   :  { %204 = vmatpush.msra.mxu1 %v2421_v62  ;;  %228 = vmatpush.msra.mxu2 %v2427_v45  ;;  %4066 = vst [vmem:[#allocation32_spill] sm:$0xff] %v2456_v61 }
  0x2d   :  { %183 = vmatpush.msra.mxu0 %v2423_v63  ;;  %251 = vmatpush.msra.mxu3 %v2433_v51  ;;  %v71_v51 = vsel %vm70_vm1, %v66_v35, %v67_v31  ;;  %v2483_v63 = vld [vmem:[#allocation2 + $0x248] sm:$0xff] }
  0x2e   :  { %229 = vmatpush.msra.mxu2 %v2440_v54  ;;  %205 = vmatpush.msra.mxu1 %v2442_v39  ;;  %v2477_v54 = vld [vmem:[#allocation2 + $0x258] sm:$0xff]  ;;  %4071 = vst [vmem:[#allocation37_spill] sm:$0xff] %v2483_v63 }
  0x2f   :  { %260 = vmatpush.msrb.mxu0 %v2430_v48  ;;  %230 = vmatmul.f32.vlgmr.msra.gmra.mxu2 %v2405_v56  ;;  %v76_v48 = vsel %vm75_vm2, %v73_v27, %v74_v23  ;;  %4069 = vst [vmem:[#allocation35_spill] sm:$0xff] %v2477_v54 }
  0x30   :  { %252 = vmatpush.msra.mxu3 %v2456_v61  ;;  %206 = vmatpush.msra.mxu1 %v2458_v15  ;;  %v81_v61 = vsel %vm80_vm0, %v78_v49, %v79_v43  ;;  %v2499_v43 = vld [vmem:[#allocation2 + $0x230] sm:$0xff]  ;;  %v2502_v49 = vld [vmem:[#allocation2 + $0x228] sm:$0xff] }
  0x31   :  { %261 = vmatpush.msrb.mxu0 %v2449_v19  ;;  %253 = vmatmul.f32.vlgmr.msra.gmra.mxu3 %v82_v9  ;;  %v2480_v19 = vld [vmem:[#allocation2 + $0x250] sm:$0xff]  ;;  %v72_v9 = vsel %vm70_vm1, %v67_v31, %v66_v35  ;;  %4074 = vst [vmem:[#allocation40_spill] sm:$0xff] %v2499_v43  ;;  %v83_v35 = vrot.slane %v2405_v56, 6 }
  0x32   :  { %184 = vmatmul.f32.vlgmr.msra.gmra.mxu0 %v71_v51  ;;  %207 = vmatmul.f32.vlgmr.msra.gmra.mxu1 %v76_v48  ;;  %4070 = vst [vmem:[#allocation36_spill] sm:$0xff] %v2480_v19  ;;  %v77_v48 = vsel %vm75_vm2, %v74_v23, %v73_v27  ;;  %v2493_v51 = vld [vmem:[#allocation2 + $0x240] sm:$0xff]  ;;  %v2508_v27 = vld [vmem:[#allocation2 + $0x218] sm:$0xff]  ;;  %v2511_v31 = vld [vmem:[#allocation2 + $0x210] sm:$0xff] }
  0x33   :  { %262 = vmatpush.msrb.mxu0 %v2460_v11  ;;  %4072 = vst [vmem:[#allocation38_spill] sm:$0xff] %v2493_v51  ;;  %v2505_v23 = vld [vmem:[#allocation2 + $0x220] sm:$0xff]  ;;  %v2602_v11 = vld [vmem:[#allocation5 + $0x138] sm:$0xff] }
  0x34   :  { %4075 = vst [vmem:[#allocation41_spill] sm:$0xff] %v2502_v49 }
  0x35   :  { %263 = vmatpush.msrb.mxu0 %v2472_v5  ;;  %4076 = vst [vmem:[#allocation42_spill] sm:$0xff] %v2505_v23  ;;  %v2578_v5 = vld [vmem:[#allocation5 + $0x148] sm:$0xff] }
  0x36   :  { %4077 = vst [vmem:[#allocation43_spill] sm:$0xff] %v2508_v27 }
  0x37   :  { %264 = vmatpush.msrb.mxu0 %v2477_v54  ;;  %233 = vmatmul.f32.gmra.mxu2 %v2407_v57  ;;  %v2496_v54 = vld [vmem:[#allocation2 + $0x238] sm:$0xff]  ;;  %4078 = vst [vmem:[#allocation44_spill] sm:$0xff] %v2511_v31 }
  0x38   :  { %4073 = vst [vmem:[#allocation39_spill] sm:$0xff] %v2496_v54 }
  0x39   :  { %265 = vmatpush.msrb.mxu0 %v2480_v19  ;;  %256 = vmatmul.f32.gmra.mxu3 %v81_v61  ;;  %v84_v61 = vrot.slane %v2407_v57, 6  ;;  %v2572_v19 = vld [vmem:[#allocation5 + $0x1f8] sm:$0xff]  ;;  %4095 = vst [vmem:[#allocation61_spill] sm:$0xff] %v2578_v5 }
  0x3a   :  { %187 = vmatmul.f32.gmra.mxu0 %v72_v9  ;;  %210 = vmatmul.f32.gmra.mxu1 %v77_v48  ;;  %v2516_v9 = vld [vmem:[#allocation2 + $0x208] sm:$0xff]  ;;  %v2520_v48 = vld [vmem:[#allocation2 + $0x200] sm:$0xff]  ;;  %4093 = vst [vmem:[#allocation59_spill] sm:$0xff] %v2572_v19 }
  0x3b   :  { %266 = vmatpush.msrb.mxu0 %v2483_v63  ;;  %4079 = vst [vmem:[#allocation45_spill] sm:$0xff] %v2516_v9  ;;  %v2566_v63 = vld [vmem:[#allocation5 + $0x150] sm:$0xff] }
  0x3c   :  { %4080 = vst [vmem:[#allocation46_spill] sm:$0xff] %v2520_v48 }
  0x3d   :  { %267 = vmatpush.msrb.mxu0 %v2493_v51  ;;  %v2560_v51 = vld [vmem:[#allocation5 + $0x158] sm:$0xff]  ;;  %4091 = vst [vmem:[#allocation57_spill] sm:$0xff] %v2566_v63 }
  0x3e   :  { %4089 = vst [vmem:[#allocation55_spill] sm:$0xff] %v2560_v51 }
  0x3f   :  { %268 = vmatpush.msrb.mxu0 %v2496_v54  ;;  %v2558_v54 = vld [vmem:[#allocation5 + $0x48] sm:$0xff]  ;;  %4103 = vst [vmem:[#allocation69_spill] sm:$0xff] %v2602_v11 }
  0x40   :  { %4088 = vst [vmem:[#allocation54_spill] sm:$0xff] %v2558_v54 }
  0x41   :  { %269 = vmatpush.msrb.mxu0 %v2499_v43  ;;  %v2530_v43 = vld [vmem:[#allocation5 + $0x70] sm:$0xff] }
  0x43   :  { %270 = vmatpush.msrb.mxu0 %v2502_v49  ;;  %v2528_v49 = vld [vmem:[#allocation5 + $0x78] sm:$0xff] }
  0x44   :  { %411 = vmatpush.msrb.mxu1 %v2528_v49 }
  0x45   :  { %271 = vmatpush.msrb.mxu0 %v2505_v23  ;;  %v87_v23 = vsel %vm85_vm3, %v84_v61, %v83_v35 }
  0x46   :  { %412 = vmatpush.msrb.mxu1 %v2530_v43 }
  0x47   :  { %272 = vmatpush.msrb.mxu0 %v2508_v27  ;;  %v86_v27 = vsel %vm85_vm3, %v83_v35, %v84_v61  ;;  %v2542_v35 = vld [vmem:[#allocation5 + $0x170] sm:$0xff]  ;;  %v2548_v61 = vld [vmem:[#allocation5 + $0x168] sm:$0xff] }
  0x48   :  { %4083 = vst [vmem:[#allocation49_spill] sm:$0xff] %v2542_v35 }
  0x49   :  { %273 = vmatpush.msrb.mxu0 %v2511_v31  ;;  %v2534_v31 = vld [vmem:[#allocation5 + $0x68] sm:$0xff]  ;;  %4085 = vst [vmem:[#allocation51_spill] sm:$0xff] %v2548_v61 }
  0x4a   :  { %413 = vmatpush.msrb.mxu1 %v2534_v31 }
  0x4b   :  { %274 = vmatpush.msrb.mxu0 %v2516_v9  ;;  %v2536_v9 = vld [vmem:[#allocation5 + $0x178] sm:$0xff] }
  0x4c   :  { %4081 = vst [vmem:[#allocation47_spill] sm:$0xff] %v2536_v9  ;;  %457 = vmatpush.msrb.mxu3 %v2536_v9  ;;  %v2554_v9 = vld [vmem:[#allocation5 + $0x160] sm:$0xff] }
  0x4d   :  { %275 = vmatpush.msrb.mxu0 %v2520_v48  ;;  %v2550_v48 = vld [vmem:[#allocation5 + $0x50] sm:$0xff]  ;;  %4087 = vst [vmem:[#allocation53_spill] sm:$0xff] %v2554_v9 }
  0x4e   :  { %276 = vmatmul.f32.vlgmr.msrb.gmra.mxu0 %v87_v23  ;;  %v2540_v23 = vld [vmem:[#allocation5 + $0x60] sm:$0xff]  ;;  %458 = vmatpush.msrb.mxu3 %v2542_v35  ;;  %4086 = vst [vmem:[#allocation52_spill] sm:$0xff] %v2550_v48 }
  0x4f   :  { %4082 = vst [vmem:[#allocation48_spill] sm:$0xff] %v2540_v23  ;;  %414 = vmatpush.msrb.mxu1 %v2540_v23  ;;  %v2564_v35 = vld [vmem:[#allocation5 + $0x40] sm:$0xff]  ;;  %480 = vmatpush.msra.mxu0 %v2572_v19  ;;  %v2594_v19 = vld [vmem:[#allocation5 + $0xe8] sm:$0xff]  ;;  %v2717_v23 = vld [vmem:[#allocation5 + $0x190] sm:$0xff] }
  0x50   :  { %459 = vmatpush.msrb.mxu3 %v2548_v61  ;;  %4090 = vst [vmem:[#allocation56_spill] sm:$0xff] %v2564_v35  ;;  %v2570_v61 = vld [vmem:[#allocation5 + $0xf8] sm:$0xff] }
  0x51   :  { %4092 = vst [vmem:[#allocation58_spill] sm:$0xff] %v2570_v61  ;;  %434 = vmatpush.msrb.mxu2 %v2570_v61 }
  0x52   :  { %460 = vmatpush.msrb.mxu3 %v2554_v9  ;;  %v2576_v9 = vld [vmem:[#allocation5 + $0x38] sm:$0xff]  ;;  %4100 = vst [vmem:[#allocation66_spill] sm:$0xff] %v2594_v19 }
  0x53   :  { %4094 = vst [vmem:[#allocation60_spill] sm:$0xff] %v2576_v9 }
  0x54   :  { %461 = vmatpush.msrb.mxu3 %v2560_v51  ;;  %v2582_v51 = vld [vmem:[#allocation5 + $0xf0] sm:$0xff]  ;;  %4141 = vst [vmem:[#allocation107_spill] sm:$0xff] %v2717_v23 }
  0x55   :  { %4096 = vst [vmem:[#allocation62_spill] sm:$0xff] %v2582_v51  ;;  %435 = vmatpush.msrb.mxu2 %v2582_v51  ;;  %v2636_v51 = vld [vmem:[#allocation5 + $0x10] sm:$0xff] }
  0x56   :  { %279 = vmatmul.f32.gmra.mxu0 %v86_v27  ;;  %v2546_v27 = vld [vmem:[#allocation5 + $0x58] sm:$0xff]  ;;  %462 = vmatpush.msrb.mxu3 %v2566_v63  ;;  %v2588_v63 = vld [vmem:[#allocation5 + $0x30] sm:$0xff]  ;;  %4114 = vst [vmem:[#allocation80_spill] sm:$0xff] %v2636_v51 }
  0x57   :  { %4084 = vst [vmem:[#allocation50_spill] sm:$0xff] %v2546_v27  ;;  %415 = vmatpush.msrb.mxu1 %v2546_v27  ;;  %436 = vmatpush.msrb.mxu2 %v2594_v19  ;;  %v2614_v19 = vld [vmem:[#allocation5 + $0x130] sm:$0xff] }
  0x58   :  { %463 = vmatpush.msrb.mxu3 %v2578_v5  ;;  %4098 = vst [vmem:[#allocation64_spill] sm:$0xff] %v2588_v63  ;;  %v2600_v5 = vld [vmem:[#allocation5 + $0x28] sm:$0xff] }
  0x59   :  { %416 = vmatpush.msrb.mxu1 %v2550_v48  ;;  %4102 = vst [vmem:[#allocation68_spill] sm:$0xff] %v2600_v5  ;;  %v2670_v48 = vld [vmem:[#allocation5 + $0x278] sm:$0xff] }
  0x5a   :  { %4107 = vst [vmem:[#allocation73_spill] sm:$0xff] %v2614_v19 }
  0x5b   :  { %417 = vmatpush.msrb.mxu1 %v2558_v54  ;;  %v2590_v54 = vld [vmem:[#allocation5 + $0x140] sm:$0xff]  ;;  %4126 = vst [vmem:[#allocation92_spill] sm:$0xff] %v2670_v48 }
  0x5c   :  { %4099 = vst [vmem:[#allocation65_spill] sm:$0xff] %v2590_v54  ;;  %464 = vmatpush.msrb.mxu3 %v2590_v54  ;;  %v2612_v54 = vld [vmem:[#allocation5 + $0x20] sm:$0xff] }
  0x5d   :  { %418 = vmatpush.msrb.mxu1 %v2564_v35  ;;  %v2584_v35 = vld [vmem:[#allocation5 + $0x1f0] sm:$0xff]  ;;  %4106 = vst [vmem:[#allocation72_spill] sm:$0xff] %v2612_v54 }
  0x5e   :  { %4097 = vst [vmem:[#allocation63_spill] sm:$0xff] %v2584_v35  ;;  %481 = vmatpush.msra.mxu0 %v2584_v35  ;;  %465 = vmatpush.msrb.mxu3 %v2602_v11  ;;  %v2606_v35 = vld [vmem:[#allocation5 + $0xe0] sm:$0xff] }
  0x5f   :  { %419 = vmatpush.msrb.mxu1 %v2576_v9  ;;  %v2596_v9 = vld [vmem:[#allocation5 + $0x1e8] sm:$0xff]  ;;  %4104 = vst [vmem:[#allocation70_spill] sm:$0xff] %v2606_v35  ;;  %437 = vmatpush.msrb.mxu2 %v2606_v35  ;;  %v2624_v35 = vld [vmem:[#allocation5 + $0x18] sm:$0xff] }
  0x60   :  { %4101 = vst [vmem:[#allocation67_spill] sm:$0xff] %v2596_v9  ;;  %482 = vmatpush.msra.mxu0 %v2596_v9  ;;  %466 = vmatpush.msrb.mxu3 %v2614_v19  ;;  %v2618_v9 = vld [vmem:[#allocation5 + $0xd8] sm:$0xff]  ;;  %v2632_v19 = vld [vmem:[#allocation5 + $0x1d0] sm:$0xff] }
  0x61   :  { %420 = vmatpush.msrb.mxu1 %v2588_v63  ;;  %v2608_v63 = vld [vmem:[#allocation5 + $0x1e0] sm:$0xff]  ;;  %4108 = vst [vmem:[#allocation74_spill] sm:$0xff] %v2618_v9  ;;  %438 = vmatpush.msrb.mxu2 %v2618_v9 }
  0x62   :  { %4105 = vst [vmem:[#allocation71_spill] sm:$0xff] %v2608_v63  ;;  %483 = vmatpush.msra.mxu0 %v2608_v63  ;;  %v2626_v63 = vld [vmem:[#allocation5 + $0x128] sm:$0xff]  ;;  %v2638_v9 = vld [vmem:[#allocation5 + $0x120] sm:$0xff] }
  0x63   :  { %421 = vmatpush.msrb.mxu1 %v2600_v5  ;;  %v2620_v5 = vld [vmem:[#allocation5 + $0x1d8] sm:$0xff]  ;;  %4110 = vst [vmem:[#allocation76_spill] sm:$0xff] %v2624_v35  ;;  %467 = vmatpush.msrb.mxu3 %v2626_v63 }
  0x64   :  { %4109 = vst [vmem:[#allocation75_spill] sm:$0xff] %v2620_v5  ;;  %484 = vmatpush.msra.mxu0 %v2620_v5  ;;  %v2642_v5 = vld [vmem:[#allocation5 + $0xc8] sm:$0xff] }
  0x65   :  { %422 = vmatpush.msrb.mxu1 %v2612_v54  ;;  %4111 = vst [vmem:[#allocation77_spill] sm:$0xff] %v2626_v63  ;;  %v2630_v54 = vld [vmem:[#allocation5 + $0xd0] sm:$0xff]  ;;  %468 = vmatpush.msrb.mxu3 %v2638_v9  ;;  %v2648_v63 = vld [vmem:[#allocation5 + $0x8] sm:$0xff] }
  0x66   :  { %4112 = vst [vmem:[#allocation78_spill] sm:$0xff] %v2630_v54  ;;  %439 = vmatpush.msrb.mxu2 %v2630_v54  ;;  %485 = vmatpush.msra.mxu0 %v2632_v19  ;;  %v2650_v54 = vld [vmem:[#allocation5 + $0x118] sm:$0xff] }
  0x67   :  { %423 = vmatpush.msrb.mxu1 %v2624_v35  ;;  %4113 = vst [vmem:[#allocation79_spill] sm:$0xff] %v2632_v19  ;;  %v2644_v35 = vld [vmem:[#allocation5 + $0x1c8] sm:$0xff]  ;;  %469 = vmatpush.msrb.mxu3 %v2650_v54  ;;  %v2654_v19 = vld [vmem:[#allocation5 + $0xc0] sm:$0xff] }
  0x68   :  { %4115 = vst [vmem:[#allocation81_spill] sm:$0xff] %v2638_v9  ;;  %440 = vmatpush.msrb.mxu2 %v2642_v5  ;;  %486 = vmatpush.msra.mxu0 %v2644_v35 }
  0x69   :  { %424 = vmatpush.msrb.mxu1 %v2636_v51  ;;  %4116 = vst [vmem:[#allocation82_spill] sm:$0xff] %v2642_v5  ;;  %v2656_v51 = vld [vmem:[#allocation5 + $0x1c0] sm:$0xff] }
  0x6a   :  { %4117 = vst [vmem:[#allocation83_spill] sm:$0xff] %v2644_v35  ;;  %441 = vmatpush.msrb.mxu2 %v2654_v19  ;;  %487 = vmatpush.msra.mxu0 %v2656_v51  ;;  %v2660_v5 = vld [vmem:[#allocation5] sm:$0xff]  ;;  %v2662_v35 = vld [vmem:[#allocation5 + $0x110] sm:$0xff] }
  0x6b   :  { %4118 = vst [vmem:[#allocation84_spill] sm:$0xff] %v2648_v63  ;;  %425 = vmatpush.msrb.mxu1 %v2648_v63  ;;  %470 = vmatpush.msrb.mxu3 %v2662_v35  ;;  %v2666_v63 = vld [vmem:[#allocation5 + $0xb8] sm:$0xff] }
  0x6c   :  { %4119 = vst [vmem:[#allocation85_spill] sm:$0xff] %v2650_v54  ;;  %v2668_v54 = vld [vmem:[#allocation5 + $0x1b8] sm:$0xff]  ;;  %442 = vmatpush.msrb.mxu2 %v2666_v63 }
  0x6d   :  { %4120 = vst [vmem:[#allocation86_spill] sm:$0xff] %v2654_v19  ;;  %426 = vmatpush.msrb.mxu1 %v2660_v5  ;;  %488 = vmatpush.msra.mxu0 %v2668_v54  ;;  %v2674_v19 = vld [vmem:[#allocation5 + $0x108] sm:$0xff] }
  0x6e   :  { %4121 = vst [vmem:[#allocation87_spill] sm:$0xff] %v2656_v51  ;;  %471 = vmatpush.msrb.mxu3 %v2674_v19  ;;  %v2678_v51 = vld [vmem:[#allocation5 + $0xb0] sm:$0xff] }
  0x6f   :  { %4122 = vst [vmem:[#allocation88_spill] sm:$0xff] %v2660_v5  ;;  %503 = vmatpush.msra.mxu1 %v2670_v48  ;;  %v2680_v5 = vld [vmem:[#allocation5 + $0x1b0] sm:$0xff]  ;;  %443 = vmatpush.msrb.mxu2 %v2678_v51  ;;  %v2690_v48 = vld [vmem:[#allocation5 + $0xa8] sm:$0xff] }
  0x70   :  { %4123 = vst [vmem:[#allocation89_spill] sm:$0xff] %v2662_v35  ;;  %v2682_v35 = vld [vmem:[#allocation5 + $0x270] sm:$0xff]  ;;  %489 = vmatpush.msra.mxu0 %v2680_v5 }
  0x71   :  { %4124 = vst [vmem:[#allocation90_spill] sm:$0xff] %v2666_v63  ;;  %v2686_v63 = vld [vmem:[#allocation5 + $0x100] sm:$0xff]  ;;  %504 = vmatpush.msra.mxu1 %v2682_v35  ;;  %444 = vmatpush.msrb.mxu2 %v2690_v48 }
  0x72   :  { %4125 = vst [vmem:[#allocation91_spill] sm:$0xff] %v2668_v54  ;;  %472 = vmatpush.msrb.mxu3 %v2686_v63 }
  0x73   :  { %4127 = vst [vmem:[#allocation93_spill] sm:$0xff] %v2674_v19  ;;  %v2692_v19 = vld [vmem:[#allocation5 + $0x1a8] sm:$0xff]  ;;  %505 = vmatpush.msra.mxu1 %v2694_v58 }
  0x74   :  { %4128 = vst [vmem:[#allocation94_spill] sm:$0xff] %v2678_v51  ;;  %490 = vmatpush.msra.mxu0 %v2692_v19  ;;  %v2701_v51 = vld [vmem:[#allocation5 + $0x1a0] sm:$0xff]  ;;  %567 = vmatpush.msra.mxu3 %v2267_v6 }
  0x75   :  { %4129 = vst [vmem:[#allocation95_spill] sm:$0xff] %v2680_v5  ;;  %v2699_v5 = vld [vmem:[#allocation5 + $0xa0] sm:$0xff] }
  0x76   :  { %4130 = vst [vmem:[#allocation96_spill] sm:$0xff] %v2682_v35  ;;  %445 = vmatpush.msrb.mxu2 %v2699_v5  ;;  %491 = vmatpush.msra.mxu0 %v2701_v51  ;;  %v2708_v35 = vld [vmem:[#allocation5 + $0x98] sm:$0xff] }
  0x77   :  { %4131 = vst [vmem:[#allocation97_spill] sm:$0xff] %v2686_v63  ;;  %v2710_v63 = vld [vmem:[#allocation5 + $0x198] sm:$0xff]  ;;  %568 = vmatpush.msra.mxu3 %v2279_v10  ;;  %v2731_v10 = vld [vmem:[#allocation5 + $0x188] sm:$0xff] }
  0x78   :  { %4132 = vst [vmem:[#allocation98_spill] sm:$0xff] %v2690_v48  ;;  %v2715_v48 = vld [vmem:[#allocation5 + $0x90] sm:$0xff]  ;;  %446 = vmatpush.msrb.mxu2 %v2708_v35  ;;  %492 = vmatpush.msra.mxu0 %v2710_v63 }
  0x79   :  { %4133 = vst [vmem:[#allocation99_spill] sm:$0xff] %v2692_v19  ;;  %v2712_v19 = vld [vmem:[#allocation5 + $0x258] sm:$0xff]  ;;  %569 = vmatpush.msra.mxu3 %v2289_v14  ;;  %v2738_v14 = vld [vmem:[#allocation5 + $0x80] sm:$0xff] }
  0x7a   :  { %4135 = vst [vmem:[#allocation101_spill] sm:$0xff] %v2699_v5  ;;  %v2725_v5 = vld [vmem:[#allocation5 + $0x88] sm:$0xff]  ;;  %447 = vmatpush.msrb.mxu2 %v2715_v48  ;;  %493 = vmatpush.msra.mxu0 %v2717_v23  ;;  %v2752_v23 = vld [vmem:[#allocation5 + $0x230] sm:$0xff] }
  0x7b   :  { %4136 = vst [vmem:[#allocation102_spill] sm:$0xff] %v2701_v51  ;;  %v2722_v51 = vld [vmem:[#allocation5 + $0x250] sm:$0xff]  ;;  %570 = vmatpush.msra.mxu3 %v2295_v16 }
  0x7c   :  { %4138 = vst [vmem:[#allocation104_spill] sm:$0xff] %v2710_v63  ;;  %448 = vmatpush.msrb.mxu2 %v2725_v5  ;;  %494 = vmatpush.msra.mxu0 %v2731_v10 }
  0x7d   :  { %4139 = vst [vmem:[#allocation105_spill] sm:$0xff] %v2712_v19  ;;  %571 = vmatpush.msra.mxu3 %v2307_v20 }
  0x7e   :  { %4140 = vst [vmem:[#allocation106_spill] sm:$0xff] %v2715_v48  ;;  %v2740_v48 = vld [vmem:[#allocation5 + $0x180] sm:$0xff]  ;;  %449 = vmatpush.msrb.mxu2 %v2738_v14 }
  0x7f   :  { %4142 = vst [vmem:[#allocation108_spill] sm:$0xff] %v2731_v10  ;;  %495 = vmatpush.msra.mxu0 %v2740_v48  ;;  %v2750_v10 = vld [vmem:[#allocation5 + $0x238] sm:$0xff]  ;;  %572 = vmatpush.msra.mxu3 %v2319_v24 }
  0x80   :  { %544 = vmatpush.msra.mxu2 %v2252_v0 }
  0x81   :  { %590 = vmatpush.msrb.mxu0 %v2259_v3  ;;  %573 = vmatpush.msra.mxu3 %v2331_v28  ;;  %v2764_v3 = vld [vmem:[#allocation5 + $0x220] sm:$0xff]  ;;  %v2774_v28 = vld [vmem:[#allocation5 + $0x218] sm:$0xff] }
  0x82   :  { %545 = vmatpush.msra.mxu2 %v2254_v1 }
  0x83   :  { %591 = vmatpush.msrb.mxu0 %v2261_v4  ;;  %574 = vmatpush.msra.mxu3 %v2343_v32 }
  0x84   :  { %546 = vmatpush.msra.mxu2 %v2257_v2 }
  0x85   :  { %592 = vmatpush.msrb.mxu0 %v2273_v8  ;;  %575 = vmatpush.msra.mxu3 %v2355_v36  ;;  %v2776_v8 = vld [vmem:[#allocation5 + $0x210] sm:$0xff]  ;;  %v2788_v36 = vld [vmem:[#allocation5 + $0x200] sm:$0xff] }
  0x86   :  { %547 = vmatpush.msra.mxu2 %v2269_v7 }
  0x87   :  { %593 = vmatpush.msrb.mxu0 %v2287_v13  ;;  %576 = vmatpush.msra.mxu3 %v2367_v40  ;;  %v2782_v13 = vld [vmem:[#allocation5 + $0x208] sm:$0xff] }
  0x88   :  { %548 = vmatpush.msra.mxu2 %v2283_v12 }
  0x89   :  { %594 = vmatpush.msrb.mxu0 %v2301_v18  ;;  %577 = vmatpush.msra.mxu3 %v2379_v44 }
  0x8a   :  { %549 = vmatpush.msra.mxu2 %v2297_v17 }
  0x8b   :  { %595 = vmatpush.msrb.mxu0 %v2313_v22  ;;  %578 = vmatpush.msra.mxu3 %v2391_v50 }
  0x8c   :  { %550 = vmatpush.msra.mxu2 %v2309_v21 }
  0x8d   :  { %596 = vmatpush.msrb.mxu0 %v2325_v26  ;;  %579 = vmatpush.msra.mxu3 %v2403_v55 }
  0x8e   :  { %551 = vmatpush.msra.mxu2 %v2321_v25 }
  0x8f   :  { %597 = vmatpush.msrb.mxu0 %v2337_v30  ;;  %580 = vmatpush.msra.mxu3 %v2421_v62 }
  0x90   :  { %552 = vmatpush.msra.mxu2 %v2333_v29 }
  0x91   :  { %598 = vmatpush.msrb.mxu0 %v2349_v34  ;;  %581 = vmatpush.msra.mxu3 %v2442_v39 }
  0x92   :  { %553 = vmatpush.msra.mxu2 %v2345_v33 }
  0x93   :  { %599 = vmatpush.msrb.mxu0 %v2361_v38  ;;  %582 = vmatpush.msra.mxu3 %v2458_v15 }
  0x94   :  { %554 = vmatpush.msra.mxu2 %v2357_v37 }
  0x95   :  { %600 = vmatpush.msrb.mxu0 %v2373_v42 }
  0x96   :  { %555 = vmatpush.msra.mxu2 %v2369_v41 }
  0x97   :  { %601 = vmatpush.msrb.mxu0 %v2385_v47 }
  0x98   :  { %556 = vmatpush.msra.mxu2 %v2381_v46 }
  0x99   :  { %602 = vmatpush.msrb.mxu0 %v2397_v53  ;;  %v4143_v53 = vld [vmem:[#allocation27_spill] sm:$0xff] }
  0x9a   :  { %557 = vmatpush.msra.mxu2 %v2393_v52 }
  0x9b   :  { %603 = vmatpush.msrb.mxu0 %v2415_v60  ;;  %v4144_v60 = vld [vmem:[#allocation48_spill] sm:$0xff] }
  0x9c   :  { %558 = vmatpush.msra.mxu2 %v2411_v59 }
  0x9d   :  { %604 = vmatpush.msrb.mxu0 %v2427_v45  ;;  %v4148_v45 = vld [vmem:[#allocation28_spill] sm:$0xff] }
  0x9e   :  { %559 = vmatpush.msra.mxu2 %v4143_v53  ;;  %v4181_v53 = vld [vmem:[#allocation86_spill] sm:$0xff] }
  0xaf   :  { %v185_v11 = vpop.f32.mrf.mxu0  ;;  %v208_v9 = vpop.f32.mrf.mxu1 }
  0xb0   :  { %v209_v54 = vadd.f32 %v208_v9, %v185_v11  ;;  %v2703_v11 = vld [vmem:[#allocation5 + $0x260] sm:$0xff] }
  0xb1   :  { %4137 = vst [vmem:[#allocation103_spill] sm:$0xff] %v2703_v11  ;;  %506 = vmatpush.msra.mxu1 %v2703_v11  ;;  %v2733_v11 = vld [vmem:[#allocation5 + $0x248] sm:$0xff] }
  0xb2   :  { %v231_v61 = vpop.f32.mrf.mxu2 }
  0xb3   :  { %v232_v58 = vadd.f32 %v231_v61, %v209_v54  ;;  %507 = vmatpush.msra.mxu1 %v2712_v19 }
  0xb4   :  { %v254_v9 = vpop.f32.mrf.mxu3 }
  0xb5   :  { %v255_v54 = vadd.f32 %v254_v9, %v232_v58  ;;  %508 = vmatpush.msra.mxu1 %v2722_v51  ;;  %v2742_v58 = vld [vmem:[#allocation5 + $0x240] sm:$0xff] }
  0xb7   :  { %v188_v27 = vpop.f32.mrf.mxu0  ;;  %v211_v6 = vpop.f32.mrf.mxu1  ;;  %509 = vmatpush.msra.mxu1 %v2733_v11 }
  0xb8   :  { %v212_v61 = vadd.f32 %v211_v6, %v188_v27 }
  0xb9   :  { %510 = vmatpush.msra.mxu1 %v2742_v58 }
  0xba   :  { %v234_v63 = vpop.f32.mrf.mxu2 }
  0xbb   :  { %v235_v16 = vadd.f32 %v234_v63, %v212_v61  ;;  %511 = vmatpush.msra.mxu1 %v2750_v10  ;;  %v4150_v61 = vld [vmem:[#allocation13_spill] sm:$0xff] }
  0xbc   :  { %v257_v6 = vpop.f32.mrf.mxu3 }
  0xbd   :  { %v258_v0 = vadd.f32 %v257_v6, %v235_v16  ;;  %512 = vmatpush.msra.mxu1 %v2752_v23  ;;  %v4152_v16 = vld [vmem:[#allocation31_spill] sm:$0xff]  ;;  %v4154_v6 = vld [vmem:[#allocation14_spill] sm:$0xff] }
  0xcb   :  { %v277_v19 = vpop.f32.mrf.mxu0 }
  0xcc   :  { %v278_v27 = vadd.f32 %v277_v19, %v255_v54  ;;  %v2758_v19 = vld [vmem:[#allocation5 + $0x228] sm:$0xff]  ;;  %v4149_v54 = vld [vmem:[#allocation50_spill] sm:$0xff] }
  0xcd   :  { %513 = vmatpush.msra.mxu1 %v2758_v19 }
  0xce   :  { %v283_v9 = vmax.f32 %v278_v27, 1e-12  ;;  %v4151_v27 = vld [vmem:[#allocation58_spill] sm:$0xff] }
  0xcf   :  { %514 = vmatpush.msra.mxu1 %v2764_v3 }
  0xd0   :  { %1772 = vrcp.f32 %v283_v9  ;;  %v296_v12 = vand.u32 2147483648, %v283_v9  ;;  %v294_v32 = vand.u32 2147483647, %v283_v9  ;;  %vm290_vm5 = vweird.f32 %v283_v9 }
  0xd1   :  { %515 = vmatpush.msra.mxu1 %v2774_v28 }
  0xd2   :  { %v297_v22 = vor.u32 1.1754944e-38, %v296_v12  ;;  %vm295_vm7 = vcmp.eq.f32.partialorder %v294_v32, 8.507059e+37  ;;  %v4161_v32 = vld [vmem:[#allocation34_spill] sm:$0xff] }
  0xd3   :  { %v280_v20 = vpop.f32.mrf.mxu0  ;;  %516 = vmatpush.msra.mxu1 %v2776_v8 }
  0xd4   :  { %v281_v24 = vadd.f32 %v280_v20, %v258_v0  ;;  %v4155_v0 = vld [vmem:[#allocation62_spill] sm:$0xff]  ;;  %v4156_v20 = vld [vmem:[#allocation33_spill] sm:$0xff] }
  0xd5   :  { %517 = vmatpush.msra.mxu1 %v2782_v13 }
  0xd6   :  { %v1773_v1 = vpop.eup %1772  ;;  %v284_v4 = vmax.f32 %v281_v24, 1e-12  ;;  %v4157_v24 = vld [vmem:[#allocation54_spill] sm:$0xff] }
  0xd7   :  { %v286_v2 = vmul.f32 %v1773_v1, %v283_v9  ;;  %vm291_vm4 = vweird.f32 %v1773_v1  ;;  %518 = vmatpush.msra.mxu1 %v2788_v36  ;;  %v4153_v9 = vld [vmem:[#allocation52_spill] sm:$0xff] }
  0xd8   :  { %1774 = vrcp.f32 %v284_v4  ;;  %vm292_vm6 = vmor %vm290_vm5, %vm291_vm4  ;;  %v311_v50 = vand.u32 2147483648, %v284_v4  ;;  %v309_v55 = vand.u32 2147483647, %v284_v4  ;;  %vm305_vm9 = vweird.f32 %v284_v4 }
  0xd9   :  { %v287_v7 = vsub.f32 1.0, %v286_v2  ;;  %v4158_v2 = vld [vmem:[#allocation15_spill] sm:$0xff] }
  0xda   :  { %v312_v34 = vor.u32 1.1754944e-38, %v311_v50  ;;  %vm310_vm11 = vcmp.eq.f32.partialorder %v309_v55, 8.507059e+37  ;;  %v4167_v50 = vld [vmem:[#allocation18_spill] sm:$0xff]  ;;  %v4169_v55 = vld [vmem:[#allocation36_spill] sm:$0xff] }
  0xdb   :  { %v288_v18 = vmul.f32 %v1773_v1, %v287_v7  ;;  %v4159_v7 = vld [vmem:[#allocation66_spill] sm:$0xff] }
  0xdd   :  { %v289_v17 = vadd.f32 %v1773_v1, %v288_v18  ;;  %v4160_v18 = vld [vmem:[#allocation16_spill] sm:$0xff] }
  0xde   :  { %v1775_v21 = vpop.eup %1774 }
  0xdf   :  { %v301_v26 = vmul.f32 %v1775_v21, %v284_v4  ;;  %v293_v40 = vsel %vm292_vm6, %v1773_v1, %v289_v17  ;;  %vm306_vm8 = vweird.f32 %v1775_v21  ;;  %v4162_v17 = vld [vmem:[#allocation56_spill] sm:$0xff] }
  0xe0   :  { %v298_v25 = vsel %vm295_vm7, %v297_v22, %v293_v40  ;;  %vm307_vm10 = vmor %vm305_vm9, %vm306_vm8  ;;  %v4163_v22 = vld [vmem:[#allocation17_spill] sm:$0xff]  ;;  %v4165_v40 = vld [vmem:[#allocation35_spill] sm:$0xff] }
  0xe1   :  { %v302_v30 = vsub.f32 1.0, %v301_v26  ;;  %v2802_v44 = vmul.f32 %v298_v25, %v2405_v56  ;;  %v4164_v26 = vld [vmem:[#allocation70_spill] sm:$0xff]  ;;  %v4166_v25 = vld [vmem:[#allocation60_spill] sm:$0xff] }
  0xe3   :  { %v303_v29 = vmul.f32 %v1775_v21, %v302_v30  ;;  %473 = vmatmul.f32.vlgmr.msrb.gmra.mxu3 %v2802_v44  ;;  %v315_v39 = vrot.slane %v2802_v44, 6  ;;  %v319_v41 = vrot.slane %v2802_v44, 7  ;;  %v323_v47 = vrot.slane %v2802_v44, 1 }
  0xe4   :  { %707 = vmatpush.msrb.mxu3 %v2528_v49  ;;  %v4146_v49 = vld [vmem:[#allocation30_spill] sm:$0xff]  ;;  %v327_v30 = vrot.slane %v2802_v44, 2  ;;  %v4175_v44 = vld [vmem:[#allocation68_spill] sm:$0xff] }
  0xe5   :  { %v304_v33 = vadd.f32 %v1775_v21, %v303_v29  ;;  %605 = vmatpush.msrb.mxu0 %v4146_v49  ;;  %v4168_v29 = vld [vmem:[#allocation74_spill] sm:$0xff] }
  0xe6   :  { %708 = vmatpush.msrb.mxu3 %v2530_v43 }
  0xe7   :  { %v308_v37 = vsel %vm307_vm10, %v1775_v21, %v304_v33  ;;  %v4170_v33 = vld [vmem:[#allocation64_spill] sm:$0xff] }
  0xe8   :  { %v313_v38 = vsel %vm310_vm11, %v312_v34, %v308_v37  ;;  %709 = vmatpush.msrb.mxu3 %v2534_v31  ;;  %v4147_v31 = vld [vmem:[#allocation12_spill] sm:$0xff]  ;;  %v4171_v37 = vld [vmem:[#allocation19_spill] sm:$0xff] }
  0xe9   :  { %v2818_v15 = vmul.f32 %v313_v38, %v2407_v57  ;;  %v4172_v38 = vld [vmem:[#allocation78_spill] sm:$0xff] }
  0xea   :  { %710 = vmatpush.msrb.mxu3 %v4144_v60  ;;  %v4182_v60 = vld [vmem:[#allocation22_spill] sm:$0xff] }
  0xeb   :  { %476 = vmatmul.f32.gmra.mxu3 %v2818_v15  ;;  %v316_v42 = vrot.slane %v2818_v15, 6  ;;  %v320_v46 = vrot.slane %v2818_v15, 7  ;;  %v324_v52 = vrot.slane %v2818_v15, 1  ;;  %v328_v21 = vrot.slane %v2818_v15, 2  ;;  %v4173_v15 = vld [vmem:[#allocation37_spill] sm:$0xff] }
  0xec   :  { %711 = vmatpush.msrb.mxu3 %v4149_v54  ;;  %v4188_v54 = vld [vmem:[#allocation41_spill] sm:$0xff] }
  0xed   :  { %v318_v63 = vsel %vm85_vm3, %v316_v42, %v315_v39  ;;  %v322_v59 = vsel %vm80_vm0, %v320_v46, %v319_v41  ;;  %v325_v43 = vsel %vm75_vm2, %v323_v47, %v324_v52  ;;  %v317_v1 = vsel %vm85_vm3, %v315_v39, %v316_v42  ;;  %v4174_v39 = vld [vmem:[#allocation20_spill] sm:$0xff]  ;;  %v4177_v42 = vld [vmem:[#allocation82_spill] sm:$0xff] }
  0xee   :  { %427 = vmatmul.f32.vlgmr.msrb.gmra.mxu1 %v318_v63  ;;  %450 = vmatmul.f32.vlgmr.msrb.gmra.mxu2 %v322_v59  ;;  %v321_v4 = vsel %vm80_vm0, %v319_v41, %v320_v46  ;;  %v326_v12 = vsel %vm75_vm2, %v324_v52, %v323_v47  ;;  %v329_v34 = vsel %vm70_vm1, %v327_v30, %v328_v21  ;;  %v4176_v41 = vld [vmem:[#allocation38_spill] sm:$0xff]  ;;  %v4178_v46 = vld [vmem:[#allocation21_spill] sm:$0xff]  ;;  %v4179_v47 = vld [vmem:[#allocation72_spill] sm:$0xff] }
  0xef   :  { %496 = vmatmul.f32.vlgmr.msra.gmra.mxu0 %v325_v43  ;;  %613 = vmatpush.msrb.mxu1 %v4147_v31  ;;  %v4180_v52 = vld [vmem:[#allocation39_spill] sm:$0xff]  ;;  %v4183_v63 = vld [vmem:[#allocation76_spill] sm:$0xff]  ;;  %v4185_v43 = vld [vmem:[#allocation90_spill] sm:$0xff]  ;;  %v330_v49 = vsel %vm70_vm1, %v328_v21, %v327_v30 }
  0xf0   :  { %636 = vmatpush.msrb.mxu2 %v4148_v45  ;;  %730 = vmatpush.msra.mxu0 %v4151_v27  ;;  %v4184_v59 = vld [vmem:[#allocation40_spill] sm:$0xff]  ;;  %v4186_v31 = vld [vmem:[#allocation23_spill] sm:$0xff]  ;;  %v4205_v21 = vld [vmem:[#allocation106_spill] sm:$0xff] }
  0xf1   :  { %614 = vmatpush.msrb.mxu1 %v4150_v61  ;;  %712 = vmatpush.msrb.mxu3 %v4153_v9  ;;  %v4187_v45 = vld [vmem:[#allocation80_spill] sm:$0xff]  ;;  %v4192_v9 = vld [vmem:[#allocation94_spill] sm:$0xff]  ;;  %v4210_v30 = vld [vmem:[#allocation61_spill] sm:$0xff] }
  0xf2   :  { %637 = vmatpush.msrb.mxu2 %v4152_v16  ;;  %731 = vmatpush.msra.mxu0 %v4155_v0  ;;  %v4189_v61 = vld [vmem:[#allocation24_spill] sm:$0xff]  ;;  %v4191_v16 = vld [vmem:[#allocation42_spill] sm:$0xff] }
  0xf3   :  { %615 = vmatpush.msrb.mxu1 %v4154_v6  ;;  %713 = vmatpush.msrb.mxu3 %v4157_v24  ;;  %v4190_v27 = vld [vmem:[#allocation84_spill] sm:$0xff]  ;;  %v4193_v6 = vld [vmem:[#allocation26_spill] sm:$0xff] }
  0xf4   :  { %638 = vmatpush.msrb.mxu2 %v4156_v20  ;;  %732 = vmatpush.msra.mxu0 %v4159_v7  ;;  %v4194_v0 = vld [vmem:[#allocation88_spill] sm:$0xff]  ;;  %v4195_v20 = vld [vmem:[#allocation43_spill] sm:$0xff]  ;;  %v4196_v24 = vld [vmem:[#allocation98_spill] sm:$0xff] }
  0xf5   :  { %616 = vmatpush.msrb.mxu1 %v4158_v2  ;;  %714 = vmatpush.msrb.mxu3 %v4162_v17  ;;  %v4199_v2 = vld [vmem:[#allocation101_spill] sm:$0xff]  ;;  %v4200_v7 = vld [vmem:[#allocation32_spill] sm:$0xff] }
  0xf6   :  { %430 = vmatmul.f32.gmra.mxu1 %v317_v1  ;;  %453 = vmatmul.f32.gmra.mxu2 %v321_v4  ;;  %v4197_v1 = vld [vmem:[#allocation29_spill] sm:$0xff]  ;;  %v4198_v4 = vld [vmem:[#allocation44_spill] sm:$0xff] }
  0xf7   :  { %499 = vmatmul.f32.gmra.mxu0 %v326_v12  ;;  %617 = vmatpush.msrb.mxu1 %v4160_v18  ;;  %v4201_v12 = vld [vmem:[#allocation45_spill] sm:$0xff]  ;;  %v4202_v18 = vld [vmem:[#allocation47_spill] sm:$0xff] }
  0xf8   :  { %639 = vmatpush.msrb.mxu2 %v4161_v32  ;;  %733 = vmatpush.msra.mxu0 %v4164_v26  ;;  %v4203_v32 = vld [vmem:[#allocation46_spill] sm:$0xff]  ;;  %v4204_v17 = vld [vmem:[#allocation49_spill] sm:$0xff] }
  0xf9   :  { %618 = vmatpush.msrb.mxu1 %v4163_v22  ;;  %715 = vmatpush.msrb.mxu3 %v4166_v25  ;;  %v4206_v22 = vld [vmem:[#allocation51_spill] sm:$0xff]  ;;  %v4207_v26 = vld [vmem:[#allocation53_spill] sm:$0xff] }
  0xfa   :  { %640 = vmatpush.msrb.mxu2 %v4165_v40  ;;  %734 = vmatpush.msra.mxu0 %v4168_v29  ;;  %v4208_v40 = vld [vmem:[#allocation55_spill] sm:$0xff]  ;;  %v4209_v25 = vld [vmem:[#allocation57_spill] sm:$0xff] }
  0xfb   :  { %619 = vmatpush.msrb.mxu1 %v4167_v50  ;;  %716 = vmatpush.msrb.mxu3 %v4170_v33  ;;  %v4211_v50 = vld [vmem:[#allocation65_spill] sm:$0xff] }
  0xfc   :  { %641 = vmatpush.msrb.mxu2 %v4169_v55  ;;  %735 = vmatpush.msra.mxu0 %v4172_v38  ;;  %v4212_v29 = vld [vmem:[#allocation69_spill] sm:$0xff] }
  0xfd   :  { %620 = vmatpush.msrb.mxu1 %v4171_v37  ;;  %717 = vmatpush.msrb.mxu3 %v4175_v44  ;;  %v4213_v55 = vld [vmem:[#allocation73_spill] sm:$0xff] }
  0xfe   :  { %519 = vmatmul.f32.vlgmr.msra.gmra.mxu1 %v329_v34  ;;  %642 = vmatpush.msrb.mxu2 %v4173_v15  ;;  %v4214_v33 = vld [vmem:[#allocation77_spill] sm:$0xff] }
  0xff   :  { %621 = vmatpush.msrb.mxu1 %v4174_v39  ;;  %736 = vmatpush.msra.mxu0 %v4177_v42  ;;  %v4215_v34 = vld [vmem:[#allocation81_spill] sm:$0xff] }
 0x100   :  { %643 = vmatpush.msrb.mxu2 %v4176_v41  ;;  %718 = vmatpush.msrb.mxu3 %v4179_v47  ;;  %v4216_v37 = vld [vmem:[#allocation85_spill] sm:$0xff] }
 0x101   :  { %622 = vmatpush.msrb.mxu1 %v4178_v46  ;;  %737 = vmatpush.msra.mxu0 %v4181_v53  ;;  %v4217_v38 = vld [vmem:[#allocation89_spill] sm:$0xff] }
 0x102   :  { %644 = vmatpush.msrb.mxu2 %v4180_v52  ;;  %719 = vmatpush.msrb.mxu3 %v4183_v63  ;;  %v4218_v15 = vld [vmem:[#allocation93_spill] sm:$0xff] }
 0x103   :  { %623 = vmatpush.msrb.mxu1 %v4182_v60  ;;  %738 = vmatpush.msra.mxu0 %v4185_v43  ;;  %v4219_v39 = vld [vmem:[#allocation97_spill] sm:$0xff] }
 0x104   :  { %645 = vmatpush.msrb.mxu2 %v4184_v59  ;;  %720 = vmatpush.msrb.mxu3 %v4187_v45 }
 0x105   :  { %624 = vmatpush.msrb.mxu1 %v4186_v31  ;;  %739 = vmatpush.msra.mxu0 %v4192_v9 }
 0x106   :  { %522 = vmatmul.f32.gmra.mxu1 %v330_v49  ;;  %646 = vmatpush.msrb.mxu2 %v4188_v54 }
 0x107   :  { %625 = vmatpush.msrb.mxu1 %v4189_v61  ;;  %721 = vmatpush.msrb.mxu3 %v4190_v27  ;;  %v2932_v27 = vld [vmem:[#allocation2 + $0x78] sm:$0xff] }
 0x108   :  { %647 = vmatpush.msrb.mxu2 %v4191_v16  ;;  %740 = vmatpush.msra.mxu0 %v4196_v24 }
 0x109   :  { %626 = vmatpush.msrb.mxu1 %v4193_v6  ;;  %722 = vmatpush.msrb.mxu3 %v4194_v0  ;;  %v2935_v6 = vld [vmem:[#allocation2 + $0x70] sm:$0xff] }
 0x10a   :  { %648 = vmatpush.msrb.mxu2 %v4195_v20  ;;  %741 = vmatpush.msra.mxu0 %v4199_v2  ;;  %v2938_v20 = vld [vmem:[#allocation2 + $0x68] sm:$0xff] }
 0x10b   :  { %627 = vmatpush.msrb.mxu1 %v4197_v1 }
 0x10c   :  { %649 = vmatpush.msrb.mxu2 %v4198_v4  ;;  %742 = vmatpush.msra.mxu0 %v2708_v35 }
 0x10d   :  { %628 = vmatpush.msrb.mxu1 %v4200_v7 }
 0x10e   :  { %650 = vmatpush.msrb.mxu2 %v4201_v12  ;;  %743 = vmatpush.msra.mxu0 %v4205_v21  ;;  %v2946_v12 = vld [vmem:[#allocation2 + $0x60] sm:$0xff] }
 0x10f   :  { %753 = vmatpush.msra.mxu1 %v4202_v18 }
 0x110   :  { %651 = vmatpush.msrb.mxu2 %v4203_v32  ;;  %744 = vmatpush.msra.mxu0 %v2725_v5 }
 0x111   :  { %754 = vmatpush.msra.mxu1 %v4204_v17 }
 0x112   :  { %745 = vmatpush.msra.mxu0 %v2738_v14 }
 0x113   :  { %755 = vmatpush.msra.mxu1 %v4206_v22 }
 0x115   :  { %756 = vmatpush.msra.mxu1 %v4207_v26  ;;  %v2954_v26 = vld [vmem:[#allocation2 + $0x58] sm:$0xff] }
 0x117   :  { %757 = vmatpush.msra.mxu1 %v4208_v40 }
 0x119   :  { %758 = vmatpush.msra.mxu1 %v4209_v25 }
 0x11b   :  { %759 = vmatpush.msra.mxu1 %v4210_v30 }
 0x11d   :  { %760 = vmatpush.msra.mxu1 %v4211_v50  ;;  %v4220_v50 = vld [vmem:[#allocation59_spill] sm:$0xff] }
 0x11f   :  { %761 = vmatpush.msra.mxu1 %v4212_v29  ;;  %v4221_v29 = vld [vmem:[#allocation92_spill] sm:$0xff] }
 0x121   :  { %762 = vmatpush.msra.mxu1 %v4213_v55  ;;  %v2965_v55 = vld [vmem:[#allocation2 + $0x50] sm:$0xff] }
 0x123   :  { %763 = vmatpush.msra.mxu1 %v4214_v33  ;;  %v4222_v33 = vld [vmem:[#allocation63_spill] sm:$0xff] }
 0x125   :  { %764 = vmatpush.msra.mxu1 %v4215_v34  ;;  %v2969_v34 = vld [vmem:[#allocation2 + $0xf8] sm:$0xff] }
 0x127   :  { %765 = vmatpush.msra.mxu1 %v4216_v37  ;;  %v4223_v37 = vld [vmem:[#allocation96_spill] sm:$0xff] }
 0x129   :  { %766 = vmatpush.msra.mxu1 %v4217_v38  ;;  %v2973_v38 = vld [vmem:[#allocation2 + $0x48] sm:$0xff] }
 0x12b   :  { %767 = vmatpush.msra.mxu1 %v4218_v15  ;;  %v4224_v15 = vld [vmem:[#allocation67_spill] sm:$0xff] }
 0x12d   :  { %768 = vmatpush.msra.mxu1 %v4219_v39  ;;  %v2977_v39 = vld [vmem:[#allocation2 + $0xf0] sm:$0xff] }
 0x166   :  { %v474_v46 = vpop.f32.mrf.mxu3 }
 0x16b   :  { %v428_v44 = vpop.f32.mrf.mxu1 }
 0x16c   :  { %v497_v53 = vpop.f32.mrf.mxu0 }
 0x16e   :  { %v477_v31 = vpop.f32.mrf.mxu3 }
 0x171   :  { %v451_v41 = vpop.f32.mrf.mxu2 }
 0x172   :  { %v452_v42 = vadd.f32 %v451_v41, %v428_v44  ;;  %v4225_v44 = vld [vmem:[#allocation100_spill] sm:$0xff] }
 0x173   :  { %v431_v47 = vpop.f32.mrf.mxu1  ;;  %v2981_v41 = vld [vmem:[#allocation2 + $0x40] sm:$0xff] }
 0x174   :  { %v475_v52 = vadd.f32 %v474_v46, %v452_v42  ;;  %v500_v61 = vpop.f32.mrf.mxu0 }
 0x176   :  { %v498_v59 = vadd.f32 %v497_v53, %v475_v52  ;;  %v2989_v52 = vld [vmem:[#allocation2 + $0xe8] sm:$0xff] }
 0x179   :  { %v454_v60 = vpop.f32.mrf.mxu2 }
 0x17a   :  { %v455_v63 = vadd.f32 %v454_v60, %v431_v47  ;;  %v4226_v47 = vld [vmem:[#allocation71_spill] sm:$0xff] }
 0x17b   :  { %v520_v43 = vpop.f32.mrf.mxu1  ;;  %v4227_v60 = vld [vmem:[#allocation75_spill] sm:$0xff] }
 0x17c   :  { %v521_v49 = vadd.f32 %v520_v43, %v498_v59  ;;  %v478_v45 = vadd.f32 %v477_v31, %v455_v63  ;;  %v4228_v63 = vld [vmem:[#allocation103_spill] sm:$0xff]  ;;  %v3001_v31 = vld [vmem:[#allocation2 + $0xe0] sm:$0xff] }
 0x17d   :  { %v2996_v59 = vld [vmem:[#allocation2 + $0x38] sm:$0xff] }
 0x17e   :  { %v2929_v54 = vmul.f32 %v521_v49, %v2405_v56  ;;  %v501_v16 = vadd.f32 %v500_v61, %v478_v45  ;;  %v4229_v49 = vld [vmem:[#allocation79_spill] sm:$0xff]  ;;  %v4230_v45 = vld [vmem:[#allocation105_spill] sm:$0xff]  ;;  %v3005_v61 = vld [vmem:[#allocation2 + $0x30] sm:$0xff] }
 0x180   :  { %606 = vmatmul.f32.vlgmr.msrb.gmra.mxu0 %v2929_v54  ;;  %v528_v4 = vrot.slane %v2929_v54, 2  ;;  %v532_v7 = vrot.slane %v2929_v54, 1  ;;  %v536_v17 = vrot.slane %v2929_v54, 7 }
 0x181   :  { %840 = vmatpush.msrb.mxu0 %v2932_v27 }
 0x183   :  { %v523_v9 = vpop.f32.mrf.mxu1  ;;  %841 = vmatpush.msrb.mxu0 %v2935_v6 }
 0x184   :  { %v524_v0 = vadd.f32 %v523_v9, %v501_v16  ;;  %v540_v16 = vrot.slane %v2929_v54, 6  ;;  %v4231_v9 = vld [vmem:[#allocation83_spill] sm:$0xff] }
 0x185   :  { %842 = vmatpush.msrb.mxu0 %v2938_v20 }
 0x186   :  { %v2942_v1 = vmul.f32 %v524_v0, %v2407_v57  ;;  %v3010_v0 = vld [vmem:[#allocation2 + $0xd8] sm:$0xff] }
 0x187   :  { %843 = vmatpush.msrb.mxu0 %v2946_v12 }
 0x188   :  { %609 = vmatmul.f32.gmra.mxu0 %v2942_v1  ;;  %v529_v18 = vrot.slane %v2942_v1, 2  ;;  %v533_v32 = vrot.slane %v2942_v1, 1  ;;  %v537_v22 = vrot.slane %v2942_v1, 7  ;;  %v541_v43 = vrot.slane %v2942_v1, 6 }
 0x189   :  { %844 = vmatpush.msrb.mxu0 %v2954_v26 }
 0x18a   :  { %v530_v40 = vsel %vm70_vm1, %v528_v4, %v529_v18  ;;  %v534_v25 = vsel %vm75_vm2, %v532_v7, %v533_v32  ;;  %v539_v30 = vsel %vm80_vm0, %v537_v22, %v536_v17  ;;  %v531_v42 = vsel %vm70_vm1, %v529_v18, %v528_v4  ;;  %v3014_v4 = vld [vmem:[#allocation2 + $0x28] sm:$0xff]  ;;  %v4232_v18 = vld [vmem:[#allocation87_spill] sm:$0xff] }
 0x18b   :  { %560 = vmatmul.f32.vlgmr.msra.gmra.mxu2 %v530_v40  ;;  %583 = vmatmul.f32.vlgmr.msra.gmra.mxu3 %v534_v25  ;;  %v535_v46 = vsel %vm75_vm2, %v533_v32, %v532_v7  ;;  %v538_v53 = vsel %vm80_vm0, %v536_v17, %v537_v22  ;;  %v543_v7 = vsel %vm85_vm3, %v541_v43, %v540_v16  ;;  %v3020_v32 = vld [vmem:[#allocation2 + $0xd0] sm:$0xff]  ;;  %v4233_v17 = vld [vmem:[#allocation91_spill] sm:$0xff]  ;;  %v3025_v22 = vld [vmem:[#allocation2 + $0x20] sm:$0xff] }
 0x18c   :  { %629 = vmatmul.f32.vlgmr.msrb.gmra.mxu1 %v539_v30  ;;  %776 = vmatpush.msra.mxu2 %v4220_v50  ;;  %v4234_v40 = vld [vmem:[#allocation95_spill] sm:$0xff]  ;;  %v3041_v50 = vld [vmem:[#allocation2 + $0x10] sm:$0xff] }
 0x18d   :  { %799 = vmatpush.msra.mxu3 %v4221_v29  ;;  %845 = vmatpush.msrb.mxu0 %v2965_v55  ;;  %v3033_v25 = vld [vmem:[#allocation2 + $0x18] sm:$0xff]  ;;  %v542_v29 = vsel %vm85_vm3, %v540_v16, %v541_v43  ;;  %v3106_v43 = vld [vmem:[#allocation2 + $0x148] sm:$0xff]  ;;  %v3115_v16 = vld [vmem:[#allocation2 + $0x130] sm:$0xff] }
 0x18e   :  { %777 = vmatpush.msra.mxu2 %v4222_v33  ;;  %863 = vmatpush.msrb.mxu1 %v2969_v34  ;;  %v4235_v30 = vld [vmem:[#allocation99_spill] sm:$0xff]  ;;  %v3051_v33 = vld [vmem:[#allocation2 + $0x8] sm:$0xff]  ;;  %4246 = vst [vmem:[#allocation50_spill] sm:$0xff] %v3106_v43 }
 0x18f   :  { %800 = vmatpush.msra.mxu3 %v4223_v37  ;;  %846 = vmatpush.msrb.mxu0 %v2973_v38  ;;  %v4237_v37 = vld [vmem:[#allocation104_spill] sm:$0xff]  ;;  %4249 = vst [vmem:[#allocation31_spill] sm:$0xff] %v3115_v16 }
 0x190   :  { %778 = vmatpush.msra.mxu2 %v4224_v15  ;;  %864 = vmatpush.msrb.mxu1 %v2977_v39  ;;  %v3056_v15 = vld [vmem:[#allocation2] sm:$0xff] }
 0x191   :  { %801 = vmatpush.msra.mxu3 %v4225_v44  ;;  %847 = vmatpush.msrb.mxu0 %v2981_v41  ;;  %v4238_v44 = vld [vmem:[#allocation107_spill] sm:$0xff] }
 0x192   :  { %779 = vmatpush.msra.mxu2 %v4226_v47  ;;  %865 = vmatpush.msrb.mxu1 %v2989_v52  ;;  %v3082_v47 = vld [vmem:[#allocation2 + $0x170] sm:$0xff] }
 0x193   :  { %563 = vmatmul.f32.gmra.mxu2 %v531_v42  ;;  %586 = vmatmul.f32.gmra.mxu3 %v535_v46  ;;  %v3065_v42 = vld [vmem:[#allocation2 + $0xa8] sm:$0xff]  ;;  %v3070_v46 = vld [vmem:[#allocation2 + $0xa0] sm:$0xff] }
 0x194   :  { %632 = vmatmul.f32.gmra.mxu1 %v538_v53  ;;  %780 = vmatpush.msra.mxu2 %v4227_v60  ;;  %v3094_v53 = vld [vmem:[#allocation2 + $0x160] sm:$0xff]  ;;  %v3100_v60 = vld [vmem:[#allocation2 + $0x158] sm:$0xff] }
 0x195   :  { %802 = vmatpush.msra.mxu3 %v4228_v63  ;;  %848 = vmatpush.msrb.mxu0 %v2996_v59  ;;  %4242 = vst [vmem:[#allocation25_spill] sm:$0xff] %v3094_v53  ;;  %v3103_v63 = vld [vmem:[#allocation2 + $0x150] sm:$0xff] }
 0x196   :  { %781 = vmatpush.msra.mxu2 %v4229_v49  ;;  %866 = vmatpush.msrb.mxu1 %v3001_v31  ;;  %4244 = vst [vmem:[#allocation12_spill] sm:$0xff] %v3100_v60  ;;  %v3109_v49 = vld [vmem:[#allocation2 + $0x140] sm:$0xff] }
 0x197   :  { %803 = vmatpush.msra.mxu3 %v4230_v45  ;;  %849 = vmatpush.msrb.mxu0 %v3005_v61  ;;  %4245 = vst [vmem:[#allocation28_spill] sm:$0xff] %v3103_v63  ;;  %v3112_v45 = vld [vmem:[#allocation2 + $0x138] sm:$0xff] }
 0x198   :  { %782 = vmatpush.msra.mxu2 %v4231_v9  ;;  %867 = vmatpush.msrb.mxu1 %v3010_v0  ;;  %4247 = vst [vmem:[#allocation13_spill] sm:$0xff] %v3109_v49  ;;  %v3118_v9 = vld [vmem:[#allocation2 + $0x128] sm:$0xff] }
 0x199   :  { %804 = vmatpush.msra.mxu3 %v2722_v51  ;;  %850 = vmatpush.msrb.mxu0 %v3014_v4  ;;  %v3029_v51 = vld [vmem:[#allocation2 + $0xc8] sm:$0xff]  ;;  %4248 = vst [vmem:[#allocation58_spill] sm:$0xff] %v3112_v45 }
 0x19a   :  { %783 = vmatpush.msra.mxu2 %v4232_v18  ;;  %868 = vmatpush.msrb.mxu1 %v3020_v32  ;;  %4250 = vst [vmem:[#allocation52_spill] sm:$0xff] %v3118_v9  ;;  %v3124_v18 = vld [vmem:[#allocation2 + $0x118] sm:$0xff] }
 0x19b   :  { %652 = vmatmul.f32.vlgmr.msrb.gmra.mxu2 %v543_v7  ;;  %805 = vmatpush.msra.mxu3 %v2733_v11  ;;  %v3037_v11 = vld [vmem:[#allocation2 + $0xc0] sm:$0xff]  ;;  %4252 = vst [vmem:[#allocation62_spill] sm:$0xff] %v3124_v18 }
 0x19c   :  { %784 = vmatpush.msra.mxu2 %v4233_v17  ;;  %851 = vmatpush.msrb.mxu0 %v3025_v22  ;;  %v3121_v7 = vld [vmem:[#allocation2 + $0x120] sm:$0xff]  ;;  %v3127_v17 = vld [vmem:[#allocation2 + $0x110] sm:$0xff] }
 0x19d   :  { %806 = vmatpush.msra.mxu3 %v2742_v58  ;;  %869 = vmatpush.msrb.mxu1 %v3029_v51  ;;  %v3045_v58 = vld [vmem:[#allocation2 + $0xb8] sm:$0xff]  ;;  %4251 = vst [vmem:[#allocation14_spill] sm:$0xff] %v3121_v7 }
 0x19e   :  { %785 = vmatpush.msra.mxu2 %v4234_v40  ;;  %852 = vmatpush.msrb.mxu0 %v3033_v25  ;;  %4253 = vst [vmem:[#allocation33_spill] sm:$0xff] %v3127_v17  ;;  %v3130_v40 = vld [vmem:[#allocation2 + $0x108] sm:$0xff] }
 0x19f   :  { %807 = vmatpush.msra.mxu3 %v2750_v10  ;;  %870 = vmatpush.msrb.mxu1 %v3037_v11  ;;  %v4236_v10 = vld [vmem:[#allocation102_spill] sm:$0xff]  ;;  %4254 = vst [vmem:[#allocation54_spill] sm:$0xff] %v3130_v40 }
 0x1a0   :  { %786 = vmatpush.msra.mxu2 %v4235_v30  ;;  %853 = vmatpush.msrb.mxu0 %v3041_v50  ;;  %v3133_v30 = vld [vmem:[#allocation2 + $0x100] sm:$0xff] }
 0x1a1   :  { %808 = vmatpush.msra.mxu3 %v2752_v23  ;;  %871 = vmatpush.msrb.mxu1 %v3045_v58  ;;  %v3060_v23 = vld [vmem:[#allocation2 + $0xb0] sm:$0xff]  ;;  %4255 = vst [vmem:[#allocation15_spill] sm:$0xff] %v3133_v30 }
 0x1a2   :  { %787 = vmatpush.msra.mxu2 %v4236_v10  ;;  %854 = vmatpush.msrb.mxu0 %v3051_v33 }
 0x1a3   :  { %655 = vmatmul.f32.gmra.mxu2 %v542_v29  ;;  %809 = vmatpush.msra.mxu3 %v2758_v19  ;;  %v4239_v19 = vld [vmem:[#allocation108_spill] sm:$0xff] }
 0x1a4   :  { %788 = vmatpush.msra.mxu2 %v4237_v37  ;;  %855 = vmatpush.msrb.mxu0 %v3056_v15 }
 0x1a5   :  { %810 = vmatpush.msra.mxu3 %v2764_v3  ;;  %872 = vmatpush.msrb.mxu1 %v3060_v23  ;;  %v3075_v3 = vld [vmem:[#allocation2 + $0x178] sm:$0xff] }
 0x1a6   :  { %789 = vmatpush.msra.mxu2 %v4238_v44 }
 0x1a7   :  { %811 = vmatpush.msra.mxu3 %v2774_v28  ;;  %873 = vmatpush.msrb.mxu1 %v3065_v42  ;;  %v3078_v28 = vld [vmem:[#allocation2 + $0x98] sm:$0xff] }
 0x1a8   :  { %790 = vmatpush.msra.mxu2 %v4239_v19 }
 0x1a9   :  { %812 = vmatpush.msra.mxu3 %v2776_v8  ;;  %874 = vmatpush.msrb.mxu1 %v3070_v46  ;;  %v3085_v8 = vld [vmem:[#allocation2 + $0x90] sm:$0xff] }
 0x1aa   :  { %791 = vmatpush.msra.mxu2 %v2740_v48  ;;  %v3088_v48 = vld [vmem:[#allocation2 + $0x168] sm:$0xff] }
 0x1ab   :  { %813 = vmatpush.msra.mxu3 %v2782_v13  ;;  %875 = vmatpush.msrb.mxu1 %v3078_v28  ;;  %4240 = vst [vmem:[#allocation27_spill] sm:$0xff] %v3088_v48  ;;  %v3091_v13 = vld [vmem:[#allocation2 + $0x88] sm:$0xff] }
 0x1ac   :  { %886 = vmatpush.msrb.mxu2 %v3075_v3  ;;  %4241 = vst [vmem:[#allocation48_spill] sm:$0xff] %v3091_v13 }
 0x1ad   :  { %814 = vmatpush.msra.mxu3 %v2788_v36  ;;  %876 = vmatpush.msrb.mxu1 %v3085_v8  ;;  %v3097_v36 = vld [vmem:[#allocation2 + $0x80] sm:$0xff] }
 0x1ae   :  { %887 = vmatpush.msrb.mxu2 %v3082_v47  ;;  %4243 = vst [vmem:[#allocation30_spill] sm:$0xff] %v3097_v36 }
 0x1af   :  { %877 = vmatpush.msrb.mxu1 %v3091_v13 }
 0x1b0   :  { %888 = vmatpush.msrb.mxu2 %v3088_v48 }
 0x1b1   :  { %878 = vmatpush.msrb.mxu1 %v3097_v36 }
 0x1b2   :  { %889 = vmatpush.msrb.mxu2 %v3094_v53 }
 0x1b4   :  { %890 = vmatpush.msrb.mxu2 %v3100_v60 }
 0x1b6   :  { %891 = vmatpush.msrb.mxu2 %v3103_v63 }
 0x1b8   :  { %892 = vmatpush.msrb.mxu2 %v3106_v43 }
 0x1ba   :  { %893 = vmatpush.msrb.mxu2 %v3109_v49 }
 0x1bc   :  { %894 = vmatpush.msrb.mxu2 %v3112_v45 }
 0x1be   :  { %895 = vmatpush.msrb.mxu2 %v3115_v16 }
 0x1c0   :  { %896 = vmatpush.msrb.mxu2 %v3118_v9 }
 0x1c2   :  { %897 = vmatpush.msrb.mxu2 %v3121_v7 }
 0x1c4   :  { %898 = vmatpush.msrb.mxu2 %v3124_v18 }
 0x1c6   :  { %899 = vmatpush.msrb.mxu2 %v3127_v17 }
 0x1c8   :  { %900 = vmatpush.msrb.mxu2 %v3130_v40 }
 0x1ca   :  { %901 = vmatpush.msrb.mxu2 %v3133_v30 }
 0x1fd   :  { %v607_v44 = vpop.f32.mrf.mxu0 }
 0x205   :  { %v610_v43 = vpop.f32.mrf.mxu0 }
 0x209   :  { %v630_v9 = vpop.f32.mrf.mxu1 }
 0x20e   :  { %v561_v29 = vpop.f32.mrf.mxu2  ;;  %v584_v10 = vpop.f32.mrf.mxu3 }
 0x20f   :  { %v585_v37 = vadd.f32 %v584_v10, %v561_v29 }
 0x211   :  { %v608_v7 = vadd.f32 %v607_v44, %v585_v37  ;;  %v633_v40 = vpop.f32.mrf.mxu1 }
 0x213   :  { %v631_v45 = vadd.f32 %v630_v9, %v608_v7 }
 0x216   :  { %v564_v19 = vpop.f32.mrf.mxu2  ;;  %v587_v18 = vpop.f32.mrf.mxu3 }
 0x217   :  { %v588_v16 = vadd.f32 %v587_v18, %v564_v19 }
 0x219   :  { %v611_v63 = vadd.f32 %v610_v43, %v588_v16 }
 0x21b   :  { %v634_v36 = vadd.f32 %v633_v40, %v611_v63 }
 0x21e   :  { %v653_v49 = vpop.f32.mrf.mxu2 }
 0x21f   :  { %v654_v17 = vadd.f32 %v653_v49, %v631_v45 }
 0x221   :  { %v659_v60 = vmax.f32 %v654_v17, 1e-12 }
 0x223   :  { %1776 = vrcp.f32 %v659_v60  ;;  %v672_v37 = vand.u32 2147483648, %v659_v60  ;;  %v670_v18 = vand.u32 2147483647, %v659_v60  ;;  %vm666_vm13 = vweird.f32 %v659_v60 }
 0x225   :  { %v673_v43 = vor.u32 1.1754944e-38, %v672_v37  ;;  %vm671_vm15 = vcmp.eq.f32.partialorder %v670_v18, 8.507059e+37  ;;  %v3146_v37 = vld [vmem:[#allocation5 + $0x68] sm:$0xff] }
 0x226   :  { %v656_v53 = vpop.f32.mrf.mxu2 }
 0x227   :  { %v657_v30 = vadd.f32 %v656_v53, %v634_v36 }
 0x229   :  { %v1777_v13 = vpop.eup %1776  ;;  %v660_v48 = vmax.f32 %v657_v30, 1e-12  ;;  %v3140_v30 = vld [vmem:[#allocation5 + $0x78] sm:$0xff] }
 0x22a   :  { %v662_v29 = vmul.f32 %v1777_v13, %v659_v60  ;;  %vm667_vm12 = vweird.f32 %v1777_v13 }
 0x22b   :  { %1778 = vrcp.f32 %v660_v48  ;;  %vm668_vm14 = vmor %vm666_vm13, %vm667_vm12  ;;  %v687_v36 = vand.u32 2147483648, %v660_v48  ;;  %v685_v40 = vand.u32 2147483647, %v660_v48  ;;  %vm681_vm5 = vweird.f32 %v660_v48 }
 0x22c   :  { %v663_v10 = vsub.f32 1.0, %v662_v29 }
 0x22d   :  { %v688_v19 = vor.u32 1.1754944e-38, %v687_v36  ;;  %vm686_vm7 = vcmp.eq.f32.partialorder %v685_v40, 8.507059e+37  ;;  %v3171_v40 = vld [vmem:[#allocation2 + $0x1f8] sm:$0xff] }
 0x22e   :  { %v664_v44 = vmul.f32 %v1777_v13, %v663_v10 }
 0x230   :  { %v665_v9 = vadd.f32 %v1777_v13, %v664_v44 }
 0x231   :  { %v1779_v49 = vpop.eup %1778 }
 0x232   :  { %v677_v45 = vmul.f32 %v1779_v49, %v660_v48  ;;  %v669_v16 = vsel %vm668_vm14, %v1777_v13, %v665_v9  ;;  %vm682_vm4 = vweird.f32 %v1779_v49  ;;  %v3143_v13 = vld [vmem:[#allocation5 + $0x70] sm:$0xff]  ;;  %v3154_v9 = vld [vmem:[#allocation5 + $0x60] sm:$0xff] }
 0x233   :  { %v674_v63 = vsel %vm671_vm15, %v673_v43, %v669_v16  ;;  %vm683_vm6 = vmor %vm681_vm5, %vm682_vm4 }
 0x234   :  { %v678_v7 = vsub.f32 1.0, %v677_v45  ;;  %v3137_v53 = vmul.f32 %v674_v63, %v2405_v56  ;;  %v3162_v63 = vld [vmem:[#allocation5 + $0x58] sm:$0xff] }
 0x236   :  { %v679_v17 = vmul.f32 %v1779_v49, %v678_v7  ;;  %769 = vmatmul.f32.vlgmr.msra.gmra.mxu1 %v3137_v53  ;;  %v691_v18 = vrot.slane %v3137_v53, 6  ;;  %v695_v48 = vrot.slane %v3137_v53, 7  ;;  %v699_v45 = vrot.slane %v3137_v53, 1 }
 0x237   :  { %1003 = vmatpush.msra.mxu1 %v3140_v30 }
 0x238   :  { %v680_v60 = vadd.f32 %v1779_v49, %v679_v17 }
 0x239   :  { %1004 = vmatpush.msra.mxu1 %v3143_v13 }
 0x23a   :  { %v684_v29 = vsel %vm683_vm6, %v1779_v49, %v680_v60  ;;  %v3174_v60 = vld [vmem:[#allocation2 + $0x278] sm:$0xff] }
 0x23b   :  { %v689_v10 = vsel %vm686_vm7, %v688_v19, %v684_v29  ;;  %1005 = vmatpush.msra.mxu1 %v3146_v37  ;;  %4256 = vst [vmem:[#allocation66_spill] sm:$0xff] %v3174_v60  ;;  %v3177_v19 = vld [vmem:[#allocation5 + $0x50] sm:$0xff] }
 0x23c   :  { %v3150_v44 = vmul.f32 %v689_v10, %v2407_v57  ;;  %4257 = vst [vmem:[#allocation16_spill] sm:$0xff] %v3177_v19  ;;  %v3180_v29 = vld [vmem:[#allocation2 + $0x1f0] sm:$0xff]  ;;  %v3183_v10 = vld [vmem:[#allocation5 + $0xf8] sm:$0xff] }
 0x23d   :  { %1006 = vmatpush.msra.mxu1 %v3154_v9  ;;  %4258 = vst [vmem:[#allocation34_spill] sm:$0xff] %v3180_v29 }
 0x23e   :  { %772 = vmatmul.f32.gmra.mxu1 %v3150_v44  ;;  %v692_v49 = vrot.slane %v3150_v44, 6  ;;  %v696_v43 = vrot.slane %v3150_v44, 7  ;;  %v700_v16 = vrot.slane %v3150_v44, 1  ;;  %4259 = vst [vmem:[#allocation56_spill] sm:$0xff] %v3183_v10 }
 0x23f   :  { %1007 = vmatpush.msra.mxu1 %v3162_v63 }
 0x240   :  { %v694_v7 = vsel %vm85_vm3, %v692_v49, %v691_v18  ;;  %v698_v36 = vsel %vm80_vm0, %v696_v43, %v695_v48  ;;  %v701_v17 = vsel %vm75_vm2, %v699_v45, %v700_v16 }
 0x241   :  { %723 = vmatmul.f32.vlgmr.msrb.gmra.mxu3 %v694_v7  ;;  %746 = vmatmul.f32.vlgmr.msra.gmra.mxu0 %v698_v36  ;;  %v3186_v7 = vld [vmem:[#allocation2 + $0x270] sm:$0xff]  ;;  %v3189_v36 = vld [vmem:[#allocation5 + $0x48] sm:$0xff] }
 0x242   :  { %792 = vmatmul.f32.vlgmr.msra.gmra.mxu2 %v701_v17  ;;  %909 = vmatpush.msrb.mxu3 %v3171_v40  ;;  %4260 = vst [vmem:[#allocation17_spill] sm:$0xff] %v3186_v7  ;;  %v3192_v17 = vld [vmem:[#allocation2 + $0x1e8] sm:$0xff] }
 0x243   :  { %932 = vmatpush.msra.mxu0 %v3174_v60  ;;  %1008 = vmatpush.msra.mxu1 %v3177_v19  ;;  %4261 = vst [vmem:[#allocation70_spill] sm:$0xff] %v3189_v36  ;;  %v3195_v19 = vld [vmem:[#allocation5 + $0xf0] sm:$0xff]  ;;  %v3208_v60 = vld [vmem:[#allocation2 + $0x1e0] sm:$0xff] }
 0x244   :  { %910 = vmatpush.msrb.mxu3 %v3180_v29  ;;  %1026 = vmatpush.msra.mxu2 %v3183_v10  ;;  %4262 = vst [vmem:[#allocation35_spill] sm:$0xff] %v3192_v17  ;;  %v3198_v29 = vld [vmem:[#allocation2 + $0x268] sm:$0xff]  ;;  %v3201_v10 = vld [vmem:[#allocation5 + $0x40] sm:$0xff] }
 0x245   :  { %933 = vmatpush.msra.mxu0 %v3186_v7  ;;  %1009 = vmatpush.msra.mxu1 %v3189_v36  ;;  %4263 = vst [vmem:[#allocation60_spill] sm:$0xff] %v3198_v29  ;;  %v693_v7 = vsel %vm85_vm3, %v691_v18, %v692_v49  ;;  %v697_v36 = vsel %vm80_vm0, %v695_v48, %v696_v43  ;;  %v3219_v18 = vld [vmem:[#allocation2 + $0x260] sm:$0xff]  ;;  %v3222_v48 = vld [vmem:[#allocation5 + $0x38] sm:$0xff]  ;;  %v704_v49 = vrot.slane %v3150_v44, 2  ;;  %v3226_v43 = vld [vmem:[#allocation2 + $0x1d0] sm:$0xff] }
 0x246   :  { %911 = vmatpush.msrb.mxu3 %v3192_v17  ;;  %1027 = vmatpush.msra.mxu2 %v3195_v19  ;;  %4264 = vst [vmem:[#allocation18_spill] sm:$0xff] %v3201_v10  ;;  %v3211_v17 = vld [vmem:[#allocation5 + $0xe8] sm:$0xff]  ;;  %v3242_v44 = vld [vmem:[#allocation5 + $0xd8] sm:$0xff] }
 0x247   :  { %934 = vmatpush.msra.mxu0 %v3198_v29  ;;  %1010 = vmatpush.msra.mxu1 %v3201_v10  ;;  %v702_v29 = vsel %vm75_vm2, %v700_v16, %v699_v45  ;;  %v3216_v10 = vld [vmem:[#allocation2 + $0x1d8] sm:$0xff]  ;;  %4265 = vst [vmem:[#allocation74_spill] sm:$0xff] %v3222_v48  ;;  %v3229_v45 = vld [vmem:[#allocation5 + $0xe0] sm:$0xff] }
 0x248   :  { %912 = vmatpush.msrb.mxu3 %v3208_v60  ;;  %1028 = vmatpush.msra.mxu2 %v3211_v17  ;;  %4266 = vst [vmem:[#allocation36_spill] sm:$0xff] %v3226_v43  ;;  %v3232_v16 = vld [vmem:[#allocation2 + $0x258] sm:$0xff] }
 0x249   :  { %726 = vmatmul.f32.gmra.mxu3 %v693_v7  ;;  %749 = vmatmul.f32.gmra.mxu0 %v697_v36  ;;  %4267 = vst [vmem:[#allocation64_spill] sm:$0xff] %v3229_v45  ;;  %v703_v7 = vrot.slane %v3137_v53, 2  ;;  %v3239_v36 = vld [vmem:[#allocation2 + $0x1c8] sm:$0xff]  ;;  %v3253_v53 = vld [vmem:[#allocation2 + $0x1c0] sm:$0xff] }
 0x24a   :  { %795 = vmatmul.f32.gmra.mxu2 %v702_v29  ;;  %913 = vmatpush.msrb.mxu3 %v3216_v10  ;;  %4268 = vst [vmem:[#allocation19_spill] sm:$0xff] %v3232_v16  ;;  %v3235_v29 = vld [vmem:[#allocation5 + $0x30] sm:$0xff] }
 0x24b   :  { %935 = vmatpush.msra.mxu0 %v3219_v18  ;;  %1011 = vmatpush.msra.mxu1 %v3222_v48  ;;  %4269 = vst [vmem:[#allocation78_spill] sm:$0xff] %v3235_v29 }
 0x24c   :  { %914 = vmatpush.msrb.mxu3 %v3226_v43  ;;  %1029 = vmatpush.msra.mxu2 %v3229_v45  ;;  %4270 = vst [vmem:[#allocation37_spill] sm:$0xff] %v3239_v36  ;;  %v3245_v43 = vld [vmem:[#allocation2 + $0x250] sm:$0xff]  ;;  %v3248_v45 = vld [vmem:[#allocation5 + $0x28] sm:$0xff] }
 0x24d   :  { %936 = vmatpush.msra.mxu0 %v3232_v16  ;;  %1012 = vmatpush.msra.mxu1 %v3235_v29  ;;  %4271 = vst [vmem:[#allocation20_spill] sm:$0xff] %v3242_v44  ;;  %v705_v29 = vsel %vm70_vm1, %v703_v7, %v704_v49  ;;  %v3268_v16 = vld [vmem:[#allocation2 + $0x240] sm:$0xff] }
 0x24e   :  { %915 = vmatpush.msrb.mxu3 %v3239_v36  ;;  %1030 = vmatpush.msra.mxu2 %v3242_v44  ;;  %4272 = vst [vmem:[#allocation68_spill] sm:$0xff] %v3245_v43  ;;  %v3256_v36 = vld [vmem:[#allocation5 + $0xd0] sm:$0xff]  ;;  %v3259_v44 = vld [vmem:[#allocation2 + $0x248] sm:$0xff] }
 0x24f   :  { %937 = vmatpush.msra.mxu0 %v3245_v43  ;;  %4273 = vst [vmem:[#allocation38_spill] sm:$0xff] %v3248_v45  ;;  %1013 = vmatpush.msra.mxu1 %v3248_v45  ;;  %v3262_v43 = vld [vmem:[#allocation2 + $0x1b8] sm:$0xff]  ;;  %v3265_v45 = vld [vmem:[#allocation5 + $0x20] sm:$0xff] }
 0x250   :  { %4274 = vst [vmem:[#allocation82_spill] sm:$0xff] %v3253_v53  ;;  %916 = vmatpush.msrb.mxu3 %v3253_v53  ;;  %1031 = vmatpush.msra.mxu2 %v3256_v36  ;;  %v3271_v53 = vld [vmem:[#allocation5 + $0xc8] sm:$0xff] }
 0x251   :  { %4275 = vst [vmem:[#allocation21_spill] sm:$0xff] %v3256_v36  ;;  %815 = vmatmul.f32.vlgmr.msra.gmra.mxu3 %v705_v29  ;;  %938 = vmatpush.msra.mxu0 %v3259_v44  ;;  %v3274_v29 = vld [vmem:[#allocation2 + $0x1b0] sm:$0xff] }
 0x252   :  { %4276 = vst [vmem:[#allocation72_spill] sm:$0xff] %v3259_v44  ;;  %917 = vmatpush.msrb.mxu3 %v3262_v43  ;;  %1014 = vmatpush.msra.mxu1 %v3265_v45  ;;  %v3277_v44 = vld [vmem:[#allocation5 + $0x18] sm:$0xff] }
 0x253   :  { %4277 = vst [vmem:[#allocation39_spill] sm:$0xff] %v3262_v43  ;;  %939 = vmatpush.msra.mxu0 %v3268_v16  ;;  %1032 = vmatpush.msra.mxu2 %v3271_v53  ;;  %v3280_v43 = vld [vmem:[#allocation2 + $0x238] sm:$0xff] }
 0x254   :  { %4278 = vst [vmem:[#allocation86_spill] sm:$0xff] %v3265_v45  ;;  %918 = vmatpush.msrb.mxu3 %v3274_v29  ;;  %1015 = vmatpush.msra.mxu1 %v3277_v44  ;;  %v3283_v45 = vld [vmem:[#allocation5 + $0xc0] sm:$0xff] }
 0x255   :  { %4279 = vst [vmem:[#allocation22_spill] sm:$0xff] %v3268_v16  ;;  %940 = vmatpush.msra.mxu0 %v3280_v43  ;;  %1033 = vmatpush.msra.mxu2 %v3283_v45  ;;  %v3286_v16 = vld [vmem:[#allocation2 + $0x1a8] sm:$0xff] }
 0x256   :  { %4280 = vst [vmem:[#allocation76_spill] sm:$0xff] %v3271_v53  ;;  %919 = vmatpush.msrb.mxu3 %v3286_v16  ;;  %v3289_v53 = vld [vmem:[#allocation5 + $0x10] sm:$0xff] }
 0x257   :  { %4281 = vst [vmem:[#allocation40_spill] sm:$0xff] %v3274_v29  ;;  %1016 = vmatpush.msra.mxu1 %v3289_v53  ;;  %v3292_v29 = vld [vmem:[#allocation2 + $0x230] sm:$0xff] }
 0x258   :  { %4282 = vst [vmem:[#allocation90_spill] sm:$0xff] %v3277_v44  ;;  %941 = vmatpush.msra.mxu0 %v3292_v29  ;;  %v3295_v44 = vld [vmem:[#allocation5 + $0xb8] sm:$0xff] }
 0x259   :  { %4283 = vst [vmem:[#allocation23_spill] sm:$0xff] %v3280_v43  ;;  %1034 = vmatpush.msra.mxu2 %v3295_v44  ;;  %v706_v43 = vsel %vm70_vm1, %v704_v49, %v703_v7  ;;  %v3315_v49 = vld [vmem:[#allocation2 + $0x220] sm:$0xff]  ;;  %v3318_v7 = vld [vmem:[#allocation5 + $0xb0] sm:$0xff] }
 0x25a   :  { %4284 = vst [vmem:[#allocation80_spill] sm:$0xff] %v3283_v45  ;;  %v3300_v45 = vld [vmem:[#allocation2 + $0x1a0] sm:$0xff]  ;;  %818 = vmatmul.f32.gmra.mxu3 %v706_v43  ;;  %v3321_v43 = vld [vmem:[#allocation2 + $0x190] sm:$0xff] }
 0x25b   :  { %4285 = vst [vmem:[#allocation41_spill] sm:$0xff] %v3286_v16  ;;  %920 = vmatpush.msrb.mxu3 %v3300_v45  ;;  %v3303_v16 = vld [vmem:[#allocation5 + $0x8] sm:$0xff]  ;;  %1035 = vmatpush.msra.mxu2 %v3318_v7 }
 0x25c   :  { %4286 = vst [vmem:[#allocation24_spill] sm:$0xff] %v3289_v53  ;;  %1017 = vmatpush.msra.mxu1 %v3303_v16  ;;  %v3306_v53 = vld [vmem:[#allocation2 + $0x228] sm:$0xff] }
 0x25d   :  { %4287 = vst [vmem:[#allocation84_spill] sm:$0xff] %v3292_v29  ;;  %942 = vmatpush.msra.mxu0 %v3306_v53  ;;  %v3309_v29 = vld [vmem:[#allocation2 + $0x198] sm:$0xff]  ;;  %1036 = vmatpush.msra.mxu2 %v4196_v24  ;;  %v3345_v24 = vld [vmem:[#allocation2 + $0x200] sm:$0xff] }
 0x25e   :  { %4288 = vst [vmem:[#allocation42_spill] sm:$0xff] %v3295_v44  ;;  %921 = vmatpush.msrb.mxu3 %v3309_v29  ;;  %v3312_v44 = vld [vmem:[#allocation5] sm:$0xff] }
 0x25f   :  { %4289 = vst [vmem:[#allocation94_spill] sm:$0xff] %v3300_v45  ;;  %1018 = vmatpush.msra.mxu1 %v3312_v44  ;;  %943 = vmatpush.msra.mxu0 %v3315_v49 }
 0x260   :  { %4290 = vst [vmem:[#allocation26_spill] sm:$0xff] %v3303_v16  ;;  %922 = vmatpush.msrb.mxu3 %v3321_v43  ;;  %1037 = vmatpush.msra.mxu2 %v4199_v2  ;;  %v3352_v2 = vld [vmem:[#allocation5 + $0x168] sm:$0xff] }
 0x261   :  { %4291 = vst [vmem:[#allocation88_spill] sm:$0xff] %v3306_v53  ;;  %v3324_v53 = vld [vmem:[#allocation2 + $0x218] sm:$0xff] }
 0x262   :  { %4292 = vst [vmem:[#allocation43_spill] sm:$0xff] %v3309_v29  ;;  %944 = vmatpush.msra.mxu0 %v3324_v53  ;;  %v3328_v29 = vld [vmem:[#allocation2 + $0x188] sm:$0xff]  ;;  %1038 = vmatpush.msra.mxu2 %v2708_v35  ;;  %v3360_v35 = vld [vmem:[#allocation5 + $0x158] sm:$0xff] }
 0x263   :  { %4293 = vst [vmem:[#allocation98_spill] sm:$0xff] %v3312_v44  ;;  %923 = vmatpush.msrb.mxu3 %v3328_v29  ;;  %v3331_v44 = vld [vmem:[#allocation2 + $0x210] sm:$0xff] }
 0x264   :  { %4294 = vst [vmem:[#allocation29_spill] sm:$0xff] %v3315_v49  ;;  %945 = vmatpush.msra.mxu0 %v3331_v44  ;;  %1039 = vmatpush.msra.mxu2 %v4205_v21  ;;  %v3366_v21 = vld [vmem:[#allocation5 + $0x148] sm:$0xff] }
 0x265   :  { %4295 = vst [vmem:[#allocation44_spill] sm:$0xff] %v3318_v7  ;;  %v3335_v7 = vld [vmem:[#allocation2 + $0x180] sm:$0xff] }
 0x266   :  { %4296 = vst [vmem:[#allocation101_spill] sm:$0xff] %v3321_v43  ;;  %924 = vmatpush.msrb.mxu3 %v3335_v7  ;;  %v3338_v43 = vld [vmem:[#allocation2 + $0x208] sm:$0xff]  ;;  %1040 = vmatpush.msra.mxu2 %v2725_v5  ;;  %v3372_v5 = vld [vmem:[#allocation5 + $0x138] sm:$0xff] }
 0x267   :  { %4297 = vst [vmem:[#allocation32_spill] sm:$0xff] %v3324_v53  ;;  %946 = vmatpush.msra.mxu0 %v3338_v43  ;;  %v3341_v53 = vld [vmem:[#allocation5 + $0x178] sm:$0xff] }
 0x268   :  { %4298 = vst [vmem:[#allocation45_spill] sm:$0xff] %v3328_v29  ;;  %1049 = vmatpush.msra.mxu3 %v3341_v53  ;;  %1041 = vmatpush.msra.mxu2 %v2738_v14  ;;  %v3375_v14 = vld [vmem:[#allocation5 + $0x130] sm:$0xff] }
 0x269   :  { %4299 = vst [vmem:[#allocation47_spill] sm:$0xff] %v3331_v44  ;;  %947 = vmatpush.msra.mxu0 %v3345_v24  ;;  %v3348_v44 = vld [vmem:[#allocation5 + $0x170] sm:$0xff] }
 0x26a   :  { %4300 = vst [vmem:[#allocation46_spill] sm:$0xff] %v3335_v7  ;;  %1050 = vmatpush.msra.mxu3 %v3348_v44 }
 0x26b   :  { %4301 = vst [vmem:[#allocation49_spill] sm:$0xff] %v3338_v43  ;;  %v3356_v43 = vld [vmem:[#allocation5 + $0x160] sm:$0xff] }
 0x26c   :  { %4302 = vst [vmem:[#allocation106_spill] sm:$0xff] %v3341_v53  ;;  %1051 = vmatpush.msra.mxu3 %v3352_v2 }
 0x26d   :  { %4303 = vst [vmem:[#allocation51_spill] sm:$0xff] %v3345_v24  ;;  %v3363_v24 = vld [vmem:[#allocation5 + $0x150] sm:$0xff] }
 0x26e   :  { %4304 = vst [vmem:[#allocation53_spill] sm:$0xff] %v3348_v44  ;;  %1052 = vmatpush.msra.mxu3 %v3356_v43 }
 0x26f   :  { %4305 = vst [vmem:[#allocation55_spill] sm:$0xff] %v3352_v2  ;;  %v3369_v2 = vld [vmem:[#allocation5 + $0x140] sm:$0xff] }
 0x270   :  { %4306 = vst [vmem:[#allocation57_spill] sm:$0xff] %v3356_v43  ;;  %1053 = vmatpush.msra.mxu3 %v3360_v35 }
 0x271   :  { %4307 = vst [vmem:[#allocation61_spill] sm:$0xff] %v3360_v35  ;;  %v3378_v35 = vld [vmem:[#allocation5 + $0x128] sm:$0xff] }
 0x272   :  { %4308 = vst [vmem:[#allocation65_spill] sm:$0xff] %v3363_v24  ;;  %1054 = vmatpush.msra.mxu3 %v3363_v24  ;;  %v3381_v24 = vld [vmem:[#allocation5 + $0x120] sm:$0xff] }
 0x273   :  { %4309 = vst [vmem:[#allocation69_spill] sm:$0xff] %v3366_v21 }
 0x274   :  { %1055 = vmatpush.msra.mxu3 %v3366_v21  ;;  %4310 = vst [vmem:[#allocation73_spill] sm:$0xff] %v3369_v2  ;;  %v3384_v21 = vld [vmem:[#allocation5 + $0x118] sm:$0xff] }
 0x275   :  { %4311 = vst [vmem:[#allocation77_spill] sm:$0xff] %v3372_v5 }
 0x276   :  { %1056 = vmatpush.msra.mxu3 %v3369_v2  ;;  %4312 = vst [vmem:[#allocation81_spill] sm:$0xff] %v3375_v14  ;;  %v3387_v2 = vld [vmem:[#allocation5 + $0x110] sm:$0xff] }
 0x277   :  { %4313 = vst [vmem:[#allocation85_spill] sm:$0xff] %v3378_v35 }
 0x278   :  { %1057 = vmatpush.msra.mxu3 %v3372_v5  ;;  %4314 = vst [vmem:[#allocation89_spill] sm:$0xff] %v3381_v24  ;;  %v3390_v5 = vld [vmem:[#allocation5 + $0x108] sm:$0xff] }
 0x279   :  { %4315 = vst [vmem:[#allocation93_spill] sm:$0xff] %v3384_v21 }
 0x27a   :  { %1058 = vmatpush.msra.mxu3 %v3375_v14  ;;  %4316 = vst [vmem:[#allocation97_spill] sm:$0xff] %v3387_v2  ;;  %v3393_v14 = vld [vmem:[#allocation5 + $0x100] sm:$0xff] }
 0x27b   :  { %4317 = vst [vmem:[#allocation59_spill] sm:$0xff] %v3390_v5 }
 0x27c   :  { %1059 = vmatpush.msra.mxu3 %v3378_v35  ;;  %4318 = vst [vmem:[#allocation92_spill] sm:$0xff] %v3393_v14 }
 0x27e   :  { %1060 = vmatpush.msra.mxu3 %v3381_v24 }
 0x280   :  { %1061 = vmatpush.msra.mxu3 %v3384_v21 }
 0x282   :  { %1062 = vmatpush.msra.mxu3 %v3387_v2 }
 0x284   :  { %1063 = vmatpush.msra.mxu3 %v3390_v5 }
 0x286   :  { %1064 = vmatpush.msra.mxu3 %v3393_v14 }
 0x2b3   :  { %v770_v24 = vpop.f32.mrf.mxu1 }
 0x2bb   :  { %v773_v36 = vpop.f32.mrf.mxu1 }
 0x2be   :  { %v747_v43 = vpop.f32.mrf.mxu0 }
 0x2c4   :  { %v724_v35 = vpop.f32.mrf.mxu3 }
 0x2c5   :  { %v748_v44 = vadd.f32 %v747_v43, %v724_v35  ;;  %v793_v29 = vpop.f32.mrf.mxu2 }
 0x2c6   :  { %v750_v21 = vpop.f32.mrf.mxu0 }
 0x2c7   :  { %v771_v7 = vadd.f32 %v770_v24, %v748_v44  ;;  %v3440_v24 = vld [vmem:[#allocation5 + $0x268] sm:$0xff] }
 0x2c9   :  { %v794_v49 = vadd.f32 %v793_v29, %v771_v7  ;;  %v3424_v29 = vld [vmem:[#allocation5 + $0x278] sm:$0xff]  ;;  %v3436_v7 = vld [vmem:[#allocation5 + $0x1e8] sm:$0xff] }
 0x2cc   :  { %v727_v53 = vpop.f32.mrf.mxu3 }
 0x2cd   :  { %v751_v16 = vadd.f32 %v750_v21, %v727_v53  ;;  %v796_v14 = vpop.f32.mrf.mxu2 }
 0x2cf   :  { %v774_v48 = vadd.f32 %v773_v36, %v751_v16  ;;  %v3421_v36 = vld [vmem:[#allocation5 + $0x1f8] sm:$0xff] }
 0x2d1   :  { %v797_v43 = vadd.f32 %v796_v14, %v774_v48  ;;  %v3462_v14 = vld [vmem:[#allocation5 + $0x1d0] sm:$0xff] }
 0x2d4   :  { %v816_v45 = vpop.f32.mrf.mxu3 }
 0x2d5   :  { %v817_v2 = vadd.f32 %v816_v45, %v794_v49  ;;  %v3432_v49 = vld [vmem:[#allocation5 + $0x270] sm:$0xff] }
 0x2d7   :  { %v3397_v5 = vmul.f32 %v817_v2, %v2929_v54  ;;  %v3448_v2 = vld [vmem:[#allocation5 + $0x1e0] sm:$0xff] }
 0x2d9   :  { %902 = vmatmul.f32.vlgmr.msrb.gmra.mxu2 %v3397_v5  ;;  %v824_v45 = vrot.slane %v3397_v5, 2  ;;  %v828_v54 = vrot.slane %v3397_v5, 1 }
 0x2da   :  { %1136 = vmatpush.msrb.mxu2 %v2932_v27 }
 0x2dc   :  { %1137 = vmatpush.msrb.mxu2 %v2935_v6  ;;  %v832_v6 = vrot.slane %v3397_v5, 7 }
 0x2dd   :  { %v819_v35 = vpop.f32.mrf.mxu3 }
 0x2de   :  { %v820_v44 = vadd.f32 %v819_v35, %v797_v43  ;;  %1138 = vmatpush.msrb.mxu2 %v2938_v20  ;;  %v836_v43 = vrot.slane %v3397_v5, 6  ;;  %v3471_v35 = vld [vmem:[#allocation5 + $0x1c8] sm:$0xff] }
 0x2e0   :  { %v3404_v53 = vmul.f32 %v820_v44, %v2942_v1  ;;  %1139 = vmatpush.msrb.mxu2 %v2946_v12  ;;  %v3481_v44 = vld [vmem:[#allocation5 + $0x1c0] sm:$0xff] }
 0x2e2   :  { %905 = vmatmul.f32.gmra.mxu2 %v3404_v53  ;;  %v825_v27 = vrot.slane %v3404_v53, 2  ;;  %v829_v48 = vrot.slane %v3404_v53, 1  ;;  %v833_v16 = vrot.slane %v3404_v53, 7  ;;  %v837_v21 = vrot.slane %v3404_v53, 6 }
 0x2e3   :  { %1140 = vmatpush.msrb.mxu2 %v2954_v26  ;;  %v3428_v26 = vld [vmem:[#allocation5 + $0x1f0] sm:$0xff] }
 0x2e4   :  { %v826_v20 = vsel %vm70_vm1, %v824_v45, %v825_v27  ;;  %v830_v1 = vsel %vm75_vm2, %v828_v54, %v829_v48  ;;  %v835_v12 = vsel %vm80_vm0, %v833_v16, %v832_v6 }
 0x2e5   :  { %856 = vmatmul.f32.vlgmr.msrb.gmra.mxu0 %v826_v20  ;;  %879 = vmatmul.f32.vlgmr.msrb.gmra.mxu1 %v830_v1  ;;  %v4327_v20 = vld [vmem:[#allocation25_spill] sm:$0xff]  ;;  %v4328_v1 = vld [vmem:[#allocation30_spill] sm:$0xff] }
 0x2e6   :  { %925 = vmatmul.f32.vlgmr.msrb.gmra.mxu3 %v835_v12  ;;  %1072 = vmatpush.msrb.mxu0 %v3421_v36  ;;  %v4329_v12 = vld [vmem:[#allocation12_spill] sm:$0xff] }
 0x2e7   :  { %1095 = vmatpush.msrb.mxu1 %v3424_v29  ;;  %1141 = vmatpush.msrb.mxu2 %v2965_v55  ;;  %v827_v55 = vsel %vm70_vm1, %v825_v27, %v824_v45  ;;  %v3496_v45 = vld [vmem:[#allocation5 + $0x1b0] sm:$0xff] }
 0x2e8   :  { %1073 = vmatpush.msrb.mxu0 %v3428_v26  ;;  %1159 = vmatpush.msrb.mxu3 %v2969_v34  ;;  %v831_v34 = vsel %vm75_vm2, %v829_v48, %v828_v54  ;;  %v3504_v54 = vld [vmem:[#allocation5 + $0x1a8] sm:$0xff]  ;;  %v3529_v27 = vld [vmem:[#allocation5 + $0x190] sm:$0xff] }
 0x2e9   :  { %1096 = vmatpush.msrb.mxu1 %v3432_v49  ;;  %1142 = vmatpush.msrb.mxu2 %v2973_v38  ;;  %v834_v38 = vsel %vm80_vm0, %v832_v6, %v833_v16  ;;  %v3536_v48 = vld [vmem:[#allocation5 + $0x188] sm:$0xff]  ;;  %v4326_v16 = vld [vmem:[#allocation48_spill] sm:$0xff] }
 0x2ea   :  { %1074 = vmatpush.msrb.mxu0 %v3436_v7  ;;  %1160 = vmatpush.msrb.mxu3 %v2977_v39  ;;  %v3454_v39 = vld [vmem:[#allocation5 + $0x1d8] sm:$0xff]  ;;  %4320 = vst [vmem:[#allocation96_spill] sm:$0xff] %v3536_v48  ;;  %v3546_v6 = vld [vmem:[#allocation5 + $0x208] sm:$0xff] }
 0x2eb   :  { %1097 = vmatpush.msrb.mxu1 %v3440_v24  ;;  %1143 = vmatpush.msrb.mxu2 %v2981_v41  ;;  %v3457_v41 = vld [vmem:[#allocation5 + $0x260] sm:$0xff]  ;;  %4323 = vst [vmem:[#allocation71_spill] sm:$0xff] %v3546_v6 }
 0x2ec   :  { %1075 = vmatpush.msrb.mxu0 %v3448_v2  ;;  %1161 = vmatpush.msrb.mxu3 %v2989_v52  ;;  %v3466_v52 = vld [vmem:[#allocation5 + $0x258] sm:$0xff] }
 0x2ed   :  { %859 = vmatmul.f32.gmra.mxu0 %v827_v55  ;;  %882 = vmatmul.f32.gmra.mxu1 %v831_v34  ;;  %v4332_v55 = vld [vmem:[#allocation13_spill] sm:$0xff]  ;;  %v4333_v34 = vld [vmem:[#allocation58_spill] sm:$0xff] }
 0x2ee   :  { %928 = vmatmul.f32.gmra.mxu3 %v834_v38  ;;  %1076 = vmatpush.msrb.mxu0 %v3454_v39  ;;  %v4336_v38 = vld [vmem:[#allocation14_spill] sm:$0xff] }
 0x2ef   :  { %1098 = vmatpush.msrb.mxu1 %v3457_v41  ;;  %1144 = vmatpush.msrb.mxu2 %v2996_v59  ;;  %v3475_v59 = vld [vmem:[#allocation5 + $0x250] sm:$0xff] }
 0x2f0   :  { %1077 = vmatpush.msrb.mxu0 %v3462_v14  ;;  %1162 = vmatpush.msrb.mxu3 %v3001_v31  ;;  %v839_v31 = vsel %vm85_vm3, %v837_v21, %v836_v43 }
 0x2f1   :  { %1099 = vmatpush.msrb.mxu1 %v3466_v52  ;;  %1145 = vmatpush.msrb.mxu2 %v3005_v61  ;;  %v3485_v61 = vld [vmem:[#allocation5 + $0x248] sm:$0xff] }
 0x2f2   :  { %1078 = vmatpush.msrb.mxu0 %v3471_v35  ;;  %1163 = vmatpush.msrb.mxu3 %v3010_v0  ;;  %v3488_v0 = vld [vmem:[#allocation5 + $0x1b8] sm:$0xff] }
 0x2f3   :  { %1100 = vmatpush.msrb.mxu1 %v3475_v59  ;;  %1146 = vmatpush.msrb.mxu2 %v3014_v4  ;;  %v3492_v4 = vld [vmem:[#allocation5 + $0x240] sm:$0xff] }
 0x2f4   :  { %1079 = vmatpush.msrb.mxu0 %v3481_v44  ;;  %1164 = vmatpush.msrb.mxu3 %v3020_v32  ;;  %v3500_v32 = vld [vmem:[#allocation5 + $0x238] sm:$0xff] }
 0x2f5   :  { %948 = vmatmul.f32.vlgmr.msra.gmra.mxu0 %v839_v31  ;;  %1101 = vmatpush.msrb.mxu1 %v3485_v61  ;;  %v4339_v31 = vld [vmem:[#allocation54_spill] sm:$0xff] }
 0x2f6   :  { %1080 = vmatpush.msrb.mxu0 %v3488_v0  ;;  %1147 = vmatpush.msrb.mxu2 %v3025_v22  ;;  %v3508_v22 = vld [vmem:[#allocation5 + $0x230] sm:$0xff] }
 0x2f7   :  { %1102 = vmatpush.msrb.mxu1 %v3492_v4  ;;  %1165 = vmatpush.msrb.mxu3 %v3029_v51  ;;  %v838_v51 = vsel %vm85_vm3, %v836_v43, %v837_v21  ;;  %v4337_v21 = vld [vmem:[#allocation62_spill] sm:$0xff]  ;;  %v4338_v43 = vld [vmem:[#allocation33_spill] sm:$0xff] }
 0x2f8   :  { %1081 = vmatpush.msrb.mxu0 %v3496_v45  ;;  %1148 = vmatpush.msrb.mxu2 %v3033_v25  ;;  %v3514_v25 = vld [vmem:[#allocation5 + $0x1a0] sm:$0xff] }
 0x2f9   :  { %1103 = vmatpush.msrb.mxu1 %v3500_v32  ;;  %1166 = vmatpush.msrb.mxu3 %v3037_v11  ;;  %v3518_v11 = vld [vmem:[#allocation5 + $0x228] sm:$0xff] }
 0x2fa   :  { %1082 = vmatpush.msrb.mxu0 %v3504_v54  ;;  %1149 = vmatpush.msrb.mxu2 %v3041_v50  ;;  %v3521_v50 = vld [vmem:[#allocation5 + $0x198] sm:$0xff] }
 0x2fb   :  { %1104 = vmatpush.msrb.mxu1 %v3508_v22  ;;  %1167 = vmatpush.msrb.mxu3 %v3045_v58  ;;  %v3525_v58 = vld [vmem:[#allocation5 + $0x220] sm:$0xff] }
 0x2fc   :  { %1083 = vmatpush.msrb.mxu0 %v3514_v25  ;;  %1150 = vmatpush.msrb.mxu2 %v3051_v33  ;;  %v3532_v33 = vld [vmem:[#allocation5 + $0x218] sm:$0xff] }
 0x2fd   :  { %951 = vmatmul.f32.gmra.mxu0 %v838_v51  ;;  %1105 = vmatpush.msrb.mxu1 %v3518_v11  ;;  %4319 = vst [vmem:[#allocation63_spill] sm:$0xff] %v3532_v33  ;;  %v4340_v51 = vld [vmem:[#allocation15_spill] sm:$0xff] }
 0x2fe   :  { %1084 = vmatpush.msrb.mxu0 %v3521_v50  ;;  %1151 = vmatpush.msrb.mxu2 %v3056_v15  ;;  %v3539_v15 = vld [vmem:[#allocation5 + $0x210] sm:$0xff] }
 0x2ff   :  { %1106 = vmatpush.msrb.mxu1 %v3525_v58  ;;  %1168 = vmatpush.msrb.mxu3 %v3060_v23  ;;  %4321 = vst [vmem:[#allocation67_spill] sm:$0xff] %v3539_v15  ;;  %v3543_v23 = vld [vmem:[#allocation5 + $0x180] sm:$0xff] }
 0x300   :  { %1085 = vmatpush.msrb.mxu0 %v3529_v27  ;;  %4322 = vst [vmem:[#allocation100_spill] sm:$0xff] %v3543_v23 }
 0x301   :  { %1107 = vmatpush.msrb.mxu1 %v3532_v33  ;;  %1169 = vmatpush.msrb.mxu3 %v3065_v42  ;;  %v3551_v42 = vld [vmem:[#allocation5 + $0x200] sm:$0xff] }
 0x302   :  { %1086 = vmatpush.msrb.mxu0 %v3536_v48  ;;  %4324 = vst [vmem:[#allocation75_spill] sm:$0xff] %v3551_v42 }
 0x303   :  { %1108 = vmatpush.msrb.mxu1 %v3539_v15  ;;  %1170 = vmatpush.msrb.mxu3 %v3070_v46  ;;  %v4325_v46 = vld [vmem:[#allocation27_spill] sm:$0xff] }
 0x304   :  { %1087 = vmatpush.msrb.mxu0 %v3543_v23 }
 0x305   :  { %1109 = vmatpush.msrb.mxu1 %v3546_v6  ;;  %1171 = vmatpush.msrb.mxu3 %v3078_v28  ;;  %v4331_v28 = vld [vmem:[#allocation50_spill] sm:$0xff] }
 0x306   :  { %1182 = vmatpush.msra.mxu0 %v3075_v3  ;;  %v4330_v3 = vld [vmem:[#allocation28_spill] sm:$0xff] }
 0x307   :  { %1110 = vmatpush.msrb.mxu1 %v3551_v42  ;;  %1172 = vmatpush.msrb.mxu3 %v3085_v8  ;;  %v4335_v8 = vld [vmem:[#allocation52_spill] sm:$0xff] }
 0x308   :  { %1183 = vmatpush.msra.mxu0 %v3082_v47  ;;  %v4334_v47 = vld [vmem:[#allocation31_spill] sm:$0xff] }
 0x309   :  { %1173 = vmatpush.msrb.mxu3 %v4326_v16 }
 0x30a   :  { %1184 = vmatpush.msra.mxu0 %v4325_v46 }
 0x30b   :  { %1174 = vmatpush.msrb.mxu3 %v4328_v1 }
 0x30c   :  { %1185 = vmatpush.msra.mxu0 %v4327_v20 }
 0x30e   :  { %1186 = vmatpush.msra.mxu0 %v4329_v12 }
 0x310   :  { %1187 = vmatpush.msra.mxu0 %v4330_v3 }
 0x312   :  { %1188 = vmatpush.msra.mxu0 %v4331_v28 }
 0x314   :  { %1189 = vmatpush.msra.mxu0 %v4332_v55 }
 0x316   :  { %1190 = vmatpush.msra.mxu0 %v4333_v34 }
 0x318   :  { %1191 = vmatpush.msra.mxu0 %v4334_v47 }
 0x31a   :  { %1192 = vmatpush.msra.mxu0 %v4335_v8 }
 0x31c   :  { %1193 = vmatpush.msra.mxu0 %v4336_v38 }
 0x31e   :  { %1194 = vmatpush.msra.mxu0 %v4337_v21 }
 0x320   :  { %1195 = vmatpush.msra.mxu0 %v4338_v43 }
 0x322   :  { %1196 = vmatpush.msra.mxu0 %v4339_v31 }
 0x324   :  { %1197 = vmatpush.msra.mxu0 %v4340_v51 }
 0x35c   :  { %v903_v12 = vpop.f32.mrf.mxu2 }
 0x362   :  { %v857_v46 = vpop.f32.mrf.mxu0  ;;  %v880_v16 = vpop.f32.mrf.mxu1 }
 0x363   :  { %v881_v1 = vadd.f32 %v880_v16, %v857_v46 }
 0x365   :  { %v904_v28 = vadd.f32 %v903_v12, %v881_v1  ;;  %v906_v21 = vpop.f32.mrf.mxu2 }
 0x369   :  { %v926_v3 = vpop.f32.mrf.mxu3 }
 0x36a   :  { %v860_v20 = vpop.f32.mrf.mxu0  ;;  %v883_v55 = vpop.f32.mrf.mxu1  ;;  %v927_v34 = vadd.f32 %v926_v3, %v904_v28 }
 0x36b   :  { %v884_v8 = vadd.f32 %v883_v55, %v860_v20 }
 0x36d   :  { %v907_v43 = vadd.f32 %v906_v21, %v884_v8 }
 0x371   :  { %v929_v6 = vpop.f32.mrf.mxu3 }
 0x372   :  { %v949_v47 = vpop.f32.mrf.mxu0  ;;  %v930_v31 = vadd.f32 %v929_v6, %v907_v43 }
 0x373   :  { %v950_v38 = vadd.f32 %v949_v47, %v927_v34 }
 0x375   :  { %v955_v42 = vmax.f32 %v950_v38, 1e-12 }
 0x377   :  { %1780 = vrcp.f32 %v955_v42  ;;  %v968_v16 = vand.u32 2147483648, %v955_v42  ;;  %v966_v12 = vand.u32 2147483647, %v955_v42  ;;  %vm962_vm9 = vweird.f32 %v955_v42 }
 0x379   :  { %v969_v28 = vor.u32 1.1754944e-38, %v968_v16  ;;  %vm967_vm11 = vcmp.eq.f32.partialorder %v966_v12, 8.507059e+37  ;;  %v4341_v12 = vld [vmem:[#allocation66_spill] sm:$0xff] }
 0x37a   :  { %v952_v23 = vpop.f32.mrf.mxu0 }
 0x37b   :  { %v953_v51 = vadd.f32 %v952_v23, %v930_v31 }
 0x37d   :  { %v1781_v15 = vpop.eup %1780  ;;  %v956_v48 = vmax.f32 %v953_v51, 1e-12 }
 0x37e   :  { %v958_v33 = vmul.f32 %v1781_v15, %v955_v42  ;;  %vm963_vm8 = vweird.f32 %v1781_v15 }
 0x37f   :  { %1782 = vrcp.f32 %v956_v48  ;;  %vm964_vm10 = vmor %vm962_vm9, %vm963_vm8  ;;  %v983_v8 = vand.u32 2147483648, %v956_v48  ;;  %vm977_vm13 = vweird.f32 %v956_v48 }
 0x380   :  { %v959_v46 = vsub.f32 1.0, %v958_v33  ;;  %v981_v33 = vand.u32 2147483647, %v956_v48 }
 0x381   :  { %v984_v21 = vor.u32 1.1754944e-38, %v983_v8 }
 0x382   :  { %v960_v1 = vmul.f32 %v1781_v15, %v959_v46  ;;  %vm982_vm15 = vcmp.eq.f32.partialorder %v981_v33, 8.507059e+37 }
 0x384   :  { %v961_v3 = vadd.f32 %v1781_v15, %v960_v1 }
 0x385   :  { %v1783_v20 = vpop.eup %1782 }
 0x386   :  { %v973_v55 = vmul.f32 %v1783_v20, %v956_v48  ;;  %v965_v34 = vsel %vm964_vm10, %v1781_v15, %v961_v3  ;;  %vm978_vm12 = vweird.f32 %v1783_v20  ;;  %v4342_v3 = vld [vmem:[#allocation16_spill] sm:$0xff] }
 0x387   :  { %v970_v6 = vsel %vm967_vm11, %v969_v28, %v965_v34  ;;  %vm979_vm14 = vmor %vm977_vm13, %vm978_vm12  ;;  %v4345_v28 = vld [vmem:[#allocation17_spill] sm:$0xff]  ;;  %v4347_v34 = vld [vmem:[#allocation35_spill] sm:$0xff] }
 0x388   :  { %v974_v47 = vsub.f32 1.0, %v973_v55  ;;  %v3573_v23 = vmul.f32 %v970_v6, %v2405_v56  ;;  %v4346_v55 = vld [vmem:[#allocation70_spill] sm:$0xff]  ;;  %v4348_v6 = vld [vmem:[#allocation60_spill] sm:$0xff] }
 0x38a   :  { %v975_v38 = vmul.f32 %v1783_v20, %v974_v47  ;;  %1065 = vmatmul.f32.vlgmr.msra.gmra.mxu3 %v3573_v23  ;;  %v987_v51 = vrot.slane %v3573_v23, 6  ;;  %v991_v46 = vrot.slane %v3573_v23, 7  ;;  %v995_v48 = vrot.slane %v3573_v23, 1  ;;  %v4349_v47 = vld [vmem:[#allocation18_spill] sm:$0xff] }
 0x38b   :  { %1299 = vmatpush.msra.mxu3 %v3140_v30 }
 0x38c   :  { %v976_v42 = vadd.f32 %v1783_v20, %v975_v38 }
 0x38d   :  { %1300 = vmatpush.msra.mxu3 %v3143_v13 }
 0x38e   :  { %v980_v15 = vsel %vm979_vm14, %v1783_v20, %v976_v42  ;;  %v4343_v20 = vld [vmem:[#allocation34_spill] sm:$0xff]  ;;  %v4351_v42 = vld [vmem:[#allocation36_spill] sm:$0xff] }
 0x38f   :  { %v985_v43 = vsel %vm982_vm15, %v984_v21, %v980_v15  ;;  %1301 = vmatpush.msra.mxu3 %v3146_v37  ;;  %v4352_v21 = vld [vmem:[#allocation64_spill] sm:$0xff]  ;;  %v999_v15 = vrot.slane %v3573_v23, 2  ;;  %v4363_v23 = vld [vmem:[#allocation86_spill] sm:$0xff] }
 0x390   :  { %v3580_v31 = vmul.f32 %v985_v43, %v2407_v57  ;;  %v4355_v43 = vld [vmem:[#allocation37_spill] sm:$0xff] }
 0x391   :  { %1302 = vmatpush.msra.mxu3 %v3154_v9 }
 0x392   :  { %1068 = vmatmul.f32.gmra.mxu3 %v3580_v31  ;;  %v988_v30 = vrot.slane %v3580_v31, 6  ;;  %v992_v13 = vrot.slane %v3580_v31, 7  ;;  %v996_v16 = vrot.slane %v3580_v31, 1  ;;  %v1000_v33 = vrot.slane %v3580_v31, 2 }
 0x393   :  { %1303 = vmatpush.msra.mxu3 %v3162_v63  ;;  %v4344_v63 = vld [vmem:[#allocation56_spill] sm:$0xff] }
 0x394   :  { %v990_v37 = vsel %vm85_vm3, %v988_v30, %v987_v51  ;;  %v994_v1 = vsel %vm80_vm0, %v992_v13, %v991_v46  ;;  %v997_v9 = vsel %vm75_vm2, %v995_v48, %v996_v16  ;;  %v993_v8 = vsel %vm80_vm0, %v991_v46, %v992_v13  ;;  %v4359_v46 = vld [vmem:[#allocation82_spill] sm:$0xff]  ;;  %v4361_v13 = vld [vmem:[#allocation72_spill] sm:$0xff] }
 0x395   :  { %1019 = vmatmul.f32.vlgmr.msra.gmra.mxu1 %v990_v37  ;;  %1042 = vmatmul.f32.vlgmr.msra.gmra.mxu2 %v994_v1  ;;  %v998_v38 = vsel %vm75_vm2, %v996_v16, %v995_v48  ;;  %v1001_v31 = vsel %vm70_vm1, %v999_v15, %v1000_v33  ;;  %v4362_v48 = vld [vmem:[#allocation39_spill] sm:$0xff]  ;;  %v4364_v16 = vld [vmem:[#allocation22_spill] sm:$0xff]  ;;  %v4365_v37 = vld [vmem:[#allocation76_spill] sm:$0xff] }
 0x396   :  { %1088 = vmatmul.f32.vlgmr.msrb.gmra.mxu0 %v997_v9  ;;  %1205 = vmatpush.msra.mxu1 %v3171_v40  ;;  %v989_v40 = vsel %vm85_vm3, %v987_v51, %v988_v30  ;;  %v4356_v51 = vld [vmem:[#allocation20_spill] sm:$0xff]  ;;  %v4360_v30 = vld [vmem:[#allocation21_spill] sm:$0xff]  ;;  %v4367_v9 = vld [vmem:[#allocation90_spill] sm:$0xff] }
 0x397   :  { %1228 = vmatpush.msra.mxu2 %v4341_v12  ;;  %1304 = vmatpush.msra.mxu3 %v4342_v3  ;;  %v4366_v1 = vld [vmem:[#allocation40_spill] sm:$0xff]  ;;  %v4368_v12 = vld [vmem:[#allocation23_spill] sm:$0xff] }
 0x398   :  { %1206 = vmatpush.msra.mxu1 %v4343_v20  ;;  %1322 = vmatpush.msrb.mxu0 %v4344_v63  ;;  %v4369_v3 = vld [vmem:[#allocation80_spill] sm:$0xff]  ;;  %v4370_v20 = vld [vmem:[#allocation41_spill] sm:$0xff] }
 0x399   :  { %1229 = vmatpush.msra.mxu2 %v4345_v28  ;;  %1305 = vmatpush.msra.mxu3 %v4346_v55  ;;  %v4371_v63 = vld [vmem:[#allocation24_spill] sm:$0xff]  ;;  %v4373_v55 = vld [vmem:[#allocation42_spill] sm:$0xff] }
 0x39a   :  { %1207 = vmatpush.msra.mxu1 %v4347_v34  ;;  %1323 = vmatpush.msrb.mxu0 %v3195_v19  ;;  %v4350_v19 = vld [vmem:[#allocation74_spill] sm:$0xff]  ;;  %v4372_v28 = vld [vmem:[#allocation84_spill] sm:$0xff]  ;;  %v1002_v34 = vsel %vm70_vm1, %v1000_v33, %v999_v15  ;;  %v3657_v33 = vld [vmem:[#allocation5 + $0xa8] sm:$0xff] }
 0x39b   :  { %1230 = vmatpush.msra.mxu2 %v4348_v6  ;;  %1306 = vmatpush.msra.mxu3 %v4349_v47  ;;  %v4374_v6 = vld [vmem:[#allocation94_spill] sm:$0xff]  ;;  %v4384_v15 = vld [vmem:[#allocation47_spill] sm:$0xff] }
 0x39c   :  { %1208 = vmatpush.msra.mxu1 %v3208_v60  ;;  %1324 = vmatpush.msrb.mxu0 %v3211_v17  ;;  %v4353_v60 = vld [vmem:[#allocation19_spill] sm:$0xff]  ;;  %v4354_v17 = vld [vmem:[#allocation78_spill] sm:$0xff] }
 0x39d   :  { %1022 = vmatmul.f32.gmra.mxu1 %v989_v40  ;;  %1045 = vmatmul.f32.gmra.mxu2 %v993_v8  ;;  %v4375_v47 = vld [vmem:[#allocation26_spill] sm:$0xff]  ;;  %v4376_v40 = vld [vmem:[#allocation88_spill] sm:$0xff]  ;;  %v4377_v8 = vld [vmem:[#allocation43_spill] sm:$0xff] }
 0x39e   :  { %1091 = vmatmul.f32.gmra.mxu0 %v998_v38  ;;  %1209 = vmatpush.msra.mxu1 %v3216_v10  ;;  %v4357_v10 = vld [vmem:[#allocation68_spill] sm:$0xff]  ;;  %v4378_v38 = vld [vmem:[#allocation98_spill] sm:$0xff] }
 0x39f   :  { %1231 = vmatpush.msra.mxu2 %v3219_v18  ;;  %1307 = vmatpush.msra.mxu3 %v4350_v19  ;;  %v4358_v18 = vld [vmem:[#allocation38_spill] sm:$0xff]  ;;  %v4379_v19 = vld [vmem:[#allocation29_spill] sm:$0xff] }
 0x3a0   :  { %1210 = vmatpush.msra.mxu1 %v4351_v42  ;;  %1325 = vmatpush.msrb.mxu0 %v4352_v21  ;;  %v4380_v42 = vld [vmem:[#allocation44_spill] sm:$0xff]  ;;  %v4381_v21 = vld [vmem:[#allocation101_spill] sm:$0xff] }
 0x3a1   :  { %1232 = vmatpush.msra.mxu2 %v4353_v60  ;;  %1308 = vmatpush.msra.mxu3 %v4354_v17  ;;  %v4382_v60 = vld [vmem:[#allocation32_spill] sm:$0xff]  ;;  %v4383_v17 = vld [vmem:[#allocation45_spill] sm:$0xff] }
 0x3a2   :  { %1211 = vmatpush.msra.mxu1 %v4355_v43  ;;  %1326 = vmatpush.msrb.mxu0 %v4356_v51  ;;  %v3662_v43 = vld [vmem:[#allocation5 + $0xa0] sm:$0xff]  ;;  %v4385_v51 = vld [vmem:[#allocation46_spill] sm:$0xff] }
 0x3a3   :  { %1233 = vmatpush.msra.mxu2 %v4357_v10  ;;  %1309 = vmatpush.msra.mxu3 %v4358_v18  ;;  %v4386_v10 = vld [vmem:[#allocation49_spill] sm:$0xff]  ;;  %v4387_v18 = vld [vmem:[#allocation106_spill] sm:$0xff] }
 0x3a4   :  { %1212 = vmatpush.msra.mxu1 %v4359_v46  ;;  %1327 = vmatpush.msrb.mxu0 %v4360_v30  ;;  %v4388_v46 = vld [vmem:[#allocation51_spill] sm:$0xff]  ;;  %v4389_v30 = vld [vmem:[#allocation53_spill] sm:$0xff] }
 0x3a5   :  { %1111 = vmatmul.f32.vlgmr.msrb.gmra.mxu1 %v1001_v31  ;;  %1234 = vmatpush.msra.mxu2 %v4361_v13  ;;  %v3668_v31 = vld [vmem:[#allocation5 + $0x98] sm:$0xff]  ;;  %v3673_v13 = vld [vmem:[#allocation5 + $0x90] sm:$0xff] }
 0x3a6   :  { %1213 = vmatpush.msra.mxu1 %v4362_v48  ;;  %1310 = vmatpush.msra.mxu3 %v4363_v23  ;;  %v4390_v48 = vld [vmem:[#allocation55_spill] sm:$0xff]  ;;  %v3677_v23 = vld [vmem:[#allocation5 + $0x88] sm:$0xff] }
 0x3a7   :  { %1235 = vmatpush.msra.mxu2 %v4364_v16  ;;  %1328 = vmatpush.msrb.mxu0 %v4365_v37  ;;  %v4391_v16 = vld [vmem:[#allocation57_spill] sm:$0xff]  ;;  %v3681_v37 = vld [vmem:[#allocation5 + $0x80] sm:$0xff] }
 0x3a8   :  { %1214 = vmatpush.msra.mxu1 %v4366_v1  ;;  %1311 = vmatpush.msra.mxu3 %v4367_v9  ;;  %v4392_v1 = vld [vmem:[#allocation61_spill] sm:$0xff] }
 0x3a9   :  { %1236 = vmatpush.msra.mxu2 %v4368_v12  ;;  %1329 = vmatpush.msrb.mxu0 %v4369_v3  ;;  %v4393_v9 = vld [vmem:[#allocation65_spill] sm:$0xff] }
 0x3aa   :  { %1215 = vmatpush.msra.mxu1 %v4370_v20  ;;  %1312 = vmatpush.msra.mxu3 %v4371_v63  ;;  %v4394_v12 = vld [vmem:[#allocation69_spill] sm:$0xff] }
 0x3ab   :  { %1237 = vmatpush.msra.mxu2 %v4372_v28  ;;  %1330 = vmatpush.msrb.mxu0 %v4373_v55  ;;  %v4395_v3 = vld [vmem:[#allocation73_spill] sm:$0xff] }
 0x3ac   :  { %1216 = vmatpush.msra.mxu1 %v4374_v6  ;;  %1313 = vmatpush.msra.mxu3 %v4375_v47  ;;  %v4396_v20 = vld [vmem:[#allocation77_spill] sm:$0xff]  ;;  %v4402_v47 = vld [vmem:[#allocation59_spill] sm:$0xff] }
 0x3ad   :  { %1114 = vmatmul.f32.gmra.mxu1 %v1002_v34  ;;  %1238 = vmatpush.msra.mxu2 %v4376_v40  ;;  %v4397_v63 = vld [vmem:[#allocation81_spill] sm:$0xff]  ;;  %v4403_v40 = vld [vmem:[#allocation92_spill] sm:$0xff] }
 0x3ae   :  { %1217 = vmatpush.msra.mxu1 %v4377_v8  ;;  %1314 = vmatpush.msra.mxu3 %v4378_v38  ;;  %v4398_v28 = vld [vmem:[#allocation85_spill] sm:$0xff] }
 0x3af   :  { %1239 = vmatpush.msra.mxu2 %v4379_v19  ;;  %1331 = vmatpush.msrb.mxu0 %v4380_v42  ;;  %v4399_v55 = vld [vmem:[#allocation89_spill] sm:$0xff] }
 0x3b0   :  { %1218 = vmatpush.msra.mxu1 %v4381_v21  ;;  %v4400_v34 = vld [vmem:[#allocation93_spill] sm:$0xff] }
 0x3b1   :  { %1240 = vmatpush.msra.mxu2 %v4382_v60  ;;  %1332 = vmatpush.msrb.mxu0 %v3657_v33  ;;  %v4401_v6 = vld [vmem:[#allocation97_spill] sm:$0xff] }
 0x3b2   :  { %1219 = vmatpush.msra.mxu1 %v4383_v17 }
 0x3b3   :  { %1241 = vmatpush.msra.mxu2 %v4384_v15  ;;  %1333 = vmatpush.msrb.mxu0 %v3662_v43 }
 0x3b4   :  { %1220 = vmatpush.msra.mxu1 %v4385_v51 }
 0x3b5   :  { %1242 = vmatpush.msra.mxu2 %v4386_v10  ;;  %1334 = vmatpush.msrb.mxu0 %v3668_v31 }
 0x3b6   :  { %1345 = vmatpush.msrb.mxu1 %v4387_v18 }
 0x3b7   :  { %1243 = vmatpush.msra.mxu2 %v4388_v46  ;;  %1335 = vmatpush.msrb.mxu0 %v3673_v13 }
 0x3b8   :  { %1346 = vmatpush.msrb.mxu1 %v4389_v30 }
 0x3b9   :  { %1336 = vmatpush.msrb.mxu0 %v3677_v23 }
 0x3ba   :  { %1347 = vmatpush.msrb.mxu1 %v4390_v48 }
 0x3bb   :  { %1337 = vmatpush.msrb.mxu0 %v3681_v37 }
 0x3bc   :  { %1348 = vmatpush.msrb.mxu1 %v4391_v16 }
 0x3be   :  { %1349 = vmatpush.msrb.mxu1 %v4392_v1 }
 0x3c0   :  { %1350 = vmatpush.msrb.mxu1 %v4393_v9  ;;  %v1952_v9 = vld [vmem:[#allocation2 + $0x78] sm:$0xff] }
 0x3c2   :  { %1351 = vmatpush.msrb.mxu1 %v4394_v12 }
 0x3c4   :  { %1352 = vmatpush.msrb.mxu1 %v4395_v3 }
 0x3c6   :  { %1353 = vmatpush.msrb.mxu1 %v4396_v20  ;;  %v1953_v20 = vld [vmem:[#allocation2 + $0x70] sm:$0xff] }
 0x3c8   :  { %1354 = vmatpush.msrb.mxu1 %v4397_v63 }
 0x3ca   :  { %1355 = vmatpush.msrb.mxu1 %v4398_v28  ;;  %v1954_v28 = vld [vmem:[#allocation2 + $0x68] sm:$0xff] }
 0x3cc   :  { %1356 = vmatpush.msrb.mxu1 %v4399_v55 }
 0x3ce   :  { %1357 = vmatpush.msrb.mxu1 %v4400_v34 }
 0x3d0   :  { %1358 = vmatpush.msrb.mxu1 %v4401_v6  ;;  %v1955_v6 = vld [vmem:[#allocation2 + $0x60] sm:$0xff] }
 0x3d2   :  { %1359 = vmatpush.msrb.mxu1 %v4402_v47 }
 0x3d4   :  { %1360 = vmatpush.msrb.mxu1 %v4403_v40 }
 0x40d   :  { %v1066_v42 = vpop.f32.mrf.mxu3 }
 0x412   :  { %v1020_v8 = vpop.f32.mrf.mxu1 }
 0x413   :  { %v1089_v17 = vpop.f32.mrf.mxu0 }
 0x415   :  { %v1069_v30 = vpop.f32.mrf.mxu3 }
 0x418   :  { %v1043_v38 = vpop.f32.mrf.mxu2 }
 0x419   :  { %v1044_v19 = vadd.f32 %v1043_v38, %v1020_v8 }
 0x41a   :  { %v1023_v21 = vpop.f32.mrf.mxu1 }
 0x41b   :  { %v1067_v60 = vadd.f32 %v1066_v42, %v1044_v19  ;;  %v1092_v1 = vpop.f32.mrf.mxu0  ;;  %v1956_v19 = vld [vmem:[#allocation2 + $0x58] sm:$0xff] }
 0x41d   :  { %v1090_v10 = vadd.f32 %v1089_v17, %v1067_v60  ;;  %v1957_v60 = vld [vmem:[#allocation2 + $0x50] sm:$0xff]  ;;  %v1958_v17 = vld [vmem:[#allocation2 + $0xf8] sm:$0xff] }
 0x420   :  { %v1046_v15 = vpop.f32.mrf.mxu2 }
 0x421   :  { %v1047_v51 = vadd.f32 %v1046_v15, %v1023_v21  ;;  %v1959_v15 = vld [vmem:[#allocation2 + $0x48] sm:$0xff] }
 0x422   :  { %v1112_v18 = vpop.f32.mrf.mxu1 }
 0x423   :  { %v1113_v46 = vadd.f32 %v1112_v18, %v1090_v10  ;;  %v1070_v48 = vadd.f32 %v1069_v30, %v1047_v51  ;;  %v1960_v51 = vld [vmem:[#allocation2 + $0xf0] sm:$0xff]  ;;  %v1961_v10 = vld [vmem:[#allocation2 + $0x40] sm:$0xff]  ;;  %v1966_v30 = vld [vmem:[#allocation2 + $0xd8] sm:$0xff] }
 0x424   :  { %v1964_v18 = vld [vmem:[#allocation2 + $0xe0] sm:$0xff] }
 0x425   :  { %v3697_v16 = vmul.f32 %v1113_v46, %v3397_v5  ;;  %v1093_v12 = vadd.f32 %v1092_v1, %v1070_v48  ;;  %v1973_v48 = vld [vmem:[#allocation2 + $0x10] sm:$0xff]  ;;  %v4406_v1 = vld [vmem:[#allocation67_spill] sm:$0xff] }
 0x427   :  { %1198 = vmatmul.f32.vlgmr.msra.gmra.mxu0 %v3697_v16  ;;  %v1120_v34 = vrot.slane %v3697_v16, 2  ;;  %v1124_v5 = vrot.slane %v3697_v16, 1  ;;  %v1128_v8 = vrot.slane %v3697_v16, 7  ;;  %v1132_v46 = vrot.slane %v3697_v16, 6 }
 0x428   :  { %1432 = vmatpush.msra.mxu0 %v1952_v9  ;;  %v1979_v9 = vld [vmem:[#allocation2 + $0xa0] sm:$0xff] }
 0x42a   :  { %v1115_v3 = vpop.f32.mrf.mxu1  ;;  %1433 = vmatpush.msra.mxu0 %v1953_v20  ;;  %v1983_v20 = vld [vmem:[#allocation2 + $0x90] sm:$0xff] }
 0x42b   :  { %v1116_v63 = vadd.f32 %v1115_v3, %v1093_v12  ;;  %v1980_v12 = vld [vmem:[#allocation2 + $0x178] sm:$0xff] }
 0x42c   :  { %1434 = vmatpush.msra.mxu0 %v1954_v28  ;;  %v4409_v3 = vld [vmem:[#allocation75_spill] sm:$0xff]  ;;  %v1985_v28 = vld [vmem:[#allocation2 + $0x88] sm:$0xff] }
 0x42d   :  { %v3701_v55 = vmul.f32 %v1116_v63, %v3404_v53  ;;  %v1984_v63 = vld [vmem:[#allocation2 + $0x168] sm:$0xff] }
 0x42e   :  { %1435 = vmatpush.msra.mxu0 %v1955_v6  ;;  %v1988_v6 = vld [vmem:[#allocation2 + $0x158] sm:$0xff] }
 0x42f   :  { %1201 = vmatmul.f32.gmra.mxu0 %v3701_v55  ;;  %v1121_v47 = vrot.slane %v3701_v55, 2  ;;  %v1125_v40 = vrot.slane %v3701_v55, 1  ;;  %v1129_v38 = vrot.slane %v3701_v55, 7 }
 0x430   :  { %1436 = vmatpush.msra.mxu0 %v1956_v19  ;;  %v1993_v19 = vld [vmem:[#allocation2 + $0x130] sm:$0xff] }
 0x431   :  { %v1122_v53 = vsel %vm70_vm1, %v1120_v34, %v1121_v47  ;;  %v1126_v42 = vsel %vm75_vm2, %v1124_v5, %v1125_v40  ;;  %v1131_v21 = vsel %vm80_vm0, %v1129_v38, %v1128_v8 }
 0x432   :  { %1152 = vmatmul.f32.vlgmr.msrb.gmra.mxu2 %v1122_v53  ;;  %1175 = vmatmul.f32.vlgmr.msrb.gmra.mxu3 %v1126_v42  ;;  %v1994_v53 = vld [vmem:[#allocation2 + $0x128] sm:$0xff]  ;;  %v1995_v42 = vld [vmem:[#allocation2 + $0x120] sm:$0xff] }
 0x433   :  { %1221 = vmatmul.f32.vlgmr.msra.gmra.mxu1 %v1131_v21  ;;  %1368 = vmatpush.msrb.mxu2 %v3421_v36  ;;  %v1123_v36 = vsel %vm70_vm1, %v1121_v47, %v1120_v34  ;;  %v1986_v34 = vld [vmem:[#allocation2 + $0x160] sm:$0xff]  ;;  %v1989_v47 = vld [vmem:[#allocation2 + $0x150] sm:$0xff]  ;;  %v1996_v21 = vld [vmem:[#allocation2 + $0x118] sm:$0xff] }
 0x434   :  { %1391 = vmatpush.msrb.mxu3 %v3424_v29  ;;  %1437 = vmatpush.msra.mxu0 %v1957_v60  ;;  %v1127_v29 = vsel %vm75_vm2, %v1125_v40, %v1124_v5  ;;  %v1987_v5 = vld [vmem:[#allocation2 + $0x80] sm:$0xff]  ;;  %v1990_v40 = vld [vmem:[#allocation2 + $0x148] sm:$0xff]  ;;  %v1997_v60 = vld [vmem:[#allocation2 + $0x110] sm:$0xff] }
 0x435   :  { %1369 = vmatpush.msrb.mxu2 %v3428_v26  ;;  %1455 = vmatpush.msra.mxu1 %v1958_v17  ;;  %v1962_v26 = vld [vmem:[#allocation2 + $0xe8] sm:$0xff] }
 0x436   :  { %1392 = vmatpush.msrb.mxu3 %v3432_v49  ;;  %1438 = vmatpush.msra.mxu0 %v1959_v15  ;;  %v1130_v49 = vsel %vm80_vm0, %v1128_v8, %v1129_v38  ;;  %v1991_v8 = vld [vmem:[#allocation2 + $0x140] sm:$0xff]  ;;  %v1992_v38 = vld [vmem:[#allocation2 + $0x138] sm:$0xff]  ;;  %v1998_v17 = vld [vmem:[#allocation2 + $0x108] sm:$0xff] }
 0x437   :  { %1370 = vmatpush.msrb.mxu2 %v3436_v7  ;;  %1456 = vmatpush.msra.mxu1 %v1960_v51  ;;  %v1963_v7 = vld [vmem:[#allocation2 + $0x38] sm:$0xff]  ;;  %v1999_v15 = vld [vmem:[#allocation2 + $0x100] sm:$0xff] }
 0x438   :  { %1393 = vmatpush.msrb.mxu3 %v3440_v24  ;;  %1439 = vmatpush.msra.mxu0 %v1961_v10  ;;  %v1133_v24 = vrot.slane %v3701_v55, 6 }
 0x439   :  { %1371 = vmatpush.msrb.mxu2 %v3448_v2  ;;  %1457 = vmatpush.msra.mxu1 %v1962_v26  ;;  %v1965_v2 = vld [vmem:[#allocation2 + $0x30] sm:$0xff] }
 0x43a   :  { %1155 = vmatmul.f32.gmra.mxu2 %v1123_v36  ;;  %1178 = vmatmul.f32.gmra.mxu3 %v1127_v29 }
 0x43b   :  { %1224 = vmatmul.f32.gmra.mxu1 %v1130_v49  ;;  %1372 = vmatpush.msrb.mxu2 %v3454_v39  ;;  %v1967_v39 = vld [vmem:[#allocation2 + $0x28] sm:$0xff] }
 0x43c   :  { %1394 = vmatpush.msrb.mxu3 %v3457_v41  ;;  %1440 = vmatpush.msra.mxu0 %v1963_v7  ;;  %v1135_v41 = vsel %vm85_vm3, %v1133_v24, %v1132_v46 }
 0x43d   :  { %1373 = vmatpush.msrb.mxu2 %v3462_v14  ;;  %1458 = vmatpush.msra.mxu1 %v1964_v18  ;;  %v1968_v14 = vld [vmem:[#allocation2 + $0xd0] sm:$0xff] }
 0x43e   :  { %1395 = vmatpush.msrb.mxu3 %v3466_v52  ;;  %1441 = vmatpush.msra.mxu0 %v1965_v2  ;;  %v1969_v52 = vld [vmem:[#allocation2 + $0x20] sm:$0xff] }
 0x43f   :  { %1374 = vmatpush.msrb.mxu2 %v3471_v35  ;;  %1459 = vmatpush.msra.mxu1 %v1966_v30  ;;  %v1970_v35 = vld [vmem:[#allocation2 + $0xc8] sm:$0xff] }
 0x440   :  { %1396 = vmatpush.msrb.mxu3 %v3475_v59  ;;  %1442 = vmatpush.msra.mxu0 %v1967_v39  ;;  %v1971_v59 = vld [vmem:[#allocation2 + $0x18] sm:$0xff] }
 0x441   :  { %1375 = vmatpush.msrb.mxu2 %v3481_v44  ;;  %1460 = vmatpush.msra.mxu1 %v1968_v14  ;;  %v1972_v44 = vld [vmem:[#allocation2 + $0xc0] sm:$0xff] }
 0x442   :  { %1244 = vmatmul.f32.vlgmr.msra.gmra.mxu2 %v1135_v41  ;;  %1397 = vmatpush.msrb.mxu3 %v3485_v61  ;;  %v1974_v61 = vld [vmem:[#allocation2 + $0xb8] sm:$0xff] }
 0x443   :  { %1376 = vmatpush.msrb.mxu2 %v3488_v0  ;;  %1443 = vmatpush.msra.mxu0 %v1969_v52  ;;  %v1134_v0 = vsel %vm85_vm3, %v1132_v46, %v1133_v24 }
 0x444   :  { %1398 = vmatpush.msrb.mxu3 %v3492_v4  ;;  %1461 = vmatpush.msra.mxu1 %v1970_v35  ;;  %v1975_v4 = vld [vmem:[#allocation2 + $0x8] sm:$0xff] }
 0x445   :  { %1377 = vmatpush.msrb.mxu2 %v3496_v45  ;;  %1444 = vmatpush.msra.mxu0 %v1971_v59  ;;  %v1976_v45 = vld [vmem:[#allocation2] sm:$0xff] }
 0x446   :  { %1399 = vmatpush.msrb.mxu3 %v3500_v32  ;;  %1462 = vmatpush.msra.mxu1 %v1972_v44  ;;  %v1977_v32 = vld [vmem:[#allocation2 + $0xb0] sm:$0xff] }
 0x447   :  { %1378 = vmatpush.msrb.mxu2 %v3504_v54  ;;  %1445 = vmatpush.msra.mxu0 %v1973_v48  ;;  %v4404_v54 = vld [vmem:[#allocation63_spill] sm:$0xff] }
 0x448   :  { %1400 = vmatpush.msrb.mxu3 %v3508_v22  ;;  %1463 = vmatpush.msra.mxu1 %v1974_v61  ;;  %v1978_v22 = vld [vmem:[#allocation2 + $0xa8] sm:$0xff] }
 0x449   :  { %1379 = vmatpush.msrb.mxu2 %v3514_v25  ;;  %1446 = vmatpush.msra.mxu0 %v1975_v4  ;;  %v4405_v25 = vld [vmem:[#allocation96_spill] sm:$0xff] }
 0x44a   :  { %1247 = vmatmul.f32.gmra.mxu2 %v1134_v0  ;;  %1401 = vmatpush.msrb.mxu3 %v3518_v11  ;;  %v4407_v11 = vld [vmem:[#allocation100_spill] sm:$0xff] }
 0x44b   :  { %1380 = vmatpush.msrb.mxu2 %v3521_v50  ;;  %1447 = vmatpush.msra.mxu0 %v1976_v45  ;;  %v4408_v50 = vld [vmem:[#allocation71_spill] sm:$0xff] }
 0x44c   :  { %1402 = vmatpush.msrb.mxu3 %v3525_v58  ;;  %1464 = vmatpush.msra.mxu1 %v1977_v32  ;;  %v1981_v58 = vld [vmem:[#allocation2 + $0x98] sm:$0xff] }
 0x44d   :  { %1381 = vmatpush.msrb.mxu2 %v3529_v27  ;;  %v1982_v27 = vld [vmem:[#allocation2 + $0x170] sm:$0xff] }
 0x44e   :  { %1403 = vmatpush.msrb.mxu3 %v4404_v54  ;;  %1465 = vmatpush.msra.mxu1 %v1978_v22 }
 0x44f   :  { %1382 = vmatpush.msrb.mxu2 %v4405_v25 }
 0x450   :  { %1404 = vmatpush.msrb.mxu3 %v4406_v1  ;;  %1466 = vmatpush.msra.mxu1 %v1979_v9 }
 0x451   :  { %1383 = vmatpush.msrb.mxu2 %v4407_v11 }
 0x452   :  { %1405 = vmatpush.msrb.mxu3 %v4408_v50  ;;  %1467 = vmatpush.msra.mxu1 %v1981_v58 }
 0x453   :  { %1478 = vmatpush.msra.mxu2 %v1980_v12 }
 0x454   :  { %1406 = vmatpush.msrb.mxu3 %v4409_v3  ;;  %1468 = vmatpush.msra.mxu1 %v1983_v20 }
 0x455   :  { %1479 = vmatpush.msra.mxu2 %v1982_v27 }
 0x456   :  { %1469 = vmatpush.msra.mxu1 %v1985_v28 }
 0x457   :  { %1480 = vmatpush.msra.mxu2 %v1984_v63  ;;  %v2000_v63 = vld [vmem:[#allocation5 + $0x78] sm:$0xff] }
 0x458   :  { %1470 = vmatpush.msra.mxu1 %v1987_v5  ;;  %v2001_v5 = vld [vmem:[#allocation5 + $0x70] sm:$0xff] }
 0x459   :  { %1481 = vmatpush.msra.mxu2 %v1986_v34 }
 0x45b   :  { %1482 = vmatpush.msra.mxu2 %v1988_v6 }
 0x45d   :  { %1483 = vmatpush.msra.mxu2 %v1989_v47 }
 0x45f   :  { %1484 = vmatpush.msra.mxu2 %v1990_v40  ;;  %v2002_v40 = vld [vmem:[#allocation5 + $0x68] sm:$0xff] }
 0x461   :  { %1485 = vmatpush.msra.mxu2 %v1991_v8 }
 0x463   :  { %1486 = vmatpush.msra.mxu2 %v1992_v38 }
 0x465   :  { %1487 = vmatpush.msra.mxu2 %v1993_v19 }
 0x467   :  { %1488 = vmatpush.msra.mxu2 %v1994_v53  ;;  %v2003_v53 = vld [vmem:[#allocation5 + $0x60] sm:$0xff] }
 0x469   :  { %1489 = vmatpush.msra.mxu2 %v1995_v42 }
 0x46b   :  { %1490 = vmatpush.msra.mxu2 %v1996_v21 }
 0x46d   :  { %1491 = vmatpush.msra.mxu2 %v1997_v60 }
 0x46f   :  { %1492 = vmatpush.msra.mxu2 %v1998_v17 }
 0x471   :  { %1493 = vmatpush.msra.mxu2 %v1999_v15  ;;  %v2004_v15 = vld [vmem:[#allocation5 + $0x58] sm:$0xff] }
 0x4a4   :  { %v1199_v29 = vpop.f32.mrf.mxu0 }
 0x4ac   :  { %v1202_v39 = vpop.f32.mrf.mxu0 }
 0x4b0   :  { %v1222_v7 = vpop.f32.mrf.mxu1 }
 0x4b5   :  { %v1153_v51 = vpop.f32.mrf.mxu2  ;;  %v1176_v10 = vpop.f32.mrf.mxu3 }
 0x4b6   :  { %v1177_v36 = vadd.f32 %v1176_v10, %v1153_v51 }
 0x4b8   :  { %v1200_v49 = vadd.f32 %v1199_v29, %v1177_v36  ;;  %v1225_v52 = vpop.f32.mrf.mxu1  ;;  %v2005_v29 = vld [vmem:[#allocation2 + $0x1f8] sm:$0xff] }
 0x4ba   :  { %v1223_v2 = vadd.f32 %v1222_v7, %v1200_v49  ;;  %v2007_v49 = vld [vmem:[#allocation5 + $0xf8] sm:$0xff]  ;;  %v2008_v7 = vld [vmem:[#allocation2 + $0x1f0] sm:$0xff] }
 0x4bd   :  { %v1156_v26 = vpop.f32.mrf.mxu2  ;;  %v1179_v24 = vpop.f32.mrf.mxu3 }
 0x4be   :  { %v1180_v18 = vadd.f32 %v1179_v24, %v1156_v26  ;;  %v2006_v26 = vld [vmem:[#allocation2 + $0x278] sm:$0xff]  ;;  %v2009_v24 = vld [vmem:[#allocation5 + $0x50] sm:$0xff] }
 0x4c0   :  { %v1203_v41 = vadd.f32 %v1202_v39, %v1180_v18  ;;  %v2010_v18 = vld [vmem:[#allocation2 + $0x270] sm:$0xff]  ;;  %v2014_v39 = vld [vmem:[#allocation2 + $0x268] sm:$0xff] }
 0x4c2   :  { %v1226_v35 = vadd.f32 %v1225_v52, %v1203_v41  ;;  %v2015_v41 = vld [vmem:[#allocation5 + $0xe8] sm:$0xff] }
 0x4c5   :  { %v1245_v46 = vpop.f32.mrf.mxu2 }
 0x4c6   :  { %v1246_v30 = vadd.f32 %v1245_v46, %v1223_v2  ;;  %v2011_v2 = vld [vmem:[#allocation5 + $0xf0] sm:$0xff]  ;;  %v2012_v46 = vld [vmem:[#allocation2 + $0x1e8] sm:$0xff] }
 0x4c8   :  { %v1251_v14 = vmax.f32 %v1246_v30, 1e-12  ;;  %v2013_v30 = vld [vmem:[#allocation5 + $0x48] sm:$0xff] }
 0x4ca   :  { %1784 = vrcp.f32 %v1251_v14  ;;  %v1264_v45 = vand.u32 2147483648, %v1251_v14  ;;  %v1262_v54 = vand.u32 2147483647, %v1251_v14  ;;  %vm1258_vm5 = vweird.f32 %v1251_v14 }
 0x4cc   :  { %v1265_v1 = vor.u32 1.1754944e-38, %v1264_v45  ;;  %vm1263_vm7 = vcmp.eq.f32.partialorder %v1262_v54, 8.507059e+37  ;;  %v2021_v45 = vld [vmem:[#allocation2 + $0x1d0] sm:$0xff]  ;;  %v2023_v54 = vld [vmem:[#allocation2 + $0x258] sm:$0xff] }
 0x4cd   :  { %v1248_v59 = vpop.f32.mrf.mxu2 }
 0x4ce   :  { %v1249_v44 = vadd.f32 %v1248_v59, %v1226_v35  ;;  %v2016_v35 = vld [vmem:[#allocation2 + $0x1e0] sm:$0xff] }
 0x4cf   :  { %v2017_v59 = vld [vmem:[#allocation5 + $0x40] sm:$0xff] }
 0x4d0   :  { %v1785_v48 = vpop.eup %1784  ;;  %v1252_v61 = vmax.f32 %v1249_v44, 1e-12 }
 0x4d1   :  { %v1254_v0 = vmul.f32 %v1785_v48, %v1251_v14  ;;  %vm1259_vm4 = vweird.f32 %v1785_v48 }
 0x4d2   :  { %1786 = vrcp.f32 %v1252_v61  ;;  %vm1260_vm6 = vmor %vm1258_vm5, %vm1259_vm4  ;;  %v1279_v3 = vand.u32 2147483648, %v1252_v61  ;;  %v1277_v20 = vand.u32 2147483647, %v1252_v61  ;;  %vm1273_vm9 = vweird.f32 %v1252_v61 }
 0x4d3   :  { %v1255_v4 = vsub.f32 1.0, %v1254_v0  ;;  %v2020_v0 = vld [vmem:[#allocation5 + $0xe0] sm:$0xff] }
 0x4d4   :  { %v1280_v34 = vor.u32 1.1754944e-38, %v1279_v3  ;;  %vm1278_vm11 = vcmp.eq.f32.partialorder %v1277_v20, 8.507059e+37  ;;  %v2029_v3 = vld [vmem:[#allocation2 + $0x1c0] sm:$0xff]  ;;  %v2031_v20 = vld [vmem:[#allocation2 + $0x248] sm:$0xff] }
 0x4d5   :  { %v1256_v32 = vmul.f32 %v1785_v48, %v1255_v4 }
 0x4d7   :  { %v1257_v22 = vadd.f32 %v1785_v48, %v1256_v32  ;;  %v2022_v32 = vld [vmem:[#allocation5 + $0x38] sm:$0xff] }
 0x4d8   :  { %v1787_v25 = vpop.eup %1786 }
 0x4d9   :  { %v1269_v9 = vmul.f32 %v1787_v25, %v1252_v61  ;;  %v1261_v11 = vsel %vm1260_vm6, %v1785_v48, %v1257_v22  ;;  %vm1274_vm8 = vweird.f32 %v1787_v25  ;;  %v2018_v48 = vld [vmem:[#allocation2 + $0x1d8] sm:$0xff]  ;;  %v2019_v61 = vld [vmem:[#allocation2 + $0x260] sm:$0xff] }
 0x4da   :  { %v1266_v50 = vsel %vm1263_vm7, %v1265_v1, %v1261_v11  ;;  %vm1275_vm10 = vmor %vm1273_vm9, %vm1274_vm8  ;;  %v2024_v22 = vld [vmem:[#allocation5 + $0xd8] sm:$0xff]  ;;  %v2025_v1 = vld [vmem:[#allocation2 + $0x1c8] sm:$0xff] }
 0x4db   :  { %v1270_v12 = vsub.f32 1.0, %v1269_v9  ;;  %v3761_v58 = vmul.f32 %v1266_v50, %v2405_v56  ;;  %v2026_v9 = vld [vmem:[#allocation5 + $0x30] sm:$0xff] }
 0x4dc   :  { %v2027_v11 = vld [vmem:[#allocation2 + $0x250] sm:$0xff] }
 0x4dd   :  { %v1271_v27 = vmul.f32 %v1787_v25, %v1270_v12  ;;  %1361 = vmatmul.f32.vlgmr.msrb.gmra.mxu1 %v3761_v58  ;;  %v1283_v38 = vrot.slane %v3761_v58, 6  ;;  %v1287_v19 = vrot.slane %v3761_v58, 7  ;;  %v1291_v60 = vrot.slane %v3761_v58, 1  ;;  %v2028_v50 = vld [vmem:[#allocation5 + $0xd0] sm:$0xff] }
 0x4de   :  { %1595 = vmatpush.msrb.mxu1 %v2000_v63  ;;  %v2032_v63 = vld [vmem:[#allocation2 + $0x1b8] sm:$0xff] }
 0x4df   :  { %v1272_v28 = vadd.f32 %v1787_v25, %v1271_v27  ;;  %v2030_v27 = vld [vmem:[#allocation5 + $0x28] sm:$0xff] }
 0x4e0   :  { %1596 = vmatpush.msrb.mxu1 %v2001_v5  ;;  %v2036_v5 = vld [vmem:[#allocation2 + $0x1b0] sm:$0xff] }
 0x4e1   :  { %v1276_v6 = vsel %vm1275_vm10, %v1787_v25, %v1272_v28  ;;  %v1295_v25 = vrot.slane %v3761_v58, 2  ;;  %v2033_v58 = vld [vmem:[#allocation5 + $0xc8] sm:$0xff]  ;;  %v2034_v28 = vld [vmem:[#allocation2 + $0x240] sm:$0xff] }
 0x4e2   :  { %v1281_v47 = vsel %vm1278_vm11, %v1280_v34, %v1276_v6  ;;  %1597 = vmatpush.msrb.mxu1 %v2002_v40  ;;  %v2035_v34 = vld [vmem:[#allocation5 + $0x20] sm:$0xff]  ;;  %v2039_v40 = vld [vmem:[#allocation5 + $0x18] sm:$0xff] }
 0x4e3   :  { %v3765_v8 = vmul.f32 %v1281_v47, %v2407_v57  ;;  %v2037_v6 = vld [vmem:[#allocation5 + $0xc0] sm:$0xff]  ;;  %v2038_v47 = vld [vmem:[#allocation2 + $0x238] sm:$0xff] }
 0x4e4   :  { %1598 = vmatpush.msrb.mxu1 %v2003_v53  ;;  %v2043_v53 = vld [vmem:[#allocation5 + $0x10] sm:$0xff] }
 0x4e5   :  { %1364 = vmatmul.f32.gmra.mxu1 %v3765_v8  ;;  %v1284_v42 = vrot.slane %v3765_v8, 6  ;;  %v1288_v21 = vrot.slane %v3765_v8, 7  ;;  %v1292_v17 = vrot.slane %v3765_v8, 1  ;;  %v1296_v4 = vrot.slane %v3765_v8, 2  ;;  %v2040_v8 = vld [vmem:[#allocation2 + $0x1a8] sm:$0xff] }
 0x4e6   :  { %1599 = vmatpush.msrb.mxu1 %v2004_v15  ;;  %v2047_v15 = vld [vmem:[#allocation2 + $0x198] sm:$0xff] }
 0x4e7   :  { %v1286_v51 = vsel %vm85_vm3, %v1284_v42, %v1283_v38  ;;  %v1290_v10 = vsel %vm80_vm0, %v1288_v21, %v1287_v19  ;;  %v1293_v36 = vsel %vm75_vm2, %v1291_v60, %v1292_v17  ;;  %v1285_v14 = vsel %vm85_vm3, %v1283_v38, %v1284_v42  ;;  %v2041_v38 = vld [vmem:[#allocation5 + $0xb8] sm:$0xff] }
 0x4e8   :  { %1315 = vmatmul.f32.vlgmr.msra.gmra.mxu3 %v1286_v51  ;;  %1338 = vmatmul.f32.vlgmr.msrb.gmra.mxu0 %v1290_v10  ;;  %v1289_v52 = vsel %vm80_vm0, %v1287_v19, %v1288_v21  ;;  %v1294_v44 = vsel %vm75_vm2, %v1292_v17, %v1291_v60  ;;  %v1297_v12 = vsel %vm70_vm1, %v1295_v25, %v1296_v4  ;;  %v2042_v19 = vld [vmem:[#allocation2 + $0x230] sm:$0xff]  ;;  %v2044_v21 = vld [vmem:[#allocation2 + $0x1a0] sm:$0xff]  ;;  %v2046_v17 = vld [vmem:[#allocation2 + $0x228] sm:$0xff] }
 0x4e9   :  { %1384 = vmatmul.f32.vlgmr.msrb.gmra.mxu2 %v1293_v36  ;;  %1501 = vmatpush.msra.mxu3 %v2005_v29  ;;  %v1298_v42 = vsel %vm70_vm1, %v1296_v4, %v1295_v25  ;;  %v2045_v60 = vld [vmem:[#allocation5 + $0xb0] sm:$0xff]  ;;  %v2048_v51 = vld [vmem:[#allocation2 + $0x220] sm:$0xff]  ;;  %v2049_v10 = vld [vmem:[#allocation5 + $0x8] sm:$0xff] }
 0x4ea   :  { %1524 = vmatpush.msrb.mxu0 %v2006_v26  ;;  %1618 = vmatpush.msrb.mxu2 %v2007_v49  ;;  %v2050_v36 = vld [vmem:[#allocation2 + $0x190] sm:$0xff]  ;;  %v2051_v29 = vld [vmem:[#allocation2 + $0x218] sm:$0xff]  ;;  %v2052_v26 = vld [vmem:[#allocation5] sm:$0xff] }
 0x4eb   :  { %1502 = vmatpush.msra.mxu3 %v2008_v7  ;;  %1600 = vmatpush.msrb.mxu1 %v2009_v24  ;;  %v2053_v49 = vld [vmem:[#allocation2 + $0x188] sm:$0xff]  ;;  %v2054_v7 = vld [vmem:[#allocation2 + $0x210] sm:$0xff]  ;;  %v2055_v24 = vld [vmem:[#allocation2 + $0x180] sm:$0xff] }
 0x4ec   :  { %1525 = vmatpush.msrb.mxu0 %v2010_v18  ;;  %1619 = vmatpush.msrb.mxu2 %v2011_v2  ;;  %v2057_v18 = vld [vmem:[#allocation5 + $0x178] sm:$0xff]  ;;  %v2059_v2 = vld [vmem:[#allocation5 + $0x170] sm:$0xff] }
 0x4ed   :  { %1503 = vmatpush.msra.mxu3 %v2012_v46  ;;  %1601 = vmatpush.msrb.mxu1 %v2013_v30  ;;  %v2060_v46 = vld [vmem:[#allocation5 + $0x168] sm:$0xff]  ;;  %v2062_v30 = vld [vmem:[#allocation5 + $0x158] sm:$0xff] }
 0x4ee   :  { %1526 = vmatpush.msrb.mxu0 %v2014_v39  ;;  %1620 = vmatpush.msrb.mxu2 %v2015_v41  ;;  %v2063_v39 = vld [vmem:[#allocation5 + $0x150] sm:$0xff]  ;;  %v2065_v41 = vld [vmem:[#allocation5 + $0x140] sm:$0xff] }
 0x4ef   :  { %1504 = vmatpush.msra.mxu3 %v2016_v35  ;;  %1602 = vmatpush.msrb.mxu1 %v2017_v59  ;;  %v2069_v35 = vld [vmem:[#allocation5 + $0x120] sm:$0xff]  ;;  %v2071_v59 = vld [vmem:[#allocation5 + $0x110] sm:$0xff] }
 0x4f0   :  { %1318 = vmatmul.f32.gmra.mxu3 %v1285_v14  ;;  %1341 = vmatmul.f32.gmra.mxu0 %v1289_v52  ;;  %v2066_v14 = vld [vmem:[#allocation5 + $0x138] sm:$0xff]  ;;  %v2068_v52 = vld [vmem:[#allocation5 + $0x128] sm:$0xff] }
 0x4f1   :  { %1387 = vmatmul.f32.gmra.mxu2 %v1294_v44  ;;  %1505 = vmatpush.msra.mxu3 %v2018_v48  ;;  %v2072_v44 = vld [vmem:[#allocation5 + $0x108] sm:$0xff]  ;;  %v2073_v48 = vld [vmem:[#allocation5 + $0x100] sm:$0xff] }
 0x4f2   :  { %1527 = vmatpush.msrb.mxu0 %v2019_v61  ;;  %1621 = vmatpush.msrb.mxu2 %v2020_v0 }
 0x4f3   :  { %1506 = vmatpush.msra.mxu3 %v2021_v45  ;;  %1603 = vmatpush.msrb.mxu1 %v2022_v32 }
 0x4f4   :  { %1528 = vmatpush.msrb.mxu0 %v2023_v54  ;;  %1622 = vmatpush.msrb.mxu2 %v2024_v22 }
 0x4f5   :  { %1507 = vmatpush.msra.mxu3 %v2025_v1  ;;  %1604 = vmatpush.msrb.mxu1 %v2026_v9 }
 0x4f6   :  { %1529 = vmatpush.msrb.mxu0 %v2027_v11  ;;  %1623 = vmatpush.msrb.mxu2 %v2028_v50 }
 0x4f7   :  { %1508 = vmatpush.msra.mxu3 %v2029_v3  ;;  %1605 = vmatpush.msrb.mxu1 %v2030_v27 }
 0x4f8   :  { %1407 = vmatmul.f32.vlgmr.msrb.gmra.mxu3 %v1297_v12  ;;  %1530 = vmatpush.msrb.mxu0 %v2031_v20 }
 0x4f9   :  { %1509 = vmatpush.msra.mxu3 %v2032_v63  ;;  %1624 = vmatpush.msrb.mxu2 %v2033_v58  ;;  %v2074_v63 = vld [vmem:[#allocation5 + $0x1f8] sm:$0xff] }
 0x4fa   :  { %1531 = vmatpush.msrb.mxu0 %v2034_v28  ;;  %1606 = vmatpush.msrb.mxu1 %v2035_v34  ;;  %v2075_v34 = vld [vmem:[#allocation5 + $0x1f0] sm:$0xff] }
 0x4fb   :  { %1510 = vmatpush.msra.mxu3 %v2036_v5  ;;  %1625 = vmatpush.msrb.mxu2 %v2037_v6  ;;  %v2076_v6 = vld [vmem:[#allocation5 + $0x1e8] sm:$0xff] }
 0x4fc   :  { %1532 = vmatpush.msrb.mxu0 %v2038_v47  ;;  %1607 = vmatpush.msrb.mxu1 %v2039_v40 }
 0x4fd   :  { %1511 = vmatpush.msra.mxu3 %v2040_v8  ;;  %1626 = vmatpush.msrb.mxu2 %v2041_v38  ;;  %v2077_v8 = vld [vmem:[#allocation5 + $0x1e0] sm:$0xff] }
 0x4fe   :  { %1533 = vmatpush.msrb.mxu0 %v2042_v19  ;;  %1608 = vmatpush.msrb.mxu1 %v2043_v53 }
 0x4ff   :  { %1512 = vmatpush.msra.mxu3 %v2044_v21  ;;  %1627 = vmatpush.msrb.mxu2 %v2045_v60  ;;  %v2078_v21 = vld [vmem:[#allocation5 + $0x1d8] sm:$0xff] }
 0x500   :  { %1410 = vmatmul.f32.gmra.mxu3 %v1298_v42  ;;  %1534 = vmatpush.msrb.mxu0 %v2046_v17 }
 0x501   :  { %1513 = vmatpush.msra.mxu3 %v2047_v15  ;;  %1628 = vmatpush.msrb.mxu2 %v3657_v33  ;;  %v2056_v33 = vld [vmem:[#allocation2 + $0x208] sm:$0xff]  ;;  %v2079_v15 = vld [vmem:[#allocation5 + $0x278] sm:$0xff] }
 0x502   :  { %1535 = vmatpush.msrb.mxu0 %v2048_v51  ;;  %1609 = vmatpush.msrb.mxu1 %v2049_v10  ;;  %v2080_v51 = vld [vmem:[#allocation5 + $0x1d0] sm:$0xff] }
 0x503   :  { %1514 = vmatpush.msra.mxu3 %v2050_v36  ;;  %1629 = vmatpush.msrb.mxu2 %v3662_v43  ;;  %v2058_v43 = vld [vmem:[#allocation2 + $0x200] sm:$0xff]  ;;  %v2081_v10 = vld [vmem:[#allocation5 + $0x270] sm:$0xff]  ;;  %v2082_v36 = vld [vmem:[#allocation5 + $0x1c8] sm:$0xff] }
 0x504   :  { %1536 = vmatpush.msrb.mxu0 %v2051_v29  ;;  %1610 = vmatpush.msrb.mxu1 %v2052_v26  ;;  %v2083_v29 = vld [vmem:[#allocation5 + $0x268] sm:$0xff] }
 0x505   :  { %1515 = vmatpush.msra.mxu3 %v2053_v49  ;;  %1630 = vmatpush.msrb.mxu2 %v3668_v31  ;;  %v2061_v31 = vld [vmem:[#allocation5 + $0x160] sm:$0xff] }
 0x506   :  { %1537 = vmatpush.msrb.mxu0 %v2054_v7  ;;  %v2084_v7 = vld [vmem:[#allocation5 + $0x1c0] sm:$0xff] }
 0x507   :  { %1516 = vmatpush.msra.mxu3 %v2055_v24  ;;  %1631 = vmatpush.msrb.mxu2 %v3673_v13  ;;  %v2064_v13 = vld [vmem:[#allocation5 + $0x148] sm:$0xff] }
 0x508   :  { %1538 = vmatpush.msrb.mxu0 %v2056_v33  ;;  %v2085_v33 = vld [vmem:[#allocation5 + $0x260] sm:$0xff] }
 0x509   :  { %1641 = vmatpush.msrb.mxu3 %v2057_v18  ;;  %1632 = vmatpush.msrb.mxu2 %v3677_v23  ;;  %v2067_v23 = vld [vmem:[#allocation5 + $0x130] sm:$0xff] }
 0x50a   :  { %1539 = vmatpush.msrb.mxu0 %v2058_v43  ;;  %v2086_v43 = vld [vmem:[#allocation5 + $0x1b8] sm:$0xff] }
 0x50b   :  { %1642 = vmatpush.msrb.mxu3 %v2059_v2  ;;  %1633 = vmatpush.msrb.mxu2 %v3681_v37  ;;  %v2070_v37 = vld [vmem:[#allocation5 + $0x118] sm:$0xff] }
 0x50c   :  { %v2087_v2 = vld [vmem:[#allocation5 + $0x258] sm:$0xff] }
 0x50d   :  { %1643 = vmatpush.msrb.mxu3 %v2060_v46 }
 0x50f   :  { %1644 = vmatpush.msrb.mxu3 %v2061_v31  ;;  %v2088_v31 = vld [vmem:[#allocation5 + $0x1b0] sm:$0xff] }
 0x511   :  { %1645 = vmatpush.msrb.mxu3 %v2062_v30  ;;  %v2089_v30 = vld [vmem:[#allocation5 + $0x250] sm:$0xff] }
 0x513   :  { %1646 = vmatpush.msrb.mxu3 %v2063_v39 }
 0x515   :  { %1647 = vmatpush.msrb.mxu3 %v2064_v13  ;;  %v2090_v13 = vld [vmem:[#allocation5 + $0x1a8] sm:$0xff] }
 0x517   :  { %1648 = vmatpush.msrb.mxu3 %v2065_v41  ;;  %v2091_v41 = vld [vmem:[#allocation5 + $0x248] sm:$0xff] }
 0x519   :  { %1649 = vmatpush.msrb.mxu3 %v2066_v14  ;;  %v2092_v14 = vld [vmem:[#allocation5 + $0x240] sm:$0xff] }
 0x51b   :  { %1650 = vmatpush.msrb.mxu3 %v2067_v23  ;;  %v2093_v23 = vld [vmem:[#allocation5 + $0x1a0] sm:$0xff] }
 0x51d   :  { %1651 = vmatpush.msrb.mxu3 %v2068_v52  ;;  %v2094_v52 = vld [vmem:[#allocation5 + $0x238] sm:$0xff] }
 0x51f   :  { %1652 = vmatpush.msrb.mxu3 %v2069_v35  ;;  %v2095_v35 = vld [vmem:[#allocation5 + $0x198] sm:$0xff] }
 0x521   :  { %1653 = vmatpush.msrb.mxu3 %v2070_v37  ;;  %v2096_v37 = vld [vmem:[#allocation5 + $0x230] sm:$0xff] }
 0x523   :  { %1654 = vmatpush.msrb.mxu3 %v2071_v59  ;;  %v2097_v59 = vld [vmem:[#allocation5 + $0x190] sm:$0xff] }
 0x525   :  { %1655 = vmatpush.msrb.mxu3 %v2072_v44 }
 0x527   :  { %1656 = vmatpush.msrb.mxu3 %v2073_v48  ;;  %v2098_v48 = vld [vmem:[#allocation5 + $0x228] sm:$0xff] }
 0x55a   :  { %v1362_v45 = vpop.f32.mrf.mxu1 }
 0x562   :  { %v1365_v12 = vpop.f32.mrf.mxu1 }
 0x565   :  { %v1339_v0 = vpop.f32.mrf.mxu0 }
 0x56b   :  { %v1316_v61 = vpop.f32.mrf.mxu3 }
 0x56c   :  { %v1340_v4 = vadd.f32 %v1339_v0, %v1316_v61  ;;  %v1385_v22 = vpop.f32.mrf.mxu2  ;;  %v2099_v61 = vld [vmem:[#allocation5 + $0x220] sm:$0xff]  ;;  %v2100_v0 = vld [vmem:[#allocation5 + $0x188] sm:$0xff] }
 0x56d   :  { %v1342_v25 = vpop.f32.mrf.mxu0 }
 0x56e   :  { %v1363_v54 = vadd.f32 %v1362_v45, %v1340_v4  ;;  %v2101_v4 = vld [vmem:[#allocation5 + $0x218] sm:$0xff]  ;;  %v2102_v45 = vld [vmem:[#allocation5 + $0x180] sm:$0xff] }
 0x570   :  { %v1386_v1 = vadd.f32 %v1385_v22, %v1363_v54  ;;  %v2104_v54 = vld [vmem:[#allocation5 + $0x208] sm:$0xff]  ;;  %v2105_v22 = vld [vmem:[#allocation5 + $0x200] sm:$0xff] }
 0x573   :  { %v1319_v32 = vpop.f32.mrf.mxu3 }
 0x574   :  { %v1343_v9 = vadd.f32 %v1342_v25, %v1319_v32  ;;  %v1388_v20 = vpop.f32.mrf.mxu2  ;;  %v2103_v32 = vld [vmem:[#allocation5 + $0x210] sm:$0xff] }
 0x576   :  { %v1366_v3 = vadd.f32 %v1365_v12, %v1343_v9 }
 0x578   :  { %v1389_v58 = vadd.f32 %v1388_v20, %v1366_v3 }
 0x57b   :  { %v1408_v11 = vpop.f32.mrf.mxu3 }
 0x57c   :  { %v1409_v50 = vadd.f32 %v1408_v11, %v1386_v1 }
 0x57e   :  { %v3799_v27 = vmul.f32 %v1409_v50, %v3697_v16 }
 0x580   :  { %1494 = vmatmul.f32.vlgmr.msra.gmra.mxu2 %v3799_v27  ;;  %v1416_v40 = vrot.slane %v3799_v27, 2  ;;  %v1420_v16 = vrot.slane %v3799_v27, 1  ;;  %v1424_v53 = vrot.slane %v3799_v27, 7  ;;  %v1428_v46 = vrot.slane %v3799_v27, 6 }
 0x581   :  { %1734 = vmatpush.msra.mxu2 %v2074_v63 }
 0x583   :  { %v1411_v28 = vpop.f32.mrf.mxu3  ;;  %1735 = vmatpush.msra.mxu2 %v2075_v34 }
 0x584   :  { %v1412_v5 = vadd.f32 %v1411_v28, %v1389_v58 }
 0x585   :  { %1736 = vmatpush.msra.mxu2 %v2076_v6 }
 0x586   :  { %v3803_v47 = vmul.f32 %v1412_v5, %v3701_v55 }
 0x587   :  { %1737 = vmatpush.msra.mxu2 %v2077_v8 }
 0x588   :  { %1497 = vmatmul.f32.gmra.mxu2 %v3803_v47  ;;  %v1417_v38 = vrot.slane %v3803_v47, 2  ;;  %v1421_v19 = vrot.slane %v3803_v47, 1  ;;  %v1425_v42 = vrot.slane %v3803_v47, 7  ;;  %v1429_v18 = vrot.slane %v3803_v47, 6 }
 0x589   :  { %1738 = vmatpush.msra.mxu2 %v2078_v21 }
 0x58a   :  { %v1418_v55 = vsel %vm70_vm1, %v1416_v40, %v1417_v38  ;;  %v1422_v60 = vsel %vm75_vm2, %v1420_v16, %v1421_v19  ;;  %v1427_v17 = vsel %vm80_vm0, %v1425_v42, %v1424_v53  ;;  %v1419_v26 = vsel %vm70_vm1, %v1417_v38, %v1416_v40 }
 0x58b   :  { %1448 = vmatmul.f32.vlgmr.msra.gmra.mxu0 %v1418_v55  ;;  %1471 = vmatmul.f32.vlgmr.msra.gmra.mxu1 %v1422_v60  ;;  %v1423_v49 = vsel %vm75_vm2, %v1421_v19, %v1420_v16  ;;  %v1426_v24 = vsel %vm80_vm0, %v1424_v53, %v1425_v42  ;;  %v1431_v39 = vsel %vm85_vm3, %v1429_v18, %v1428_v46 }
 0x58c   :  { %1517 = vmatmul.f32.vlgmr.msra.gmra.mxu3 %v1427_v17  ;;  %1664 = vmatpush.msra.mxu0 %v2074_v63  ;;  %v1430_v44 = vsel %vm85_vm3, %v1428_v46, %v1429_v18 }
 0x58d   :  { %1750 = vmatpush.msra.mxu3 %v2079_v15  ;;  %1687 = vmatpush.msra.mxu1 %v2079_v15 }
 0x58e   :  { %1665 = vmatpush.msra.mxu0 %v2075_v34  ;;  %1739 = vmatpush.msra.mxu2 %v2080_v51 }
 0x58f   :  { %1751 = vmatpush.msra.mxu3 %v2081_v10  ;;  %1688 = vmatpush.msra.mxu1 %v2081_v10 }
 0x590   :  { %1666 = vmatpush.msra.mxu0 %v2076_v6  ;;  %1740 = vmatpush.msra.mxu2 %v2082_v36 }
 0x591   :  { %1752 = vmatpush.msra.mxu3 %v2083_v29  ;;  %1689 = vmatpush.msra.mxu1 %v2083_v29 }
 0x592   :  { %1667 = vmatpush.msra.mxu0 %v2077_v8  ;;  %1741 = vmatpush.msra.mxu2 %v2084_v7 }
 0x593   :  { %1451 = vmatmul.f32.gmra.mxu0 %v1419_v26  ;;  %1474 = vmatmul.f32.gmra.mxu1 %v1423_v49 }
 0x594   :  { %1520 = vmatmul.f32.gmra.mxu3 %v1426_v24  ;;  %1668 = vmatpush.msra.mxu0 %v2078_v21 }
 0x595   :  { %1753 = vmatpush.msra.mxu3 %v2085_v33  ;;  %1690 = vmatpush.msra.mxu1 %v2085_v33 }
 0x596   :  { %1669 = vmatpush.msra.mxu0 %v2080_v51  ;;  %1742 = vmatpush.msra.mxu2 %v2086_v43 }
 0x597   :  { %1754 = vmatpush.msra.mxu3 %v2087_v2  ;;  %1691 = vmatpush.msra.mxu1 %v2087_v2 }
 0x598   :  { %1670 = vmatpush.msra.mxu0 %v2082_v36  ;;  %1743 = vmatpush.msra.mxu2 %v2088_v31 }
 0x599   :  { %1755 = vmatpush.msra.mxu3 %v2089_v30  ;;  %1692 = vmatpush.msra.mxu1 %v2089_v30 }
 0x59a   :  { %1671 = vmatpush.msra.mxu0 %v2084_v7  ;;  %1744 = vmatpush.msra.mxu2 %v2090_v13 }
 0x59b   :  { %1540 = vmatmul.f32.vlgmr.msrb.gmra.mxu0 %v1431_v39  ;;  %1756 = vmatpush.msra.mxu3 %v2091_v41 }
 0x59c   :  { %1672 = vmatpush.msra.mxu0 %v2086_v43  ;;  %1693 = vmatpush.msra.mxu1 %v2091_v41 }
 0x59d   :  { %1757 = vmatpush.msra.mxu3 %v2092_v14  ;;  %1745 = vmatpush.msra.mxu2 %v2093_v23 }
 0x59e   :  { %1673 = vmatpush.msra.mxu0 %v2088_v31  ;;  %1694 = vmatpush.msra.mxu1 %v2092_v14 }
 0x59f   :  { %1758 = vmatpush.msra.mxu3 %v2094_v52  ;;  %1746 = vmatpush.msra.mxu2 %v2095_v35 }
 0x5a0   :  { %1674 = vmatpush.msra.mxu0 %v2090_v13  ;;  %1695 = vmatpush.msra.mxu1 %v2094_v52 }
 0x5a1   :  { %1759 = vmatpush.msra.mxu3 %v2096_v37  ;;  %1747 = vmatpush.msra.mxu2 %v2097_v59 }
 0x5a2   :  { %1675 = vmatpush.msra.mxu0 %v2093_v23  ;;  %1696 = vmatpush.msra.mxu1 %v2096_v37 }
 0x5a3   :  { %1543 = vmatmul.f32.gmra.mxu0 %v1430_v44  ;;  %1760 = vmatpush.msra.mxu3 %v2098_v48 }
 0x5a4   :  { %1676 = vmatpush.msra.mxu0 %v2095_v35  ;;  %1697 = vmatpush.msra.mxu1 %v2098_v48 }
 0x5a5   :  { %1761 = vmatpush.msra.mxu3 %v2099_v61  ;;  %1748 = vmatpush.msra.mxu2 %v2100_v0 }
 0x5a6   :  { %1677 = vmatpush.msra.mxu0 %v2097_v59  ;;  %1698 = vmatpush.msra.mxu1 %v2099_v61 }
 0x5a7   :  { %1762 = vmatpush.msra.mxu3 %v2101_v4  ;;  %1749 = vmatpush.msra.mxu2 %v2102_v45 }
 0x5a8   :  { %1678 = vmatpush.msra.mxu0 %v2100_v0  ;;  %1699 = vmatpush.msra.mxu1 %v2101_v4 }
 0x5a9   :  { %1763 = vmatpush.msra.mxu3 %v2103_v32 }
 0x5aa   :  { %1679 = vmatpush.msra.mxu0 %v2102_v45  ;;  %1700 = vmatpush.msra.mxu1 %v2103_v32 }
 0x5ab   :  { %1764 = vmatpush.msra.mxu3 %v2104_v54 }
 0x5ac   :  { %1701 = vmatpush.msra.mxu1 %v2104_v54 }
 0x5ad   :  { %1765 = vmatpush.msra.mxu3 %v2105_v22 }
 0x5ae   :  { %1702 = vmatpush.msra.mxu1 %v2105_v22 }
 0x603   :  { %v1495_v50 = vpop.f32.mrf.mxu2 }
 0x608   :  { %v1449_v25 = vpop.f32.mrf.mxu0  ;;  %v1472_v1 = vpop.f32.mrf.mxu1 }
 0x609   :  { %v1473_v11 = vadd.f32 %v1472_v1, %v1449_v25 }
 0x60b   :  { %v1496_v3 = vadd.f32 %v1495_v50, %v1473_v11  ;;  %v1498_v6 = vpop.f32.mrf.mxu2 }
 0x60f   :  { %v1518_v12 = vpop.f32.mrf.mxu3 }
 0x610   :  { %v1452_v9 = vpop.f32.mrf.mxu0  ;;  %v1475_v20 = vpop.f32.mrf.mxu1  ;;  %v1519_v63 = vadd.f32 %v1518_v12, %v1496_v3 }
 0x611   :  { %v1476_v28 = vadd.f32 %v1475_v20, %v1452_v9 }
 0x613   :  { %v1499_v16 = vadd.f32 %v1498_v6, %v1476_v28 }
 0x617   :  { %v1521_v40 = vpop.f32.mrf.mxu3 }
 0x618   :  { %v1541_v58 = vpop.f32.mrf.mxu0  ;;  %v1522_v8 = vadd.f32 %v1521_v40, %v1499_v16 }
 0x619   :  { %v1542_v34 = vadd.f32 %v1541_v58, %v1519_v63 }
 0x61b   :  { %v1547_v5 = vmax.f32 %v1542_v34, 1e-12 }
 0x61d   :  { %1788 = vrcp.f32 %v1547_v5  ;;  %v1560_v60 = vand.u32 2147483648, %v1547_v5  ;;  %v1558_v15 = vand.u32 2147483647, %v1547_v5  ;;  %vm1554_vm13 = vweird.f32 %v1547_v5 }
 0x61f   :  { %v1561_v36 = vor.u32 1.1754944e-38, %v1560_v60  ;;  %vm1559_vm15 = vcmp.eq.f32.partialorder %v1558_v15, 8.507059e+37 }
 0x620   :  { %v1544_v38 = vpop.f32.mrf.mxu0 }
 0x621   :  { %v1545_v19 = vadd.f32 %v1544_v38, %v1522_v8 }
 0x623   :  { %v1789_v53 = vpop.eup %1788  ;;  %v1548_v42 = vmax.f32 %v1545_v19, 1e-12 }
 0x624   :  { %v1550_v21 = vmul.f32 %v1789_v53, %v1547_v5  ;;  %vm1555_vm12 = vweird.f32 %v1789_v53 }
 0x625   :  { %1790 = vrcp.f32 %v1548_v42  ;;  %vm1556_vm14 = vmor %vm1554_vm13, %vm1555_vm12  ;;  %v1575_v33 = vand.u32 2147483648, %v1548_v42  ;;  %v1573_v43 = vand.u32 2147483647, %v1548_v42  ;;  %vm1569_vm5 = vweird.f32 %v1548_v42 }
 0x626   :  { %v1551_v55 = vsub.f32 1.0, %v1550_v21 }
 0x627   :  { %v1576_v46 = vor.u32 1.1754944e-38, %v1575_v33  ;;  %vm1574_vm7 = vcmp.eq.f32.partialorder %v1573_v43, 8.507059e+37 }
 0x628   :  { %v1552_v17 = vmul.f32 %v1789_v53, %v1551_v55 }
 0x62a   :  { %v1553_v51 = vadd.f32 %v1789_v53, %v1552_v17 }
 0x62b   :  { %v1791_v10 = vpop.eup %1790 }
 0x62c   :  { %v1565_v29 = vmul.f32 %v1791_v10, %v1548_v42  ;;  %v1557_v26 = vsel %vm1556_vm14, %v1789_v53, %v1553_v51  ;;  %vm1570_vm4 = vweird.f32 %v1791_v10 }
 0x62d   :  { %v1562_v49 = vsel %vm1559_vm15, %v1561_v36, %v1557_v26  ;;  %vm1571_vm6 = vmor %vm1569_vm5, %vm1570_vm4 }
 0x62e   :  { %v1566_v7 = vsub.f32 1.0, %v1565_v29  ;;  %v1563_v24 = vmul.f32 %v1562_v49, %v2405_v56 }
 0x630   :  { %v1567_v18 = vmul.f32 %v1791_v10, %v1566_v7  ;;  %1657 = vmatmul.f32.vlgmr.msrb.gmra.mxu3 %v1563_v24  ;;  %v1579_v13 = vrot.slane %v1563_v24, 6  ;;  %v1583_v41 = vrot.slane %v1563_v24, 7  ;;  %v1587_v56 = vrot.slane %v1563_v24, 1 }
 0x632   :  { %v1568_v2 = vadd.f32 %v1791_v10, %v1567_v18 }
 0x634   :  { %v1572_v31 = vsel %vm1571_vm6, %v1791_v10, %v1568_v2 }
 0x635   :  { %v1577_v30 = vsel %vm1574_vm7, %v1576_v46, %v1572_v31 }
 0x636   :  { %v1578_v39 = vmul.f32 %v1577_v30, %v2407_v57  ;;  %v1591_v57 = vrot.slane %v1563_v24, 2 }
 0x638   :  { %1660 = vmatmul.f32.gmra.mxu3 %v1578_v39  ;;  %v1580_v14 = vrot.slane %v1578_v39, 6  ;;  %v1584_v23 = vrot.slane %v1578_v39, 7  ;;  %v1588_v52 = vrot.slane %v1578_v39, 1  ;;  %v1592_v44 = vrot.slane %v1578_v39, 2 }
 0x63a   :  { %v1582_v35 = vsel %vm85_vm3, %v1580_v14, %v1579_v13  ;;  %v1586_v37 = vsel %vm80_vm0, %v1584_v23, %v1583_v41  ;;  %v1589_v59 = vsel %vm75_vm2, %v1587_v56, %v1588_v52  ;;  %v1594_v48 = vsel %vm70_vm1, %v1592_v44, %v1591_v57 }
 0x63b   :  { %1611 = vmatmul.f32.vlgmr.msrb.gmra.mxu1 %v1582_v35  ;;  %1634 = vmatmul.f32.vlgmr.msrb.gmra.mxu2 %v1586_v37  ;;  %v1581_v61 = vsel %vm85_vm3, %v1579_v13, %v1580_v14  ;;  %v1585_v0 = vsel %vm80_vm0, %v1583_v41, %v1584_v23  ;;  %v1590_v4 = vsel %vm75_vm2, %v1588_v52, %v1587_v56 }
 0x63c   :  { %1680 = vmatmul.f32.vlgmr.msra.gmra.mxu0 %v1589_v59  ;;  %v1593_v45 = vsel %vm70_vm1, %v1591_v57, %v1592_v44 }
 0x640   :  { %1706 = vmatmul.f32.vlgmr.msra.gmra.mxu3 %v1594_v48 }
 0x643   :  { %1614 = vmatmul.f32.gmra.mxu1 %v1581_v61  ;;  %1637 = vmatmul.f32.gmra.mxu2 %v1585_v0 }
 0x64b   :  { %1683 = vmatmul.f32.vlgmr.msra.gmra.mxu2 %v1590_v4  ;;  %1703 = vmatmul.f32.vlgmr.msra.gmra.mxu1 %v1593_v45 }
 0x6b3   :  { %v1658_v54 = vpop.f32.mrf.mxu3 }
 0x6b8   :  { %v1612_v32 = vpop.f32.mrf.mxu1 }
 0x6b9   :  { %v1681_v11 = vpop.f32.mrf.mxu0 }
 0x6bb   :  { %v1661_v50 = vpop.f32.mrf.mxu3 }
 0x6be   :  { %v1635_v22 = vpop.f32.mrf.mxu2 }
 0x6bf   :  { %v1636_v25 = vadd.f32 %v1635_v22, %v1612_v32 }
 0x6c0   :  { %v1615_v1 = vpop.f32.mrf.mxu1 }
 0x6c1   :  { %v1659_v9 = vadd.f32 %v1658_v54, %v1636_v25 }
 0x6c3   :  { %v1682_v3 = vadd.f32 %v1681_v11, %v1659_v9  ;;  %v1707_v6 = vpop.f32.mrf.mxu3 }
 0x6c6   :  { %v1638_v12 = vpop.f32.mrf.mxu2 }
 0x6c7   :  { %v1639_v63 = vadd.f32 %v1638_v12, %v1615_v1 }
 0x6c8   :  { %v1704_v20 = vpop.f32.mrf.mxu1 }
 0x6c9   :  { %v1705_v58 = vadd.f32 %v1704_v20, %v1682_v3  ;;  %v1662_v62 = vadd.f32 %v1661_v50, %v1639_v63 }
 0x6cb   :  { %v1710_v28 = vmul.f32 %v1705_v58, %v3799_v27 }
 0x6cd   :  { %1712 = vst [vmem:[#allocation8] sm:$0xff] %v1710_v28 }
 0x6ce   :  { %v1684_v34 = vpop.f32.mrf.mxu2 }
 0x6cf   :  { %v1685_v5 = vadd.f32 %v1684_v34, %v1662_v62 }
 0x6d1   :  { %v1708_v40 = vadd.f32 %v1707_v6, %v1685_v5 }
 0x6d3   :  { %v1711_v16 = vmul.f32 %v1708_v40, %v3803_v47 }
 0x6d5   :  { %1713 = vst [vmem:[#allocation8 + $0x8] sm:$0xff] %v1711_v16 }
 0x6d6   :  { %1726 = dma.vmem_to_hbm [thread:$0]  %s1719_s27, 256, %s1721_s30, [#allocation4], %s2209_s20, %s2209_s20, %s2210_s21  }
 0x6d7   :  { %2206 = dma.done.wait [#allocation4], 256  }
 0x6d8   :  { %2207 = vsyncadd [#allocation4], 4294967040 }
 0x6d9   :  { %1731 = vsyncpa [#allocation3], 1 }
 0x6da   :  { %1732 = vsyncpa [#allocation6], 1 }
 0x6db   :  { %1733 = vsyncpa [#allocation4], 1 }

</bundles_post_ra>
